<compile_context>
chip_gen: v6e
topology: v6e:2x2x1
jax: 0.10.0
libtpu: 0.0.40
codegen_flags: <defaults>
</compile_context>

<pallas_src>
import math

import jax
import jax.numpy as jnp
from jax import lax
from jax.experimental import pallas as pl
from jax.experimental.pallas import tpu as pltpu

HEADS = 8
D_MODEL = 256
HEAD_DIM = D_MODEL // HEADS      # 32
D_FFN = 4 * D_MODEL              # 1024
LN_EPS = 1e-5                    # torch.nn.LayerNorm default


def _layer_norm(x, gamma, beta):
    mean = jnp.mean(x, axis=-1, keepdims=True)
    xc = x - mean
    var = jnp.mean(xc * xc, axis=-1, keepdims=True)
    return xc * lax.rsqrt(var + LN_EPS) * gamma + beta


def _gelu_exact(x):
    # torch.nn.GELU() default (erf-based) formulation.
    return 0.5 * x * (1.0 + lax.erf(x * (1.0 / math.sqrt(2.0))))


def _self_transformer_kernel(x_ref, wqkv_ref, bqkv_ref, wo_ref, bo_ref,
                             g1_ref, beta1_ref, w1_ref, b1_ref,
                             w2_ref, b2_ref, g2_ref, beta2_ref, out_ref):
    x = x_ref[0]                                   # (S, D) f32
    xb = x.astype(jnp.bfloat16)

    # ---- fused QKV projection: one MXU pass, 768-wide lane-aligned output
    qkv = jnp.dot(xb, wqkv_ref[...], preferred_element_type=jnp.float32)
    qkv = qkv + bqkv_ref[...]

    # ---- multi-head scaled-dot-product attention (S is small -> per-head loop)
    scale = 1.0 / math.sqrt(HEAD_DIM)
    head_outs = []
    for h in range(HEADS):
        lo = h * HEAD_DIM
        q = qkv[:, lo:lo + HEAD_DIM]
        k = qkv[:, D_MODEL + lo:D_MODEL + lo + HEAD_DIM]
        v = qkv[:, 2 * D_MODEL + lo:2 * D_MODEL + lo + HEAD_DIM]
        # q @ k^T without an explicit transpose (MXU handles transposed RHS).
        logits = lax.dot_general(q, k, (((1,), (1,)), ((), ())),
                                 preferred_element_type=jnp.float32) * scale
        logits = logits - jnp.max(logits, axis=-1, keepdims=True)
        p = jnp.exp(logits)
        p = p / jnp.sum(p, axis=-1, keepdims=True)
        head_outs.append(jnp.dot(p, v, preferred_element_type=jnp.float32))
    attn = jnp.concatenate(head_outs, axis=-1)      # (S, D) f32

    attn = jnp.dot(attn.astype(jnp.bfloat16), wo_ref[...],
                   preferred_element_type=jnp.float32) + bo_ref[...]

    # ---- residual + LayerNorm 1 (f32)
    h1 = _layer_norm(attn + x, g1_ref[...], beta1_ref[...])

    # ---- FFN: Linear(256,1024) -> GELU -> (Dropout=id) -> Linear(1024,256)
    f = jnp.dot(h1.astype(jnp.bfloat16), w1_ref[...],
                preferred_element_type=jnp.float32) + b1_ref[...]
    f = _gelu_exact(f)
    f = jnp.dot(f.astype(jnp.bfloat16), w2_ref[...],
                preferred_element_type=jnp.float32) + b2_ref[...]

    # ---- residual + LayerNorm 2 (f32)
    out = _layer_norm(f + h1, g2_ref[...], beta2_ref[...])
    out_ref[0] = out.astype(out_ref.dtype)


@jax.jit
def self_transformer_forward(x, params):
    """x: (B, S, 256) f32 -> (B, S, 256) f32. Eval-mode forward, mask=None."""
    B, S, D = x.shape
    assert D == D_MODEL
    (wqkv, bqkv, wo, bo, g1, be1, w1, b1, w2, b2, g2, be2) = params

    # bf16 weights: full MXU rate + halved weight HBM/VMEM traffic.
    wqkv_b = wqkv.astype(jnp.bfloat16)
    wo_b = wo.astype(jnp.bfloat16)
    w1_b = w1.astype(jnp.bfloat16)
    w2_b = w2.astype(jnp.bfloat16)

    def const(shape):
        return pl.BlockSpec(shape, lambda b: (0, 0))

    return pl.pallas_call(
        _self_transformer_kernel,
        out_shape=jax.ShapeDtypeStruct((B, S, D), jnp.float32),
        grid_spec=pltpu.PrefetchScalarGridSpec(
            num_scalar_prefetch=0,
            grid=(B,),
            in_specs=[
                pl.BlockSpec((1, S, D), lambda b: (b, 0, 0)),   # x
                const((D, 3 * D)),                              # wqkv (fused)
                const((1, 3 * D)),                              # bqkv
                const((D, D)),                                  # wo
                const((1, D)),                                  # bo
                const((1, D)),                                  # ln1 gamma
                const((1, D)),                                  # ln1 beta
                const((D, D_FFN)),                              # w1
                const((1, D_FFN)),                              # b1
                const((D_FFN, D)),                              # w2
                const((1, D)),                                  # b2
                const((1, D)),                                  # ln2 gamma
                const((1, D)),                                  # ln2 beta
            ],
            out_specs=pl.BlockSpec((1, S, D), lambda b: (b, 0, 0)),
        ),
        compiler_params=pltpu.CompilerParams(
            dimension_semantics=("parallel",)),
    )(x, wqkv_b, bqkv, wo_b, bo, g1, be1, w1_b, b1, w2_b, b2, g2, be2)


def init_params(key):
    """Deterministic params matching the PyTorch layer shapes.

    Linear weights stored as (in_features, out_features) so the kernel does
    x @ W.  QKV in-proj is pre-fused into a single (256, 768) weight.
    """
    def linear(k, fan_in, fan_out):
        kw, kb = jax.random.split(k)
        bound = 1.0 / math.sqrt(fan_in)
        w = jax.random.uniform(kw, (fan_in, fan_out), jnp.float32, -bound, bound)
        b = jax.random.uniform(kb, (1, fan_out), jnp.float32, -bound, bound)
        return w, b

    k1, k2, k3, k4 = jax.random.split(key, 4)
    wqkv, bqkv = linear(k1, D_MODEL, 3 * D_MODEL)   # MHA in_proj (q|k|v fused)
    wo, bo = linear(k2, D_MODEL, D_MODEL)           # MHA out_proj
    w1, b1 = linear(k3, D_MODEL, D_FFN)             # ffn[0]: Linear(256, 1024)
    w2, b2 = linear(k4, D_FFN, D_MODEL)             # ffn[3]: Linear(1024, 256)
    g1 = jnp.ones((1, D_MODEL), jnp.float32)        # LayerNorm default init
    be1 = jnp.zeros((1, D_MODEL), jnp.float32)
    g2 = jnp.ones((1, D_MODEL), jnp.float32)
    be2 = jnp.zeros((1, D_MODEL), jnp.float32)
    return (wqkv, bqkv, wo, bo, g1, be1, w1, b1, w2, b2, g2, be2)


def _reference(x, params):
    """Pure-JAX f32 reference reproducing the PyTorch forward (eval mode)."""
    (wqkv, bqkv, wo, bo, g1, be1, w1, b1, w2, b2, g2, be2) = params
    B, S, D = x.shape
    qkv = x @ wqkv + bqkv
    q, k, v = jnp.split(qkv, 3, axis=-1)

    def heads(t):
        return t.reshape(B, S, HEADS, HEAD_DIM).transpose(0, 2, 1, 3)

    q, k, v = heads(q), heads(k), heads(v)
    logits = jnp.einsum('bhqd,bhkd->bhqk', q, k) / math.sqrt(HEAD_DIM)
    p = jax.nn.softmax(logits, axis=-1)
    attn = jnp.einsum('bhqk,bhkd->bhqd', p, v).transpose(0, 2, 1, 3).reshape(B, S, D)
    attn = attn @ wo + bo

    def ln(t, g, b_):
        m = t.mean(-1, keepdims=True)
        var = ((t - m) ** 2).mean(-1, keepdims=True)
        return (t - m) / jnp.sqrt(var + LN_EPS) * g + b_

    h = ln(attn + x, g1, be1)
    f = h @ w1 + b1
    f = 0.5 * f * (1.0 + jax.scipy.special.erf(f / math.sqrt(2.0)))
    f = f @ w2 + b2
    return ln(f + h, g2, be2)


if __name__ == "__main__":
    key = jax.random.PRNGKey(0)
    kp, kx = jax.random.split(key)

    B, S = 2, 16                      # small demo shapes; dim fixed at 256 by the module
    params = init_params(kp)
    x = jax.random.normal(kx, (B, S, D_MODEL), dtype=jnp.float32)

    out = self_transformer_forward(x, params)
    jax.block_until_ready(out)
    assert out.shape == (B, S, D_MODEL), out.shape

    ref = _reference(x, params)
    # bf16 matmul inputs with f32 accumulation vs. full-f32 reference.
    max_err = float(jnp.max(jnp.abs(out - ref)))
    assert jnp.allclose(out, ref, atol=2e-2, rtol=2e-2), max_err

    print("KERNEL_OK")
</pallas_src>

<mosaic_0001>
module attributes {stable_mosaic.version = 11 : i64} {
  func.func @_self_transformer_kernel(%arg0: i32, %arg1: memref<1x16x256xf32, #tpu.memory_space<vmem>>, %arg2: memref<256x768xbf16, #tpu.memory_space<vmem>>, %arg3: memref<1x768xf32, #tpu.memory_space<vmem>>, %arg4: memref<256x256xbf16, #tpu.memory_space<vmem>>, %arg5: memref<1x256xf32, #tpu.memory_space<vmem>>, %arg6: memref<1x256xf32, #tpu.memory_space<vmem>>, %arg7: memref<1x256xf32, #tpu.memory_space<vmem>>, %arg8: memref<256x1024xbf16, #tpu.memory_space<vmem>>, %arg9: memref<1x1024xf32, #tpu.memory_space<vmem>>, %arg10: memref<1024x256xbf16, #tpu.memory_space<vmem>>, %arg11: memref<1x256xf32, #tpu.memory_space<vmem>>, %arg12: memref<1x256xf32, #tpu.memory_space<vmem>>, %arg13: memref<1x256xf32, #tpu.memory_space<vmem>>, %arg14: memref<1x16x256xf32, #tpu.memory_space<vmem>>) attributes {dimension_semantics = [#tpu.dimension_semantics<parallel>], iteration_bounds = array<i64: 2>, scalar_prefetch = 0 : i64, scratch_operands = 0 : i64, tpu.core_type = #tpu.core_type<tc>, window_params = [{transform_indices = @transform_0, window_bounds = array<i64: 1, 16, 256>}, {pipeline_mode = #tpu.pipeline_mode<synchronous>, transform_indices = @transform_1, window_bounds = array<i64: 256, 768>}, {pipeline_mode = #tpu.pipeline_mode<synchronous>, transform_indices = @transform_2, window_bounds = array<i64: 1, 768>}, {pipeline_mode = #tpu.pipeline_mode<synchronous>, transform_indices = @transform_3, window_bounds = array<i64: 256, 256>}, {pipeline_mode = #tpu.pipeline_mode<synchronous>, transform_indices = @transform_4, window_bounds = array<i64: 1, 256>}, {pipeline_mode = #tpu.pipeline_mode<synchronous>, transform_indices = @transform_5, window_bounds = array<i64: 1, 256>}, {pipeline_mode = #tpu.pipeline_mode<synchronous>, transform_indices = @transform_6, window_bounds = array<i64: 1, 256>}, {pipeline_mode = #tpu.pipeline_mode<synchronous>, transform_indices = @transform_7, window_bounds = array<i64: 256, 1024>}, {pipeline_mode = #tpu.pipeline_mode<synchronous>, transform_indices = @transform_8, window_bounds = array<i64: 1, 1024>}, {pipeline_mode = #tpu.pipeline_mode<synchronous>, transform_indices = @transform_9, window_bounds = array<i64: 1024, 256>}, {pipeline_mode = #tpu.pipeline_mode<synchronous>, transform_indices = @transform_10, window_bounds = array<i64: 1, 256>}, {pipeline_mode = #tpu.pipeline_mode<synchronous>, transform_indices = @transform_11, window_bounds = array<i64: 1, 256>}, {pipeline_mode = #tpu.pipeline_mode<synchronous>, transform_indices = @transform_12, window_bounds = array<i64: 1, 256>}, {transform_indices = @transform_13, window_bounds = array<i64: 1, 16, 256>}]} {
    %c0 = arith.constant 0 : index
    %c0_0 = arith.constant 0 : index
    %c0_1 = arith.constant 0 : index
    %0 = vector.load %arg1[%c0, %c0_0, %c0_1] : memref<1x16x256xf32, #tpu.memory_space<vmem>>, vector<1x16x256xf32>
    %1 = vector.shape_cast %0 : vector<1x16x256xf32> to vector<16x256xf32>
    %2 = arith.truncf %1 : vector<16x256xf32> to vector<16x256xbf16>
    %c0_2 = arith.constant 0 : index
    %c0_3 = arith.constant 0 : index
    %3 = vector.load %arg2[%c0_2, %c0_3] : memref<256x768xbf16, #tpu.memory_space<vmem>>, vector<256x768xbf16>
    %cst = arith.constant dense<0.000000e+00> : vector<16x768xf32>
    %4 = tpu.matmul %2, %3, %cst {dimension_numbers = #tpu.dot_dimension_numbers<[1], [0], [0], [1], [0, 0, 1, 1], [], []>} : vector<16x256xbf16>, vector<256x768xbf16>, vector<16x768xf32> -> vector<16x768xf32>
    %c0_4 = arith.constant 0 : index
    %c0_5 = arith.constant 0 : index
    %5 = vector.load %arg3[%c0_4, %c0_5] : memref<1x768xf32, #tpu.memory_space<vmem>>, vector<1x768xf32>
    %6 = vector.broadcast %5 : vector<1x768xf32> to vector<16x768xf32>
    %7 = arith.addf %4, %6 : vector<16x768xf32>
    %8 = vector.extract_strided_slice %7 {offsets = [0, 0], sizes = [16, 32], strides = [1, 1]} : vector<16x768xf32> to vector<16x32xf32>
    %9 = vector.extract_strided_slice %7 {offsets = [0, 256], sizes = [16, 32], strides = [1, 1]} : vector<16x768xf32> to vector<16x32xf32>
    %10 = vector.extract_strided_slice %7 {offsets = [0, 512], sizes = [16, 32], strides = [1, 1]} : vector<16x768xf32> to vector<16x32xf32>
    %cst_6 = arith.constant dense<0.000000e+00> : vector<16x16xf32>
    %11 = tpu.matmul %8, %9, %cst_6 {dimension_numbers = #tpu.dot_dimension_numbers<[1], [1], [0], [0], [0, 0, 1, 0], [], []>} : vector<16x32xf32>, vector<16x32xf32>, vector<16x16xf32> -> vector<16x16xf32>
    %cst_7 = arith.constant 0.176776692 : f32
    %12 = vector.broadcast %cst_7 : f32 to vector<16x16xf32>
    %13 = arith.mulf %11, %12 : vector<16x16xf32>
    %cst_8 = arith.constant dense<0xFF800000> : vector<16xf32>
    %14 = vector.multi_reduction <maximumf>, %13, %cst_8 [1] : vector<16x16xf32> to vector<16xf32>
    %15 = vector.shape_cast %14 : vector<16xf32> to vector<16x1xf32>
    %16 = vector.broadcast %15 : vector<16x1xf32> to vector<16x16xf32>
    %17 = arith.subf %13, %16 : vector<16x16xf32>
    %18 = math.exp %17 : vector<16x16xf32>
    %cst_9 = arith.constant dense<0.000000e+00> : vector<16xf32>
    %19 = vector.multi_reduction <add>, %18, %cst_9 [1] : vector<16x16xf32> to vector<16xf32>
    %20 = vector.shape_cast %19 : vector<16xf32> to vector<16x1xf32>
    %21 = vector.broadcast %20 : vector<16x1xf32> to vector<16x16xf32>
    %22 = arith.divf %18, %21 : vector<16x16xf32>
    %cst_10 = arith.constant dense<0.000000e+00> : vector<16x32xf32>
    %23 = tpu.matmul %22, %10, %cst_10 {dimension_numbers = #tpu.dot_dimension_numbers<[1], [0], [0], [1], [0, 0, 1, 1], [], []>} : vector<16x16xf32>, vector<16x32xf32>, vector<16x32xf32> -> vector<16x32xf32>
    %24 = vector.extract_strided_slice %7 {offsets = [0, 32], sizes = [16, 32], strides = [1, 1]} : vector<16x768xf32> to vector<16x32xf32>
    %25 = vector.extract_strided_slice %7 {offsets = [0, 288], sizes = [16, 32], strides = [1, 1]} : vector<16x768xf32> to vector<16x32xf32>
    %26 = vector.extract_strided_slice %7 {offsets = [0, 544], sizes = [16, 32], strides = [1, 1]} : vector<16x768xf32> to vector<16x32xf32>
    %cst_11 = arith.constant dense<0.000000e+00> : vector<16x16xf32>
    %27 = tpu.matmul %24, %25, %cst_11 {dimension_numbers = #tpu.dot_dimension_numbers<[1], [1], [0], [0], [0, 0, 1, 0], [], []>} : vector<16x32xf32>, vector<16x32xf32>, vector<16x16xf32> -> vector<16x16xf32>
    %cst_12 = arith.constant 0.176776692 : f32
    %28 = vector.broadcast %cst_12 : f32 to vector<16x16xf32>
    %29 = arith.mulf %27, %28 : vector<16x16xf32>
    %cst_13 = arith.constant dense<0xFF800000> : vector<16xf32>
    %30 = vector.multi_reduction <maximumf>, %29, %cst_13 [1] : vector<16x16xf32> to vector<16xf32>
    %31 = vector.shape_cast %30 : vector<16xf32> to vector<16x1xf32>
    %32 = vector.broadcast %31 : vector<16x1xf32> to vector<16x16xf32>
    %33 = arith.subf %29, %32 : vector<16x16xf32>
    %34 = math.exp %33 : vector<16x16xf32>
    %cst_14 = arith.constant dense<0.000000e+00> : vector<16xf32>
    %35 = vector.multi_reduction <add>, %34, %cst_14 [1] : vector<16x16xf32> to vector<16xf32>
    %36 = vector.shape_cast %35 : vector<16xf32> to vector<16x1xf32>
    %37 = vector.broadcast %36 : vector<16x1xf32> to vector<16x16xf32>
    %38 = arith.divf %34, %37 : vector<16x16xf32>
    %cst_15 = arith.constant dense<0.000000e+00> : vector<16x32xf32>
    %39 = tpu.matmul %38, %26, %cst_15 {dimension_numbers = #tpu.dot_dimension_numbers<[1], [0], [0], [1], [0, 0, 1, 1], [], []>} : vector<16x16xf32>, vector<16x32xf32>, vector<16x32xf32> -> vector<16x32xf32>
    %40 = vector.extract_strided_slice %7 {offsets = [0, 64], sizes = [16, 32], strides = [1, 1]} : vector<16x768xf32> to vector<16x32xf32>
    %41 = vector.extract_strided_slice %7 {offsets = [0, 320], sizes = [16, 32], strides = [1, 1]} : vector<16x768xf32> to vector<16x32xf32>
    %42 = vector.extract_strided_slice %7 {offsets = [0, 576], sizes = [16, 32], strides = [1, 1]} : vector<16x768xf32> to vector<16x32xf32>
    %cst_16 = arith.constant dense<0.000000e+00> : vector<16x16xf32>
    %43 = tpu.matmul %40, %41, %cst_16 {dimension_numbers = #tpu.dot_dimension_numbers<[1], [1], [0], [0], [0, 0, 1, 0], [], []>} : vector<16x32xf32>, vector<16x32xf32>, vector<16x16xf32> -> vector<16x16xf32>
    %cst_17 = arith.constant 0.176776692 : f32
    %44 = vector.broadcast %cst_17 : f32 to vector<16x16xf32>
    %45 = arith.mulf %43, %44 : vector<16x16xf32>
    %cst_18 = arith.constant dense<0xFF800000> : vector<16xf32>
    %46 = vector.multi_reduction <maximumf>, %45, %cst_18 [1] : vector<16x16xf32> to vector<16xf32>
    %47 = vector.shape_cast %46 : vector<16xf32> to vector<16x1xf32>
    %48 = vector.broadcast %47 : vector<16x1xf32> to vector<16x16xf32>
    %49 = arith.subf %45, %48 : vector<16x16xf32>
    %50 = math.exp %49 : vector<16x16xf32>
    %cst_19 = arith.constant dense<0.000000e+00> : vector<16xf32>
    %51 = vector.multi_reduction <add>, %50, %cst_19 [1] : vector<16x16xf32> to vector<16xf32>
    %52 = vector.shape_cast %51 : vector<16xf32> to vector<16x1xf32>
    %53 = vector.broadcast %52 : vector<16x1xf32> to vector<16x16xf32>
    %54 = arith.divf %50, %53 : vector<16x16xf32>
    %cst_20 = arith.constant dense<0.000000e+00> : vector<16x32xf32>
    %55 = tpu.matmul %54, %42, %cst_20 {dimension_numbers = #tpu.dot_dimension_numbers<[1], [0], [0], [1], [0, 0, 1, 1], [], []>} : vector<16x16xf32>, vector<16x32xf32>, vector<16x32xf32> -> vector<16x32xf32>
    %56 = vector.extract_strided_slice %7 {offsets = [0, 96], sizes = [16, 32], strides = [1, 1]} : vector<16x768xf32> to vector<16x32xf32>
    %57 = vector.extract_strided_slice %7 {offsets = [0, 352], sizes = [16, 32], strides = [1, 1]} : vector<16x768xf32> to vector<16x32xf32>
    %58 = vector.extract_strided_slice %7 {offsets = [0, 608], sizes = [16, 32], strides = [1, 1]} : vector<16x768xf32> to vector<16x32xf32>
    %cst_21 = arith.constant dense<0.000000e+00> : vector<16x16xf32>
    %59 = tpu.matmul %56, %57, %cst_21 {dimension_numbers = #tpu.dot_dimension_numbers<[1], [1], [0], [0], [0, 0, 1, 0], [], []>} : vector<16x32xf32>, vector<16x32xf32>, vector<16x16xf32> -> vector<16x16xf32>
    %cst_22 = arith.constant 0.176776692 : f32
    %60 = vector.broadcast %cst_22 : f32 to vector<16x16xf32>
    %61 = arith.mulf %59, %60 : vector<16x16xf32>
    %cst_23 = arith.constant dense<0xFF800000> : vector<16xf32>
    %62 = vector.multi_reduction <maximumf>, %61, %cst_23 [1] : vector<16x16xf32> to vector<16xf32>
    %63 = vector.shape_cast %62 : vector<16xf32> to vector<16x1xf32>
    %64 = vector.broadcast %63 : vector<16x1xf32> to vector<16x16xf32>
    %65 = arith.subf %61, %64 : vector<16x16xf32>
    %66 = math.exp %65 : vector<16x16xf32>
    %cst_24 = arith.constant dense<0.000000e+00> : vector<16xf32>
    %67 = vector.multi_reduction <add>, %66, %cst_24 [1] : vector<16x16xf32> to vector<16xf32>
    %68 = vector.shape_cast %67 : vector<16xf32> to vector<16x1xf32>
    %69 = vector.broadcast %68 : vector<16x1xf32> to vector<16x16xf32>
    %70 = arith.divf %66, %69 : vector<16x16xf32>
    %cst_25 = arith.constant dense<0.000000e+00> : vector<16x32xf32>
    %71 = tpu.matmul %70, %58, %cst_25 {dimension_numbers = #tpu.dot_dimension_numbers<[1], [0], [0], [1], [0, 0, 1, 1], [], []>} : vector<16x16xf32>, vector<16x32xf32>, vector<16x32xf32> -> vector<16x32xf32>
    %72 = vector.extract_strided_slice %7 {offsets = [0, 128], sizes = [16, 32], strides = [1, 1]} : vector<16x768xf32> to vector<16x32xf32>
    %73 = vector.extract_strided_slice %7 {offsets = [0, 384], sizes = [16, 32], strides = [1, 1]} : vector<16x768xf32> to vector<16x32xf32>
    %74 = vector.extract_strided_slice %7 {offsets = [0, 640], sizes = [16, 32], strides = [1, 1]} : vector<16x768xf32> to vector<16x32xf32>
    %cst_26 = arith.constant dense<0.000000e+00> : vector<16x16xf32>
    %75 = tpu.matmul %72, %73, %cst_26 {dimension_numbers = #tpu.dot_dimension_numbers<[1], [1], [0], [0], [0, 0, 1, 0], [], []>} : vector<16x32xf32>, vector<16x32xf32>, vector<16x16xf32> -> vector<16x16xf32>
    %cst_27 = arith.constant 0.176776692 : f32
    %76 = vector.broadcast %cst_27 : f32 to vector<16x16xf32>
    %77 = arith.mulf %75, %76 : vector<16x16xf32>
    %cst_28 = arith.constant dense<0xFF800000> : vector<16xf32>
    %78 = vector.multi_reduction <maximumf>, %77, %cst_28 [1] : vector<16x16xf32> to vector<16xf32>
    %79 = vector.shape_cast %78 : vector<16xf32> to vector<16x1xf32>
    %80 = vector.broadcast %79 : vector<16x1xf32> to vector<16x16xf32>
    %81 = arith.subf %77, %80 : vector<16x16xf32>
    %82 = math.exp %81 : vector<16x16xf32>
    %cst_29 = arith.constant dense<0.000000e+00> : vector<16xf32>
    %83 = vector.multi_reduction <add>, %82, %cst_29 [1] : vector<16x16xf32> to vector<16xf32>
    %84 = vector.shape_cast %83 : vector<16xf32> to vector<16x1xf32>
    %85 = vector.broadcast %84 : vector<16x1xf32> to vector<16x16xf32>
    %86 = arith.divf %82, %85 : vector<16x16xf32>
    %cst_30 = arith.constant dense<0.000000e+00> : vector<16x32xf32>
    %87 = tpu.matmul %86, %74, %cst_30 {dimension_numbers = #tpu.dot_dimension_numbers<[1], [0], [0], [1], [0, 0, 1, 1], [], []>} : vector<16x16xf32>, vector<16x32xf32>, vector<16x32xf32> -> vector<16x32xf32>
    %88 = vector.extract_strided_slice %7 {offsets = [0, 160], sizes = [16, 32], strides = [1, 1]} : vector<16x768xf32> to vector<16x32xf32>
    %89 = vector.extract_strided_slice %7 {offsets = [0, 416], sizes = [16, 32], strides = [1, 1]} : vector<16x768xf32> to vector<16x32xf32>
    %90 = vector.extract_strided_slice %7 {offsets = [0, 672], sizes = [16, 32], strides = [1, 1]} : vector<16x768xf32> to vector<16x32xf32>
    %cst_31 = arith.constant dense<0.000000e+00> : vector<16x16xf32>
    %91 = tpu.matmul %88, %89, %cst_31 {dimension_numbers = #tpu.dot_dimension_numbers<[1], [1], [0], [0], [0, 0, 1, 0], [], []>} : vector<16x32xf32>, vector<16x32xf32>, vector<16x16xf32> -> vector<16x16xf32>
    %cst_32 = arith.constant 0.176776692 : f32
    %92 = vector.broadcast %cst_32 : f32 to vector<16x16xf32>
    %93 = arith.mulf %91, %92 : vector<16x16xf32>
    %cst_33 = arith.constant dense<0xFF800000> : vector<16xf32>
    %94 = vector.multi_reduction <maximumf>, %93, %cst_33 [1] : vector<16x16xf32> to vector<16xf32>
    %95 = vector.shape_cast %94 : vector<16xf32> to vector<16x1xf32>
    %96 = vector.broadcast %95 : vector<16x1xf32> to vector<16x16xf32>
    %97 = arith.subf %93, %96 : vector<16x16xf32>
    %98 = math.exp %97 : vector<16x16xf32>
    %cst_34 = arith.constant dense<0.000000e+00> : vector<16xf32>
    %99 = vector.multi_reduction <add>, %98, %cst_34 [1] : vector<16x16xf32> to vector<16xf32>
    %100 = vector.shape_cast %99 : vector<16xf32> to vector<16x1xf32>
    %101 = vector.broadcast %100 : vector<16x1xf32> to vector<16x16xf32>
    %102 = arith.divf %98, %101 : vector<16x16xf32>
    %cst_35 = arith.constant dense<0.000000e+00> : vector<16x32xf32>
    %103 = tpu.matmul %102, %90, %cst_35 {dimension_numbers = #tpu.dot_dimension_numbers<[1], [0], [0], [1], [0, 0, 1, 1], [], []>} : vector<16x16xf32>, vector<16x32xf32>, vector<16x32xf32> -> vector<16x32xf32>
    %104 = vector.extract_strided_slice %7 {offsets = [0, 192], sizes = [16, 32], strides = [1, 1]} : vector<16x768xf32> to vector<16x32xf32>
    %105 = vector.extract_strided_slice %7 {offsets = [0, 448], sizes = [16, 32], strides = [1, 1]} : vector<16x768xf32> to vector<16x32xf32>
    %106 = vector.extract_strided_slice %7 {offsets = [0, 704], sizes = [16, 32], strides = [1, 1]} : vector<16x768xf32> to vector<16x32xf32>
    %cst_36 = arith.constant dense<0.000000e+00> : vector<16x16xf32>
    %107 = tpu.matmul %104, %105, %cst_36 {dimension_numbers = #tpu.dot_dimension_numbers<[1], [1], [0], [0], [0, 0, 1, 0], [], []>} : vector<16x32xf32>, vector<16x32xf32>, vector<16x16xf32> -> vector<16x16xf32>
    %cst_37 = arith.constant 0.176776692 : f32
    %108 = vector.broadcast %cst_37 : f32 to vector<16x16xf32>
    %109 = arith.mulf %107, %108 : vector<16x16xf32>
    %cst_38 = arith.constant dense<0xFF800000> : vector<16xf32>
    %110 = vector.multi_reduction <maximumf>, %109, %cst_38 [1] : vector<16x16xf32> to vector<16xf32>
    %111 = vector.shape_cast %110 : vector<16xf32> to vector<16x1xf32>
    %112 = vector.broadcast %111 : vector<16x1xf32> to vector<16x16xf32>
    %113 = arith.subf %109, %112 : vector<16x16xf32>
    %114 = math.exp %113 : vector<16x16xf32>
    %cst_39 = arith.constant dense<0.000000e+00> : vector<16xf32>
    %115 = vector.multi_reduction <add>, %114, %cst_39 [1] : vector<16x16xf32> to vector<16xf32>
    %116 = vector.shape_cast %115 : vector<16xf32> to vector<16x1xf32>
    %117 = vector.broadcast %116 : vector<16x1xf32> to vector<16x16xf32>
    %118 = arith.divf %114, %117 : vector<16x16xf32>
    %cst_40 = arith.constant dense<0.000000e+00> : vector<16x32xf32>
    %119 = tpu.matmul %118, %106, %cst_40 {dimension_numbers = #tpu.dot_dimension_numbers<[1], [0], [0], [1], [0, 0, 1, 1], [], []>} : vector<16x16xf32>, vector<16x32xf32>, vector<16x32xf32> -> vector<16x32xf32>
    %120 = vector.extract_strided_slice %7 {offsets = [0, 224], sizes = [16, 32], strides = [1, 1]} : vector<16x768xf32> to vector<16x32xf32>
    %121 = vector.extract_strided_slice %7 {offsets = [0, 480], sizes = [16, 32], strides = [1, 1]} : vector<16x768xf32> to vector<16x32xf32>
    %122 = vector.extract_strided_slice %7 {offsets = [0, 736], sizes = [16, 32], strides = [1, 1]} : vector<16x768xf32> to vector<16x32xf32>
    %cst_41 = arith.constant dense<0.000000e+00> : vector<16x16xf32>
    %123 = tpu.matmul %120, %121, %cst_41 {dimension_numbers = #tpu.dot_dimension_numbers<[1], [1], [0], [0], [0, 0, 1, 0], [], []>} : vector<16x32xf32>, vector<16x32xf32>, vector<16x16xf32> -> vector<16x16xf32>
    %cst_42 = arith.constant 0.176776692 : f32
    %124 = vector.broadcast %cst_42 : f32 to vector<16x16xf32>
    %125 = arith.mulf %123, %124 : vector<16x16xf32>
    %cst_43 = arith.constant dense<0xFF800000> : vector<16xf32>
    %126 = vector.multi_reduction <maximumf>, %125, %cst_43 [1] : vector<16x16xf32> to vector<16xf32>
    %127 = vector.shape_cast %126 : vector<16xf32> to vector<16x1xf32>
    %128 = vector.broadcast %127 : vector<16x1xf32> to vector<16x16xf32>
    %129 = arith.subf %125, %128 : vector<16x16xf32>
    %130 = math.exp %129 : vector<16x16xf32>
    %cst_44 = arith.constant dense<0.000000e+00> : vector<16xf32>
    %131 = vector.multi_reduction <add>, %130, %cst_44 [1] : vector<16x16xf32> to vector<16xf32>
    %132 = vector.shape_cast %131 : vector<16xf32> to vector<16x1xf32>
    %133 = vector.broadcast %132 : vector<16x1xf32> to vector<16x16xf32>
    %134 = arith.divf %130, %133 : vector<16x16xf32>
    %cst_45 = arith.constant dense<0.000000e+00> : vector<16x32xf32>
    %135 = tpu.matmul %134, %122, %cst_45 {dimension_numbers = #tpu.dot_dimension_numbers<[1], [0], [0], [1], [0, 0, 1, 1], [], []>} : vector<16x16xf32>, vector<16x32xf32>, vector<16x32xf32> -> vector<16x32xf32>
    %136 = tpu.concatenate %23, %39, %55, %71, %87, %103, %119, %135 in 1 : vector<16x32xf32>, vector<16x32xf32>, vector<16x32xf32>, vector<16x32xf32>, vector<16x32xf32>, vector<16x32xf32>, vector<16x32xf32>, vector<16x32xf32> -> vector<16x256xf32>
    %137 = arith.truncf %136 : vector<16x256xf32> to vector<16x256xbf16>
    %c0_46 = arith.constant 0 : index
    %c0_47 = arith.constant 0 : index
    %138 = vector.load %arg4[%c0_46, %c0_47] : memref<256x256xbf16, #tpu.memory_space<vmem>>, vector<256x256xbf16>
    %cst_48 = arith.constant dense<0.000000e+00> : vector<16x256xf32>
    %139 = tpu.matmul %137, %138, %cst_48 {dimension_numbers = #tpu.dot_dimension_numbers<[1], [0], [0], [1], [0, 0, 1, 1], [], []>} : vector<16x256xbf16>, vector<256x256xbf16>, vector<16x256xf32> -> vector<16x256xf32>
    %c0_49 = arith.constant 0 : index
    %c0_50 = arith.constant 0 : index
    %140 = vector.load %arg5[%c0_49, %c0_50] : memref<1x256xf32, #tpu.memory_space<vmem>>, vector<1x256xf32>
    %141 = vector.broadcast %140 : vector<1x256xf32> to vector<16x256xf32>
    %142 = arith.addf %139, %141 : vector<16x256xf32>
    %143 = arith.addf %142, %1 : vector<16x256xf32>
    %c0_51 = arith.constant 0 : index
    %c0_52 = arith.constant 0 : index
    %144 = vector.load %arg6[%c0_51, %c0_52] : memref<1x256xf32, #tpu.memory_space<vmem>>, vector<1x256xf32>
    %c0_53 = arith.constant 0 : index
    %c0_54 = arith.constant 0 : index
    %145 = vector.load %arg7[%c0_53, %c0_54] : memref<1x256xf32, #tpu.memory_space<vmem>>, vector<1x256xf32>
    %cst_55 = arith.constant dense<0.000000e+00> : vector<16xf32>
    %146 = vector.multi_reduction <add>, %143, %cst_55 [1] : vector<16x256xf32> to vector<16xf32>
    %147 = vector.shape_cast %146 : vector<16xf32> to vector<16x1xf32>
    %cst_56 = arith.constant 2.560000e+02 : f32
    %148 = vector.broadcast %cst_56 : f32 to vector<16x1xf32>
    %149 = arith.divf %147, %148 : vector<16x1xf32>
    %150 = vector.broadcast %149 : vector<16x1xf32> to vector<16x256xf32>
    %151 = arith.subf %143, %150 : vector<16x256xf32>
    %152 = arith.mulf %151, %151 : vector<16x256xf32>
    %cst_57 = arith.constant dense<0.000000e+00> : vector<16xf32>
    %153 = vector.multi_reduction <add>, %152, %cst_57 [1] : vector<16x256xf32> to vector<16xf32>
    %154 = vector.shape_cast %153 : vector<16xf32> to vector<16x1xf32>
    %cst_58 = arith.constant 2.560000e+02 : f32
    %155 = vector.broadcast %cst_58 : f32 to vector<16x1xf32>
    %156 = arith.divf %154, %155 : vector<16x1xf32>
    %cst_59 = arith.constant 9.99999974E-6 : f32
    %157 = vector.broadcast %cst_59 : f32 to vector<16x1xf32>
    %158 = arith.addf %156, %157 : vector<16x1xf32>
    %159 = math.rsqrt %158 : vector<16x1xf32>
    %160 = vector.broadcast %159 : vector<16x1xf32> to vector<16x256xf32>
    %161 = arith.mulf %151, %160 : vector<16x256xf32>
    %162 = vector.broadcast %144 : vector<1x256xf32> to vector<16x256xf32>
    %163 = arith.mulf %161, %162 : vector<16x256xf32>
    %164 = vector.broadcast %145 : vector<1x256xf32> to vector<16x256xf32>
    %165 = arith.addf %163, %164 : vector<16x256xf32>
    %166 = arith.truncf %165 : vector<16x256xf32> to vector<16x256xbf16>
    %c0_60 = arith.constant 0 : index
    %c0_61 = arith.constant 0 : index
    %167 = vector.load %arg8[%c0_60, %c0_61] : memref<256x1024xbf16, #tpu.memory_space<vmem>>, vector<256x1024xbf16>
    %cst_62 = arith.constant dense<0.000000e+00> : vector<16x1024xf32>
    %168 = tpu.matmul %166, %167, %cst_62 {dimension_numbers = #tpu.dot_dimension_numbers<[1], [0], [0], [1], [0, 0, 1, 1], [], []>} : vector<16x256xbf16>, vector<256x1024xbf16>, vector<16x1024xf32> -> vector<16x1024xf32>
    %c0_63 = arith.constant 0 : index
    %c0_64 = arith.constant 0 : index
    %169 = vector.load %arg9[%c0_63, %c0_64] : memref<1x1024xf32, #tpu.memory_space<vmem>>, vector<1x1024xf32>
    %170 = vector.broadcast %169 : vector<1x1024xf32> to vector<16x1024xf32>
    %171 = arith.addf %168, %170 : vector<16x1024xf32>
    %cst_65 = arith.constant 5.000000e-01 : f32
    %172 = vector.broadcast %cst_65 : f32 to vector<16x1024xf32>
    %173 = arith.mulf %172, %171 : vector<16x1024xf32>
    %cst_66 = arith.constant 0.707106769 : f32
    %174 = vector.broadcast %cst_66 : f32 to vector<16x1024xf32>
    %175 = arith.mulf %171, %174 : vector<16x1024xf32>
    %176 = math.erf %175 : vector<16x1024xf32>
    %cst_67 = arith.constant 1.000000e+00 : f32
    %177 = vector.broadcast %cst_67 : f32 to vector<16x1024xf32>
    %178 = arith.addf %177, %176 : vector<16x1024xf32>
    %179 = arith.mulf %173, %178 : vector<16x1024xf32>
    %180 = arith.truncf %179 : vector<16x1024xf32> to vector<16x1024xbf16>
    %c0_68 = arith.constant 0 : index
    %c0_69 = arith.constant 0 : index
    %181 = vector.load %arg10[%c0_68, %c0_69] : memref<1024x256xbf16, #tpu.memory_space<vmem>>, vector<1024x256xbf16>
    %cst_70 = arith.constant dense<0.000000e+00> : vector<16x256xf32>
    %182 = tpu.matmul %180, %181, %cst_70 {dimension_numbers = #tpu.dot_dimension_numbers<[1], [0], [0], [1], [0, 0, 1, 1], [], []>} : vector<16x1024xbf16>, vector<1024x256xbf16>, vector<16x256xf32> -> vector<16x256xf32>
    %c0_71 = arith.constant 0 : index
    %c0_72 = arith.constant 0 : index
    %183 = vector.load %arg11[%c0_71, %c0_72] : memref<1x256xf32, #tpu.memory_space<vmem>>, vector<1x256xf32>
    %184 = vector.broadcast %183 : vector<1x256xf32> to vector<16x256xf32>
    %185 = arith.addf %182, %184 : vector<16x256xf32>
    %186 = arith.addf %185, %165 : vector<16x256xf32>
    %c0_73 = arith.constant 0 : index
    %c0_74 = arith.constant 0 : index
    %187 = vector.load %arg12[%c0_73, %c0_74] : memref<1x256xf32, #tpu.memory_space<vmem>>, vector<1x256xf32>
    %c0_75 = arith.constant 0 : index
    %c0_76 = arith.constant 0 : index
    %188 = vector.load %arg13[%c0_75, %c0_76] : memref<1x256xf32, #tpu.memory_space<vmem>>, vector<1x256xf32>
    %cst_77 = arith.constant dense<0.000000e+00> : vector<16xf32>
    %189 = vector.multi_reduction <add>, %186, %cst_77 [1] : vector<16x256xf32> to vector<16xf32>
    %190 = vector.shape_cast %189 : vector<16xf32> to vector<16x1xf32>
    %cst_78 = arith.constant 2.560000e+02 : f32
    %191 = vector.broadcast %cst_78 : f32 to vector<16x1xf32>
    %192 = arith.divf %190, %191 : vector<16x1xf32>
    %193 = vector.broadcast %192 : vector<16x1xf32> to vector<16x256xf32>
    %194 = arith.subf %186, %193 : vector<16x256xf32>
    %195 = arith.mulf %194, %194 : vector<16x256xf32>
    %cst_79 = arith.constant dense<0.000000e+00> : vector<16xf32>
    %196 = vector.multi_reduction <add>, %195, %cst_79 [1] : vector<16x256xf32> to vector<16xf32>
    %197 = vector.shape_cast %196 : vector<16xf32> to vector<16x1xf32>
    %cst_80 = arith.constant 2.560000e+02 : f32
    %198 = vector.broadcast %cst_80 : f32 to vector<16x1xf32>
    %199 = arith.divf %197, %198 : vector<16x1xf32>
    %cst_81 = arith.constant 9.99999974E-6 : f32
    %200 = vector.broadcast %cst_81 : f32 to vector<16x1xf32>
    %201 = arith.addf %199, %200 : vector<16x1xf32>
    %202 = math.rsqrt %201 : vector<16x1xf32>
    %203 = vector.broadcast %202 : vector<16x1xf32> to vector<16x256xf32>
    %204 = arith.mulf %194, %203 : vector<16x256xf32>
    %205 = vector.broadcast %187 : vector<1x256xf32> to vector<16x256xf32>
    %206 = arith.mulf %204, %205 : vector<16x256xf32>
    %207 = vector.broadcast %188 : vector<1x256xf32> to vector<16x256xf32>
    %208 = arith.addf %206, %207 : vector<16x256xf32>
    %c0_82 = arith.constant 0 : index
    %c0_83 = arith.constant 0 : index
    %c0_84 = arith.constant 0 : index
    %209 = vector.load %arg14[%c0_82, %c0_83, %c0_84] : memref<1x16x256xf32, #tpu.memory_space<vmem>>, vector<1x16x256xf32>
    %210 = vector.shape_cast %209 : vector<1x16x256xf32> to vector<16x256xf32>
    %211 = vector.shape_cast %208 : vector<16x256xf32> to vector<1x16x256xf32>
    tpu.vector_store %arg14[%c0_82, %c0_83, %c0_84], %211 {strides = array<i32>} : memref<1x16x256xf32, #tpu.memory_space<vmem>>, vector<1x16x256xf32>,
    return
  }
  func.func @transform_0(%arg0: i32) -> (i32, i32, i32) {
    %c0_i32 = arith.constant 0 : i32
    %c0_i32_0 = arith.constant 0 : i32
    %c0_i32_1 = arith.constant 0 : i32
    return %arg0, %c0_i32, %c0_i32_0 : i32, i32, i32
  }
  func.func @transform_1(%arg0: i32) -> (i32, i32) {
    %c0_i32 = arith.constant 0 : i32
    %c0_i32_0 = arith.constant 0 : i32
    %c0_i32_1 = arith.constant 0 : i32
    return %c0_i32, %c0_i32_0 : i32, i32
  }
  func.func @transform_2(%arg0: i32) -> (i32, i32) {
    %c0_i32 = arith.constant 0 : i32
    %c0_i32_0 = arith.constant 0 : i32
    %c0_i32_1 = arith.constant 0 : i32
    return %c0_i32, %c0_i32_0 : i32, i32
  }
  func.func @transform_3(%arg0: i32) -> (i32, i32) {
    %c0_i32 = arith.constant 0 : i32
    %c0_i32_0 = arith.constant 0 : i32
    %c0_i32_1 = arith.constant 0 : i32
    return %c0_i32, %c0_i32_0 : i32, i32
  }
  func.func @transform_4(%arg0: i32) -> (i32, i32) {
    %c0_i32 = arith.constant 0 : i32
    %c0_i32_0 = arith.constant 0 : i32
    %c0_i32_1 = arith.constant 0 : i32
    return %c0_i32, %c0_i32_0 : i32, i32
  }
  func.func @transform_5(%arg0: i32) -> (i32, i32) {
    %c0_i32 = arith.constant 0 : i32
    %c0_i32_0 = arith.constant 0 : i32
    %c0_i32_1 = arith.constant 0 : i32
    return %c0_i32, %c0_i32_0 : i32, i32
  }
  func.func @transform_6(%arg0: i32) -> (i32, i32) {
    %c0_i32 = arith.constant 0 : i32
    %c0_i32_0 = arith.constant 0 : i32
    %c0_i32_1 = arith.constant 0 : i32
    return %c0_i32, %c0_i32_0 : i32, i32
  }
  func.func @transform_7(%arg0: i32) -> (i32, i32) {
    %c0_i32 = arith.constant 0 : i32
    %c0_i32_0 = arith.constant 0 : i32
    %c0_i32_1 = arith.constant 0 : i32
    return %c0_i32, %c0_i32_0 : i32, i32
  }
  func.func @transform_8(%arg0: i32) -> (i32, i32) {
    %c0_i32 = arith.constant 0 : i32
    %c0_i32_0 = arith.constant 0 : i32
    %c0_i32_1 = arith.constant 0 : i32
    return %c0_i32, %c0_i32_0 : i32, i32
  }
  func.func @transform_9(%arg0: i32) -> (i32, i32) {
    %c0_i32 = arith.constant 0 : i32
    %c0_i32_0 = arith.constant 0 : i32
    %c0_i32_1 = arith.constant 0 : i32
    return %c0_i32, %c0_i32_0 : i32, i32
  }
  func.func @transform_10(%arg0: i32) -> (i32, i32) {
    %c0_i32 = arith.constant 0 : i32
    %c0_i32_0 = arith.constant 0 : i32
    %c0_i32_1 = arith.constant 0 : i32
    return %c0_i32, %c0_i32_0 : i32, i32
  }
  func.func @transform_11(%arg0: i32) -> (i32, i32) {
    %c0_i32 = arith.constant 0 : i32
    %c0_i32_0 = arith.constant 0 : i32
    %c0_i32_1 = arith.constant 0 : i32
    return %c0_i32, %c0_i32_0 : i32, i32
  }
  func.func @transform_12(%arg0: i32) -> (i32, i32) {
    %c0_i32 = arith.constant 0 : i32
    %c0_i32_0 = arith.constant 0 : i32
    %c0_i32_1 = arith.constant 0 : i32
    return %c0_i32, %c0_i32_0 : i32, i32
  }
  func.func @transform_13(%arg0: i32) -> (i32, i32, i32) {
    %c0_i32 = arith.constant 0 : i32
    %c0_i32_0 = arith.constant 0 : i32
    %c0_i32_1 = arith.constant 0 : i32
    return %arg0, %c0_i32, %c0_i32_0 : i32, i32, i32
  }
}

</mosaic_0001>

<bundles_post_ra>
// kernel: self_transformer_forward.1
= control target key start
LH: loop header
LB: loop body
LE: loop exit
PB: predicated region body
PF: predicated region fallthrough
CT: control target
= control target key end

     0   :  { %18 = vsyncpa [#allocation3], 0  ;;  %s8383_s0 = inlined_call_operand.vmem [shape: f32[2,16,256], index: 0, kind: input, shape index: {}]   ;;  %s8384_s1 = inlined_call_operand.vmem [shape: bf16[256,768], index: 1, kind: input, shape index: {}]   ;;  %s8385_s2 = inlined_call_operand.vmem [shape: f32[1,768], index: 2, kind: input, shape index: {}]   ;;  %s8386_s3 = inlined_call_operand.vmem [shape: bf16[256,256], index: 3, kind: input, shape index: {}]   ;;  %s8387_s4 = inlined_call_operand.vmem [shape: f32[1,256], index: 4, kind: input, shape index: {}]   ;;  %s8388_s5 = inlined_call_operand.vmem [shape: f32[1,256], index: 5, kind: input, shape index: {}]   ;;  %s8389_s6 = inlined_call_operand.vmem [shape: f32[1,256], index: 6, kind: input, shape index: {}]   ;;  %s8390_s7 = inlined_call_operand.vmem [shape: bf16[256,1024], index: 7, kind: input, shape index: {}]   ;;  %s8391_s8 = inlined_call_operand.vmem [shape: f32[1,1024], index: 8, kind: input, shape index: {}]   ;;  %s8392_s9 = inlined_call_operand.vmem [shape: bf16[1024,256], index: 9, kind: input, shape index: {}]   ;;  %s8393_s10 = inlined_call_operand.vmem [shape: f32[1,256], index: 10, kind: input, shape index: {}]   ;;  %s8394_s11 = inlined_call_operand.vmem [shape: f32[1,256], index: 11, kind: input, shape index: {}]   ;;  %s8395_s12 = inlined_call_operand.vmem [shape: f32[1,256], index: 12, kind: input, shape index: {}]   ;;  %s8396_s13 = inlined_call_operand.hbm [shape: f32[2,16,256], index: 13, kind: output, shape index: {}]  }
   0x1   :  { %20 = vsyncpa [#allocation3 + $0x1], 0  ;;  %s6662_s25 = smov 0   ;;  %s6664_s26 = smov 0  }
   0x2   :  { %s6666_s27 = smov 0   ;;  %s6668_s28 = smov 0  }
   0x3 LB: > { %8401 = sst [smem:[#allocation5_spill]] %s6580_s27  ;;  %s6683_s29 = sadd.s32 4294967295, %s6584_s28   ;;  %s6584_s28 = sphi %s6668_s28, %s8408_s28   ;;  %s6580_s27 = sphi %s6666_s27, %s8410_s27   ;;  %s6576_s26 = sphi %s6664_s26, %s8412_s26   ;;  %s6572_s25 = sphi %s6662_s25, %s8411_s25  }
   0x4   : > { %s5336_s30 = sadd.s32 4294967294, %s6584_s28   ;;  %s6687_s14 = sadd.s32 1, %s6584_s28  }
   0x5   : > { %8402 = sst [smem:[#allocation6_spill]] %s6687_s14  ;;  %s311_s15 = sadd.s32 1, %s6580_s27 }
   0x6   : > { %s308_s16 = ssub.s32 %s6584_s28, %s6687_s14  ;;  %p321_p0 = scmp.ne.s32.totalorder %s6580_s27, %s6576_s26 }
   0x7   : > { %p309_p1 = scmp.eq.s32.totalorder %s308_s16, 0  ;;  %p322_p2 = scmp.eq.s32.totalorder %s6683_s29, 1 }
   0x8   : > { %p327_p3 = scmp.ne.s32.totalorder %s6576_s26, %s6572_s25  ;;  %p328_p4 = scmp.eq.s32.totalorder %s5336_s30, 1 }
   0x9   : > { %s6698_s17 = scalar_select %p309_p1, %s6580_s27, %s311_s15  }
   0xa   : > { %p6700_p5 = por %p322_p2, %p321_p0  ;;  %p6704_p6 = por %p328_p4, %p327_p3 }
   0xb   : > { %8403 = sst [smem:[#allocation7_spill]] %s6698_s17  ;;  %p5339_p7 = scmp.ge.s32.totalorder %s6584_s28, 1 }
   0xc   : > { %s8405_s19 = scalar_select %p6704_p6, 1, 0 }
   0xd   : > { %p390_p8 = scmp.lt.s32.totalorder %s6584_s28, 3 }
   0xe   : > { %8406 = sst [smem:[#allocation8_spill]] %s8405_s19 }
   0xf   : > { %p391_p9 = pnand %p5339_p7, %p390_p8 }
  0x10   : > { %p434_p10 = scmp.lt.s32.totalorder (!%p391_p9), %s6683_s29, 1  ;;  %s6586_s16 = smov (!%p391_p9), 96  }
  0x11   : > { %394 = sbr.rel (%p391_p9) target bundleno = 3739 (0xe9b), region = 72  ;;  %s6587_s27 = smov (!%p391_p9), 64  }
  0x12   : > { %s6588_s17 = smov (!%p391_p9), 32   ;;  %s431_s14 = sand.u32 (!%p391_p9), 1, %s6576_s26  }
  0x13   : > { %s5340_s22 = sshll.u32 (!%p391_p9), %s431_s14, 5  ;;  %s6589_s20 = smov (!%p391_p9), [#allocation2]  }
  0x14   : > { %s433_s30 = scalar_lea.vmem (!%p391_p9), [#allocation2], %s5340_s22 }
  0x15   : > { %s5274_s19 = sshll.u32 (!%p391_p9), %s433_s30, 4  ;;  %s8341_s19 = int_to_ptr.vmem [resolvable:$true] %s5274_s19 }
  0x16   : > { %v6032_v0 = vld [vmem:[%s8384_s1 + $0x154] ss:$24 sps:$4 sm:$0xff]   ;;  %v6036_v2 = vld [vmem:[%s8384_s1 + $0x150] ss:$24 sps:$4 sm:$0xff]   ;;  %v6038_v4 = vld [vmem:[%s8384_s1 + $0x124] ss:$24 sps:$4 sm:$0xff]  }
  0x17   : > { %v6034_v1 = vld [vmem:[%s8384_s1 + $0x15c] ss:$24 sps:$4 sm:$0xff]   ;;  %1053 = vmatprep.subr.bf16.mxu0 %v6032_v0  ;;  %v6037_v3 = vld [vmem:[%s8384_s1 + $0x158] ss:$24 sps:$4 sm:$0xff]   ;;  %v6040_v5 = vld [vmem:[%s8384_s1 + $0x12c] ss:$24 sps:$4 sm:$0xff]  }
  0x18   : > { %1096 = vmatprep.subr.bf16.mxu1 %v6034_v1  ;;  %1054 = vmatpush1.bf16.msra.mxu0 %v6036_v2  ;;  %v6042_v6 = vld [vmem:[%s8384_s1 + $0x120] ss:$24 sps:$4 sm:$0xff]   ;;  %v6044_v8 = vld [vmem:[%s8384_s1 + $0xf4] ss:$24 sps:$4 sm:$0xff]   ;;  %v6048_v10 = vld [vmem:[%s8384_s1 + $0xf0] ss:$24 sps:$4 sm:$0xff]  }
  0x19   : > { %1097 = vmatpush1.bf16.msra.mxu1 %v6037_v3  ;;  %1055 = vmatprep.subr.bf16.mxu0 %v6038_v4  ;;  %v6043_v7 = vld [vmem:[%s8384_s1 + $0x128] ss:$24 sps:$4 sm:$0xff]   ;;  %v6046_v9 = vld [vmem:[%s8384_s1 + $0xfc] ss:$24 sps:$4 sm:$0xff]   ;;  %v6049_v11 = vld [vmem:[%s8384_s1 + $0xf8] ss:$24 sps:$4 sm:$0xff]  }
  0x1a   : > { %1098 = vmatprep.subr.bf16.mxu1 %v6040_v5  ;;  %v6050_v12 = vld [vmem:[%s8384_s1 + $0xc4] ss:$24 sps:$4 sm:$0xff]   ;;  %v6054_v14 = vld [vmem:[%s8384_s1 + $0xc0] ss:$24 sps:$4 sm:$0xff]   ;;  %v6056_v16 = vld [vmem:[%s8384_s1 + $0x94] ss:$24 sps:$4 sm:$0xff]  }
  0x1b   : > { %v6052_v13 = vld [vmem:[%s8384_s1 + $0xcc] ss:$24 sps:$4 sm:$0xff]   ;;  %v6055_v15 = vld [vmem:[%s8384_s1 + $0xc8] ss:$24 sps:$4 sm:$0xff]   ;;  %v6058_v17 = vld [vmem:[%s8384_s1 + $0x9c] ss:$24 sps:$4 sm:$0xff]  }
  0x1c   : > { %1056 = vmatpush1.bf16.msra.mxu0 %v6042_v6  ;;  %v6060_v18 = vld [vmem:[%s8384_s1 + $0x90] ss:$24 sps:$4 sm:$0xff]   ;;  %v6062_v20 = vld [vmem:[%s8384_s1 + $0x64] ss:$24 sps:$4 sm:$0xff]   ;;  %v6066_v22 = vld [vmem:[%s8384_s1 + $0x60] ss:$24 sps:$4 sm:$0xff]  }
  0x1d   : > { %1099 = vmatpush1.bf16.msra.mxu1 %v6043_v7  ;;  %1057 = vmatprep.subr.bf16.mxu0 %v6044_v8  ;;  %v6061_v19 = vld [vmem:[%s8384_s1 + $0x98] ss:$24 sps:$4 sm:$0xff]   ;;  %v6064_v21 = vld [vmem:[%s8384_s1 + $0x6c] ss:$24 sps:$4 sm:$0xff]   ;;  %v6067_v23 = vld [vmem:[%s8384_s1 + $0x68] ss:$24 sps:$4 sm:$0xff]  }
  0x1e   : > { %1100 = vmatprep.subr.bf16.mxu1 %v6046_v9  ;;  %v6068_v24 = vld [vmem:[%s8384_s1 + $0x34] ss:$24 sps:$4 sm:$0xff]   ;;  %v6072_v26 = vld [vmem:[%s8384_s1 + $0x30] ss:$24 sps:$4 sm:$0xff]   ;;  %v6074_v28 = vld [vmem:[%s8384_s1 + $0x4] ss:$24 sps:$4 sm:$0xff]  }
  0x1f   : > { %v6070_v25 = vld [vmem:[%s8384_s1 + $0x3c] ss:$24 sps:$4 sm:$0xff]   ;;  %v6073_v27 = vld [vmem:[%s8384_s1 + $0x38] ss:$24 sps:$4 sm:$0xff]   ;;  %v6076_v29 = vld [vmem:[%s8384_s1 + $0xc] ss:$24 sps:$4 sm:$0xff]  }
  0x20   : > { %1058 = vmatpush1.bf16.msra.mxu0 %v6048_v10  ;;  %v6078_v30 = vld [vmem:[%s8384_s1] ss:$24 sps:$4 sm:$0xff]   ;;  %v6080_v32 = vld [vmem:[%s8384_s1 + $0x2d4] ss:$24 sps:$4 sm:$0xff]   ;;  %v6084_v34 = vld [vmem:[%s8384_s1 + $0x2d0] ss:$24 sps:$4 sm:$0xff]  }
  0x21   : > { %1101 = vmatpush1.bf16.msra.mxu1 %v6049_v11  ;;  %1059 = vmatprep.subr.bf16.mxu0 %v6050_v12  ;;  %v6079_v31 = vld [vmem:[%s8384_s1 + $0x8] ss:$24 sps:$4 sm:$0xff]   ;;  %v6082_v33 = vld [vmem:[%s8384_s1 + $0x2dc] ss:$24 sps:$4 sm:$0xff]   ;;  %v6085_v35 = vld [vmem:[%s8384_s1 + $0x2d8] ss:$24 sps:$4 sm:$0xff]  }
  0x22   : > { %1102 = vmatprep.subr.bf16.mxu1 %v6052_v13  ;;  %v6086_v36 = vld [vmem:[%s8384_s1 + $0x2a4] ss:$24 sps:$4 sm:$0xff]   ;;  %s435_s24 = scalar_select %p434_p10, %s6683_s29, 1  ;;  %v6090_v38 = vld [vmem:[%s8384_s1 + $0x2a0] ss:$24 sps:$4 sm:$0xff]   ;;  %vm1182_vm0 = vcmask 261120  }
  0x23   : > { %v6088_v37 = vld [vmem:[%s8384_s1 + $0x2ac] ss:$24 sps:$4 sm:$0xff]   ;;  %v6091_v39 = vld [vmem:[%s8384_s1 + $0x2a8] ss:$24 sps:$4 sm:$0xff]   ;;  %v6094_v41 = vld [vmem:[%s8384_s1 + $0x27c] ss:$24 sps:$4 sm:$0xff]  }
  0x24   : > { %1060 = vmatpush1.bf16.msra.mxu0 %v6054_v14  ;;  %v6092_v40 = vld [vmem:[%s8384_s1 + $0x274] ss:$24 sps:$4 sm:$0xff]   ;;  %s5780_s23 = sshll.u32 %s435_s24, 5  ;;  %v6096_v42 = vld [vmem:[%s8384_s1 + $0x270] ss:$24 sps:$4 sm:$0xff]   ;;  %vm1272_vm1 = vcmask 130048  }
  0x25   : > { %1103 = vmatpush1.bf16.msra.mxu1 %v6055_v15  ;;  %1061 = vmatprep.subr.bf16.mxu0 %v6056_v16  ;;  %v6097_v43 = vld [vmem:[%s8384_s1 + $0x278] ss:$24 sps:$4 sm:$0xff]   ;;  %s6847_s21 = scalar_lea.vmem %s8383_s0, %s5780_s23  ;;  %v6098_v44 = vld [vmem:[%s8384_s1 + $0x244] ss:$24 sps:$4 sm:$0xff]   ;;  %v6103_v48 = vld [vmem:[%s8384_s1 + $0x248] ss:$24 sps:$4 sm:$0xff]  }
  0x26   : > { %1104 = vmatprep.subr.bf16.mxu1 %v6058_v17  ;;  %v6100_v45 = vld [vmem:[%s8384_s1 + $0x24c] ss:$24 sps:$4 sm:$0xff]   ;;  %v6102_v46 = vld [vmem:[%s8384_s1 + $0x240] ss:$24 sps:$4 sm:$0xff]   ;;  %v6106_v51 = vld [vmem:[%s8384_s1 + $0x21c] ss:$24 sps:$4 sm:$0xff]  }
  0x27   : > { %v440_v47 = vld [vmem:[%s6847_s21 + $0x8] sm:$0xff]  ;;  %v442_v50 = vld [vmem:[%s6847_s21 + $0x18] sm:$0xff]  ;;  %v439_v3 = vld [vmem:[%s6847_s21] sm:$0xff]  ;;  %vm2834_vm2 = vcmask 523264   ;;  %vm2837_vm3 = vcmask 785408  }
  0x28   : > { %1062 = vmatpush1.bf16.msra.mxu0 %v6060_v18  ;;  %v6104_v49 = vld [vmem:[%s8384_s1 + $0x214] ss:$24 sps:$4 sm:$0xff]   ;;  %v444_v52 = vpack.c.bf16 %v442_v50, %v440_v47  ;;  %v6108_v53 = vld [vmem:[%s8384_s1 + $0x210] ss:$24 sps:$4 sm:$0xff]   ;;  %v6110_v55 = vld [vmem:[%s8384_s1 + $0x1e4] ss:$24 sps:$4 sm:$0xff]  }
  0x29   : > { %1105 = vmatpush1.bf16.msra.mxu1 %v6061_v19  ;;  %1063 = vmatprep.subr.bf16.mxu0 %v6062_v20  ;;  %v6109_v54 = vld [vmem:[%s8384_s1 + $0x218] ss:$24 sps:$4 sm:$0xff]   ;;  %v6112_v56 = vld [vmem:[%s8384_s1 + $0x1ec] ss:$24 sps:$4 sm:$0xff]   ;;  %v6115_v58 = vld [vmem:[%s8384_s1 + $0x1e8] ss:$24 sps:$4 sm:$0xff]  }
  0x2a   : > { %1106 = vmatprep.subr.bf16.mxu1 %v6064_v21  ;;  %1085 = vmatprep.mubr.bf16.mxu0 %v444_v52  ;;  %v6114_v57 = vld [vmem:[%s8384_s1 + $0x1e0] ss:$24 sps:$4 sm:$0xff]   ;;  %v6116_v59 = vld [vmem:[%s8384_s1 + $0x1b4] ss:$24 sps:$4 sm:$0xff]   ;;  %v6120_v61 = vld [vmem:[%s8384_s1 + $0x1b0] ss:$24 sps:$4 sm:$0xff]  }
  0x2b   : > { %1128 = vmatprep.mubr.bf16.mxu1 %v444_v52  ;;  %v6118_v60 = vld [vmem:[%s8384_s1 + $0x1bc] ss:$24 sps:$4 sm:$0xff]   ;;  %v6121_v62 = vld [vmem:[%s8384_s1 + $0x1b8] ss:$24 sps:$4 sm:$0xff]   ;;  %v6124_v0 = vld [vmem:[%s8384_s1 + $0x18c] ss:$24 sps:$4 sm:$0xff]  }
  0x2c   : > { %1064 = vmatpush1.bf16.msra.mxu0 %v6066_v22  ;;  %v6122_v63 = vld [vmem:[%s8384_s1 + $0x184] ss:$24 sps:$4 sm:$0xff]   ;;  %v6126_v1 = vld [vmem:[%s8384_s1 + $0x180] ss:$24 sps:$4 sm:$0xff]   ;;  %v441_v4 = vld [vmem:[%s6847_s21 + $0x10] sm:$0xff] }
  0x2d   : > { %1107 = vmatpush1.bf16.msra.mxu1 %v6067_v23  ;;  %1065 = vmatprep.subr.bf16.mxu0 %v6068_v24  ;;  %v6127_v2 = vld [vmem:[%s8384_s1 + $0x188] ss:$24 sps:$4 sm:$0xff]   ;;  %v6913_v5 = vpack.c.bf16 %v441_v4, %v439_v3  ;;  %v6130_v7 = vld [vmem:[%s8384_s1 + $0x164] ss:$24 sps:$4 sm:$0xff]   ;;  %v6133_v8 = vld [vmem:[%s8384_s1 + $0x134] ss:$24 sps:$4 sm:$0xff]  }
  0x2e   : > { %1108 = vmatprep.subr.bf16.mxu1 %v6070_v25  ;;  %v6128_v6 = vld [vmem:[%s8384_s1 + $0x160] ss:$24 sps:$4 sm:$0xff]   ;;  %v6131_v9 = vld [vmem:[%s8384_s1 + $0x130] ss:$24 sps:$4 sm:$0xff]   ;;  %v6136_v10 = vld [vmem:[%s8384_s1 + $0x104] ss:$24 sps:$4 sm:$0xff]  }
  0x2f   : > { %v6134_v11 = vld [vmem:[%s8384_s1 + $0x100] ss:$24 sps:$4 sm:$0xff]   ;;  %v6139_v12 = vld [vmem:[%s8384_s1 + $0xd4] ss:$24 sps:$4 sm:$0xff]   ;;  %v6137_v13 = vld [vmem:[%s8384_s1 + $0xd0] ss:$24 sps:$4 sm:$0xff]  }
  0x30   : > { %1066 = vmatpush1.bf16.msra.mxu0 %v6072_v26  ;;  %v6142_v14 = vld [vmem:[%s8384_s1 + $0xa4] ss:$24 sps:$4 sm:$0xff]   ;;  %v6140_v15 = vld [vmem:[%s8384_s1 + $0xa0] ss:$24 sps:$4 sm:$0xff]   ;;  %v6145_v16 = vld [vmem:[%s8384_s1 + $0x74] ss:$24 sps:$4 sm:$0xff]  }
  0x31   : > { %1109 = vmatpush1.bf16.msra.mxu1 %v6073_v27  ;;  %1067 = vmatprep.subr.bf16.mxu0 %v6074_v28  ;;  %v6143_v17 = vld [vmem:[%s8384_s1 + $0x70] ss:$24 sps:$4 sm:$0xff]   ;;  %v6148_v18 = vld [vmem:[%s8384_s1 + $0x44] ss:$24 sps:$4 sm:$0xff]   ;;  %v6146_v19 = vld [vmem:[%s8384_s1 + $0x40] ss:$24 sps:$4 sm:$0xff]  }
  0x32   : > { %1110 = vmatprep.subr.bf16.mxu1 %v6076_v29  ;;  %v6151_v20 = vld [vmem:[%s8384_s1 + $0x14] ss:$24 sps:$4 sm:$0xff]   ;;  %v6149_v21 = vld [vmem:[%s8384_s1 + $0x10] ss:$24 sps:$4 sm:$0xff]   ;;  %v6154_v22 = vld [vmem:[%s8384_s1 + $0x2e4] ss:$24 sps:$4 sm:$0xff]  }
  0x33   : > { %v6152_v23 = vld [vmem:[%s8384_s1 + $0x2e0] ss:$24 sps:$4 sm:$0xff]   ;;  %v6157_v24 = vld [vmem:[%s8384_s1 + $0x2b4] ss:$24 sps:$4 sm:$0xff]   ;;  %v6155_v25 = vld [vmem:[%s8384_s1 + $0x2b0] ss:$24 sps:$4 sm:$0xff]  }
  0x34   : > { %1068 = vmatpush1.bf16.msra.mxu0 %v6078_v30  ;;  %v6160_v26 = vld [vmem:[%s8384_s1 + $0x284] ss:$24 sps:$4 sm:$0xff]   ;;  %v6158_v27 = vld [vmem:[%s8384_s1 + $0x280] ss:$24 sps:$4 sm:$0xff]   ;;  %v6163_v28 = vld [vmem:[%s8384_s1 + $0x254] ss:$24 sps:$4 sm:$0xff]  }
  0x35   : > { %1111 = vmatpush1.bf16.msra.mxu1 %v6079_v31  ;;  %1069 = vmatprep.subr.bf16.mxu0 %v6080_v32  ;;  %v6161_v29 = vld [vmem:[%s8384_s1 + $0x250] ss:$24 sps:$4 sm:$0xff]   ;;  %v6166_v30 = vld [vmem:[%s8384_s1 + $0x224] ss:$24 sps:$4 sm:$0xff]   ;;  %v6164_v31 = vld [vmem:[%s8384_s1 + $0x220] ss:$24 sps:$4 sm:$0xff]  }
  0x36   : > { %1112 = vmatprep.subr.bf16.mxu1 %v6082_v33  ;;  %v6169_v32 = vld [vmem:[%s8384_s1 + $0x1f4] ss:$24 sps:$4 sm:$0xff]   ;;  %v6167_v33 = vld [vmem:[%s8384_s1 + $0x1f0] ss:$24 sps:$4 sm:$0xff]  }
  0x38   : > { %1070 = vmatpush2.bf16.msra.mxu0 %v6084_v34  ;;  %v6172_v34 = vld [vmem:[%s8384_s1 + $0x1c4] ss:$24 sps:$4 sm:$0xff]  }
  0x39   : > { %1113 = vmatpush2.bf16.msra.mxu1 %v6085_v35  ;;  %1071 = vmatprep.subr.bf16.mxu0 %v6086_v36  ;;  %v6170_v35 = vld [vmem:[%s8384_s1 + $0x1c0] ss:$24 sps:$4 sm:$0xff]   ;;  %v6175_v36 = vld [vmem:[%s8384_s1 + $0x194] ss:$24 sps:$4 sm:$0xff]  }
  0x3a   : > { %1114 = vmatprep.subr.bf16.mxu1 %v6088_v37  ;;  %v6173_v37 = vld [vmem:[%s8384_s1 + $0x190] ss:$24 sps:$4 sm:$0xff]  }
  0x3c   : > { %1072 = vmatpush2.bf16.msra.mxu0 %v6090_v38  ;;  %v543_v38 = vlaneseq }
  0x3d   : > { %1115 = vmatpush2.bf16.msra.mxu1 %v6091_v39  ;;  %1073 = vmatprep.subr.bf16.mxu0 %v6092_v40 }
  0x3e   : > { %1116 = vmatprep.subr.bf16.mxu1 %v6094_v41  ;;  %v7014_v39 = vshrl.u32 %v543_v38, 7  ;;  %v7022_v41 = vld [vmem:[%s8385_s2] sm:$0x3f] }
  0x40   : > { %1074 = vmatpush2.bf16.msra.mxu0 %v6096_v42  ;;  %v7017_v40 = vsub.s32 0, %v7014_v39 }
  0x41   : > { %1117 = vmatpush2.bf16.msra.mxu1 %v6097_v43  ;;  %1075 = vmatprep.subr.bf16.mxu0 %v6098_v44  ;;  %v553_v43 = vsub.s32 2, %v7014_v39 }
  0x42   : > { %1118 = vmatprep.subr.bf16.mxu1 %v6100_v45  ;;  %v546_v42 = vrot.slane %v7022_v41, %v7017_v40 }
  0x44   : > { %1076 = vmatpush2.bf16.msra.mxu0 %v6102_v46 }
  0x45   : > { %1119 = vmatpush2.bf16.msra.mxu1 %v6103_v48  ;;  %1077 = vmatprep.subr.bf16.mxu0 %v6104_v49  ;;  %v554_v48 = vrot.slane %v7022_v41, %v553_v43 }
  0x46   : > { %1120 = vmatprep.subr.bf16.mxu1 %v6106_v51 }
  0x48   : > { %1078 = vmatpush2.bf16.msra.mxu0 %v6108_v53 }
  0x49   : > { %1121 = vmatpush2.bf16.msra.mxu1 %v6109_v54  ;;  %1079 = vmatprep.subr.bf16.mxu0 %v6110_v55 }
  0x4a   : > { %1122 = vmatprep.subr.bf16.mxu1 %v6112_v56 }
  0x4c   : > { %1080 = vmatpush2.bf16.msra.mxu0 %v6114_v57 }
  0x4d   : > { %1123 = vmatpush2.bf16.msra.mxu1 %v6115_v58  ;;  %1081 = vmatprep.subr.bf16.mxu0 %v6116_v59 }
  0x4e   : > { %1124 = vmatprep.subr.bf16.mxu1 %v6118_v60 }
  0x50   : > { %1082 = vmatpush2.bf16.msra.mxu0 %v6120_v61 }
  0x51   : > { %1125 = vmatpush2.bf16.msra.mxu1 %v6121_v62  ;;  %1083 = vmatprep.subr.bf16.mxu0 %v6122_v63  ;;  %v557_v63 = vsub.s32 3, %v7014_v39 }
  0x52   : > { %1126 = vmatprep.subr.bf16.mxu1 %v6124_v0  ;;  %v7064_v0 = vsub.s32 1, %v7014_v39 }
  0x53   : > { %v558_v4 = vrot.slane %v7022_v41, %v557_v63 }
  0x54   : > { %1084 = vmatpush2.bf16.msra.mxu0 %v6126_v1 }
  0x55   : > { %1127 = vmatpush2.bf16.msra.mxu1 %v6127_v2  ;;  %1139 = vmatprep.subr.bf16.mxu0 %v6130_v7 }
  0x57   : > { %1086 = vmatmul.mubr.bf16.vlgmr.msra.gmra.mxu0 %v6913_v5 }
  0x58   : > { %1129 = vmatmul.mubr.bf16.vlgmr.msra.gmra.mxu1 %v6913_v5  ;;  %1171 = vmatprep.mubr.bf16.mxu0 %v444_v52 }
  0x59   : > { %1140 = vmatpush1.bf16.msra.mxu0 %v6128_v6 }
  0x5a   : > { %1141 = vmatprep.subr.bf16.mxu0 %v6133_v8 }
  0x5d   : > { %1142 = vmatpush1.bf16.msra.mxu0 %v6131_v9 }
  0x5e   : > { %1143 = vmatprep.subr.bf16.mxu0 %v6136_v10 }
  0x61   : > { %1144 = vmatpush1.bf16.msra.mxu0 %v6134_v11 }
  0x62   : > { %1145 = vmatprep.subr.bf16.mxu0 %v6139_v12 }
  0x65   : > { %1146 = vmatpush1.bf16.msra.mxu0 %v6137_v13  ;;  %v561_v13 = vsub.s32 4, %v7014_v39 }
  0x66   : > { %1147 = vmatprep.subr.bf16.mxu0 %v6142_v14 }
  0x69   : > { %1148 = vmatpush1.bf16.msra.mxu0 %v6140_v15  ;;  %v562_v15 = vrot.slane %v7022_v41, %v561_v13 }
  0x6a   : > { %1149 = vmatprep.subr.bf16.mxu0 %v6145_v16 }
  0x6d   : > { %1150 = vmatpush1.bf16.msra.mxu0 %v6143_v17 }
  0x6e   : > { %1151 = vmatprep.subr.bf16.mxu0 %v6148_v18 }
  0x71   : > { %1152 = vmatpush1.bf16.msra.mxu0 %v6146_v19 }
  0x72   : > { %1153 = vmatprep.subr.bf16.mxu0 %v6151_v20 }
  0x75   : > { %1154 = vmatpush1.bf16.msra.mxu0 %v6149_v21 }
  0x76   : > { %1155 = vmatprep.subr.bf16.mxu0 %v6154_v22 }
  0x79   : > { %1156 = vmatpush2.bf16.msra.mxu0 %v6152_v23 }
  0x7a   : > { %1157 = vmatprep.subr.bf16.mxu0 %v6157_v24 }
  0x7d   : > { %1158 = vmatpush2.bf16.msra.mxu0 %v6155_v25 }
  0x7e   : > { %1159 = vmatprep.subr.bf16.mxu0 %v6160_v26 }
  0x81   : > { %1160 = vmatpush2.bf16.msra.mxu0 %v6158_v27 }
  0x82   : > { %1161 = vmatprep.subr.bf16.mxu0 %v6163_v28 }
  0x85   : > { %1162 = vmatpush2.bf16.msra.mxu0 %v6161_v29 }
  0x86   : > { %1163 = vmatprep.subr.bf16.mxu0 %v6166_v30 }
  0x89   : > { %1164 = vmatpush2.bf16.msra.mxu0 %v6164_v31 }
  0x8a   : > { %1165 = vmatprep.subr.bf16.mxu0 %v6169_v32 }
  0x8d   : > { %1166 = vmatpush2.bf16.msra.mxu0 %v6167_v33 }
  0x8e   : > { %1167 = vmatprep.subr.bf16.mxu0 %v6172_v34 }
  0x91   : > { %1168 = vmatpush2.bf16.msra.mxu0 %v6170_v35 }
  0x92   : > { %1169 = vmatprep.subr.bf16.mxu0 %v6175_v36 }
  0x95   : > { %1170 = vmatpush2.bf16.msra.mxu0 %v6173_v37 }
  0x98   : > { %1172 = vmatmul.mubr.bf16.vlgmr.msra.gmra.mxu0 %v6913_v5  ;;  %v550_v5 = vrot.slane %v7022_v41, %v7064_v0 }
 0x117   : > { %v1087_v44 = vpop.f32.mrf.mxu0 }
 0x118   : > { %v1130_v45 = vpop.f32.mrf.mxu1  ;;  %v1088_v46 = vadd.f32 %v1087_v44, %v546_v42 }
 0x119   : > { %v1131_v51 = vadd.f32 %v1130_v45, %v554_v48  ;;  %v1089_v52 = vpop.f32.mrf.mxu0 }
 0x11a   : > { %v7027_v47 = vpop.f32.mrf.mxu1  ;;  %1376 = vrot.lane.b32.xlu1 %v1088_v46, %s6586_s16  ;;  %5850 = vmatprep.mubr.msk.f32.mxu1 %vm1182_vm0, %v1088_v46  ;;  %v7080_v8 = vadd.f32 %v1089_v52, %v550_v5 }
 0x11b   : > { %v1091_v53 = vpop.f32.mrf.mxu0  ;;  %v7083_v10 = vadd.f32 %v7027_v47, %v558_v4 }
 0x11c   : > { %v1134_v49 = vpop.f32.mrf.mxu1  ;;  %v1092_v54 = vadd.f32 %v1091_v53, %v546_v42 }
 0x11d   : > { %v1135_v50 = vadd.f32 %v1134_v49, %v554_v48  ;;  %v1093_v11 = vpop.f32.mrf.mxu0 }
 0x11e   : > { %v1136_v2 = vpop.f32.mrf.mxu1  ;;  %v7094_v12 = vadd.f32 %v1093_v11, %v550_v5 }
 0x11f   : > { %1382 = vrot.lane.b32.xlu0 %v1135_v50, %s6586_s16  ;;  %5846 = vmatprep.subr.msk.mxu1 %vm1182_vm0, %v1135_v50  ;;  %v7074_v7 = vadd.f32 %v1136_v2, %v558_v4 }
 0x120   : > { %1586 = vrot.lane.b32.xlu1 %v1135_v50, %s6587_s27  ;;  %5847 = vmatpush3.xpose.msk.msra.mxu1 %vm1182_vm0, %v1135_v50 }
 0x121   : > { %5848 = vmatprep.subr.msk.mxu1 %vm1182_vm0, %v1131_v51 }
 0x123   : > { %1380 = vrot.lane.b32.xlu0 %v1131_v51, %s6586_s16 }
 0x124   : > { %1584 = vrot.lane.b32.xlu1 %v1131_v51, %s6587_s27  ;;  %5849 = vmatpush3.xpose.msk.msra.mxu1 %vm1182_vm0, %v1131_v51 }
 0x127   : > { %1378 = vrot.lane.b32.xlu0 %v1092_v54, %s6586_s16  ;;  %5851 = vmatmul.mubr.msk.f32.vlgmr.msra.gmra.mxu1 %vm1182_vm0, %v1092_v54 }
 0x128   : > { %1788 = vrot.lane.b32.xlu1 %v1135_v50, %s6588_s17 }
 0x12b   : > { %1580 = vrot.lane.b32.xlu0 %v1088_v46, %s6587_s27 }
 0x12c   : > { %1786 = vrot.lane.b32.xlu1 %v1131_v51, %s6588_s17 }
 0x12f   : > { %1582 = vrot.lane.b32.xlu0 %v1092_v54, %s6587_s27 }
 0x130   : > { %1784 = vrot.lane.b32.xlu1 %v1092_v54, %s6588_s17 }
 0x133   : > { %1782 = vrot.lane.b32.xlu0 %v1088_v46, %s6588_s17 }
 0x158   : > { %v1173_v14 = vpop.f32.mrf.mxu0 }
 0x159   : > { %v1174_v18 = vadd.f32 %v1173_v14, %v562_v15 }
 0x15a   : > { %v7102_v16 = vpop.f32.mrf.mxu0 }
 0x15c   : > { %v1177_v17 = vpop.f32.mrf.mxu0 }
 0x15d   : > { %v1178_v19 = vadd.f32 %v1177_v17, %v562_v15 }
 0x15e   : > { %v7106_v26 = vpop.f32.mrf.mxu0 }
 0x15f   : > { %5853 = vmatprep.subr.mxu1 %v1178_v19 }
 0x160   : > { %5854 = vmatpush3.msra.mxu1 %v1178_v19 }
 0x161   : > { %5855 = vmatprep.subr.mxu1 %v1174_v18 }
 0x162   : > { %5856 = vmatpush3.msra.mxu1 %v1174_v18 }
 0x18c   : > { %v1377_v55 = vpop.permute.xlu1 %1376 }
 0x18d   : > { %5864 = vmatprep.mubr.msk.f32.mxu0 %vm1182_vm0, %v1377_v55 }
 0x191   : > { %v1383_v56 = vpop.permute.xlu0 %1382 }
 0x192   : > { %v1587_v57 = vpop.permute.xlu1 %1586  ;;  %5860 = vmatprep.subr.msk.mxu0 %vm1182_vm0, %v1383_v56 }
 0x193   : > { %5861 = vmatpush3.xpose.msk.msra.mxu0 %vm1182_vm0, %v1383_v56 }
 0x195   : > { %v1381_v58 = vpop.permute.xlu0 %1380 }
 0x196   : > { %5862 = vmatprep.subr.msk.mxu0 %vm1182_vm0, %v1381_v58  ;;  %v1585_v59 = vpop.permute.xlu1 %1584 }
 0x197   : > { %5863 = vmatpush3.xpose.msk.msra.mxu0 %vm1182_vm0, %v1381_v58 }
 0x198   : > { %5874 = vmatprep.subr.msk.mxu0 %vm1182_vm0, %v1587_v57 }
 0x199   : > { %v1379_v60 = vpop.permute.xlu0 %1378 }
 0x19a   : > { %5865 = vmatmul.mubr.msk.f32.vlgmr.msra.gmra.mxu0 %vm1182_vm0, %v1379_v60  ;;  %v1789_v61 = vpop.permute.xlu1 %1788 }
 0x19b   : > { %5875 = vmatpush3.xpose.msk.msra.mxu0 %vm1182_vm0, %v1587_v57 }
 0x19c   : > { %5876 = vmatprep.subr.msk.mxu0 %vm1182_vm0, %v1585_v59 }
 0x19d   : > { %v1581_v62 = vpop.permute.xlu0 %1580 }
 0x19e   : > { %5878 = vmatprep.mubr.msk.f32.mxu0 %vm1182_vm0, %v1581_v62  ;;  %v1787_v3 = vpop.permute.xlu1 %1786 }
 0x19f   : > { %5877 = vmatpush3.xpose.msk.msra.mxu0 %vm1182_vm0, %v1585_v59 }
 0x1a0   : > { %5888 = vmatprep.subr.msk.mxu0 %vm1182_vm0, %v1789_v61 }
 0x1a1   : > { %v1583_v1 = vpop.permute.xlu0 %1582 }
 0x1a2   : > { %5879 = vmatmul.mubr.msk.f32.vlgmr.msra.gmra.mxu0 %vm1182_vm0, %v1583_v1  ;;  %v1785_v9 = vpop.permute.xlu1 %1784 }
 0x1a3   : > { %5889 = vmatpush3.xpose.msk.msra.mxu0 %vm1182_vm0, %v1789_v61 }
 0x1a4   : > { %5890 = vmatprep.subr.msk.mxu0 %vm1182_vm0, %v1787_v3 }
 0x1a5   : > { %v1783_v6 = vpop.permute.xlu0 %1782 }
 0x1a6   : > { %5892 = vmatprep.mubr.msk.f32.mxu0 %vm1182_vm0, %v1783_v6 }
 0x1a7   : > { %5891 = vmatpush3.xpose.msk.msra.mxu0 %vm1182_vm0, %v1787_v3 }
 0x1a8   : > { %5902 = vmatprep.subr.msk.mxu0 %vm1182_vm0, %v7074_v7 }
 0x1aa   : > { %5893 = vmatmul.mubr.msk.f32.vlgmr.msra.gmra.mxu0 %vm1182_vm0, %v1785_v9 }
 0x1ab   : > { %5903 = vmatpush3.xpose.msk.msra.mxu0 %vm1182_vm0, %v7074_v7  ;;  %5906 = vmatprep.mubr.msk.f32.mxu0 %vm1182_vm0, %v7080_v8 }
 0x1ac   : > { %5904 = vmatprep.subr.msk.mxu0 %vm1182_vm0, %v7083_v10 }
 0x1af   : > { %5905 = vmatpush3.xpose.msk.msra.mxu0 %vm1182_vm0, %v7083_v10 }
 0x1b2   : > { %5907 = vmatmul.mubr.msk.f32.vlgmr.msra.gmra.mxu0 %vm1182_vm0, %v7094_v12 }
 0x1e7   : > { %v5852_v20 = vpop.f32.mrf.mxu1 }
 0x1e8   : > { %v1271_v21 = vmul.f32 0.17677669, %v5852_v20 }
 0x1e9   : > { %v1261_v22 = vpop.f32.mrf.mxu1 }
 0x1ea   : > { %v1270_v23 = vmul.f32 0.17677669, %v1261_v22  ;;  %v1276_v24 = vsel %vm1272_vm1, %v1271_v21, -inf }
 0x1eb   : > { %1277 = vmax.xlane.f32.xlu1 %v1276_v24 }
 0x1ec   : > { %v1273_v25 = vsel %vm1272_vm1, %v1270_v23, -inf }
 0x1ed   : > { %1274 = vmax.xlane.f32.xlu0 %v1273_v25 }
 0x25a   : > { %v5866_v27 = vpop.f32.mrf.mxu0 }
 0x25b   : > { %v1468_v30 = vmul.f32 0.17677669, %v5866_v27 }
 0x25c   : > { %v1458_v28 = vpop.f32.mrf.mxu0 }
 0x25d   : > { %v1467_v29 = vmul.f32 0.17677669, %v1458_v28  ;;  %v1472_v34 = vsel %vm1272_vm1, %v1468_v30, -inf }
 0x25f   : > { %v1469_v31 = vsel %vm1272_vm1, %v1467_v29, -inf }
 0x260   : > { %1470 = vmax.xlane.f32.xlu0 %v1469_v31 }
 0x262   : > { %v5880_v32 = vpop.f32.mrf.mxu0 }
 0x263   : > { %v1672_v33 = vmul.f32 0.17677669, %v5880_v32 }
 0x264   : > { %v1662_v35 = vpop.f32.mrf.mxu0  ;;  %1473 = vmax.xlane.f32.xlu0 %v1472_v34 }
 0x265   : > { %v1671_v36 = vmul.f32 0.17677669, %v1662_v35  ;;  %v1676_v38 = vsel %vm1272_vm1, %v1672_v33, -inf }
 0x267   : > { %v1673_v37 = vsel %vm1272_vm1, %v1671_v36, -inf }
 0x268   : > { %1674 = vmax.xlane.f32.xlu1 %v1673_v37  ;;  %1677 = vmax.xlane.f32.xlu0 %v1676_v38 }
 0x26a   : > { %v5894_v42 = vpop.f32.mrf.mxu0 }
 0x26b   : > { %v1874_v44 = vmul.f32 0.17677669, %v5894_v42 }
 0x26c   : > { %v1864_v45 = vpop.f32.mrf.mxu0 }
 0x26d   : > { %v1873_v46 = vmul.f32 0.17677669, %v1864_v45  ;;  %v1878_v47 = vsel %vm1272_vm1, %v1874_v44, -inf }
 0x26e   : > { %1879 = vmax.xlane.f32.xlu0 %v1878_v47 }
 0x26f   : > { %v1875_v48 = vsel %vm1272_vm1, %v1873_v46, -inf }
 0x270   : > { %1876 = vmax.xlane.f32.xlu1 %v1875_v48 }
 0x272   : > { %v5908_v49 = vpop.f32.mrf.mxu0 }
 0x273   : > { %v2072_v50 = vmul.f32 0.17677669, %v5908_v49 }
 0x274   : > { %v1278_v52 = vpop.xlane.xlu1 %1277  ;;  %v2062_v55 = vpop.f32.mrf.mxu0 }
 0x275   : > { %v2076_v51 = vsel %vm1272_vm1, %v2072_v50, -inf  ;;  %v1280_v53 = vsub.f32 %v1271_v21, %v1278_v52  ;;  %v7120_v56 = vmul.f32 0.17677669, %v2062_v55 }
 0x276   : > { %2077 = vmax.xlane.f32.xlu0 %v2076_v51  ;;  %v1275_v60 = vpop.xlane.xlu0 %1274 }
 0x277   : > { %v1283_v54 = vmul.f32 1.442695, %v1280_v53  ;;  %v2073_v58 = vsel %vm1272_vm1, %v7120_v56, -inf  ;;  %v1279_v61 = vsub.f32 %v1270_v23, %v1275_v60 }
 0x279   : > { %6416 = vpow2.f32 %v1283_v54  ;;  %v1281_v62 = vmul.f32 1.442695, %v1279_v61 }
 0x27b   : > { %6418 = vpow2.f32 %v1281_v62 }
 0x281   : > { %1495 = vrot.lane.b32.xlu1 %v1178_v19, %s6586_s16 }
 0x285   : > { %1697 = vrot.lane.b32.xlu1 %v1178_v19, %s6587_s27 }
 0x286   : > { %v7122_v57 = vpop.eup %6416 }
 0x287   : > { %v1288_v59 = vsel %vm1272_vm1, %v7122_v57, 0.0 }
 0x288   : > { %v7129_v1 = vpop.eup %6418 }
 0x289   : > { %1695 = vrot.lane.b32.xlu1 %v1174_v18, %s6587_s27  ;;  %v1285_v2 = vsel %vm1272_vm1, %v7129_v1, 0.0 }
 0x28c   : > { %1493 = vrot.lane.b32.xlu0 %v1174_v18, %s6586_s16 }
 0x290   : > { %1899 = vrot.lane.b32.xlu0 %v1178_v19, %s6588_s17 }
 0x2ad   : > { %2074 = vmax.xlane.f32.xlu1 %v2073_v58 }
 0x2af   : > { %1289 = vadd.xlane.f32.xlu0 %v1288_v59 }
 0x2be   : > { %1897 = vrot.lane.b32.xlu1 %v1174_v18, %s6588_s17 }
 0x2e2   : > { %1286 = vadd.xlane.f32.xlu1 %v1285_v2 }
 0x2e9   : > { %v1471_v3 = vpop.xlane.xlu0 %1470 }
 0x2ea   : > { %v1475_v4 = vsub.f32 %v1467_v29, %v1471_v3 }
 0x2ec   : > { %v1477_v5 = vmul.f32 1.442695, %v1475_v4 }
 0x2ed   : > { %v1474_v6 = vpop.xlane.xlu0 %1473 }
 0x2ee   : > { %6420 = vpow2.f32 %v1477_v5  ;;  %v1476_v9 = vsub.f32 %v1468_v30, %v1474_v6 }
 0x2f0   : > { %v1479_v11 = vmul.f32 1.442695, %v1476_v9 }
 0x2f1   : > { %v1675_v14 = vpop.xlane.xlu1 %1674  ;;  %v1678_v15 = vpop.xlane.xlu0 %1677 }
 0x2f2   : > { %6422 = vpow2.f32 %v1479_v11  ;;  %v1679_v17 = vsub.f32 %v1671_v36, %v1675_v14  ;;  %v1680_v18 = vsub.f32 %v1672_v33, %v1678_v15 }
 0x2f4   : > { %v1681_v19 = vmul.f32 1.442695, %v1679_v17  ;;  %v1683_v20 = vmul.f32 1.442695, %v1680_v18 }
 0x2f6   : > { %6424 = vpow2.f32 %v1681_v19 }
 0x2f7   : > { %6426 = vpow2.f32 %v1683_v20  ;;  %v1880_v21 = vpop.xlane.xlu0 %1879  ;;  %v565_v20 = vsub.s32 5, %v7014_v39 }
 0x2f8   : > { %v1882_v22 = vsub.f32 %v1874_v44, %v1880_v21 }
 0x2f9   : > { %v1877_v23 = vpop.xlane.xlu1 %1876 }
 0x2fa   : > { %v1885_v24 = vmul.f32 1.442695, %v1882_v22  ;;  %v1881_v25 = vsub.f32 %v1873_v46, %v1877_v23 }
 0x2fb   : > { %v7133_v27 = vpop.eup %6420 }
 0x2fc   : > { %6428 = vpow2.f32 %v1885_v24  ;;  %v1883_v28 = vmul.f32 1.442695, %v1881_v25  ;;  %v1481_v29 = vsel %vm1272_vm1, %v7133_v27, 0.0  ;;  %v566_v24 = vrot.slane %v7022_v41, %v565_v20 }
 0x2fd   : > { %v1496_v30 = vpop.permute.xlu1 %1495  ;;  %1482 = vadd.xlane.f32.xlu1 %v1481_v29 }
 0x2fe   : > { %6430 = vpow2.f32 %v1883_v28  ;;  %5867 = vmatprep.subr.mxu1 %v1496_v30 }
 0x2ff   : > { %v7137_v31 = vpop.eup %6422  ;;  %v2078_v32 = vpop.xlane.xlu0 %2077 }
 0x300   : > { %v2080_v33 = vsub.f32 %v2072_v50, %v2078_v32  ;;  %v1484_v34 = vsel %vm1272_vm1, %v7137_v31, 0.0  ;;  %v7206_v32 = vadd.f32 %v7102_v16, %v566_v24 }
 0x301   : > { %1485 = vadd.xlane.f32.xlu0 %v1484_v34  ;;  %v1698_v50 = vpop.permute.xlu1 %1697 }
 0x302   : > { %v2083_v35 = vmul.f32 1.442695, %v2080_v33 }
 0x303   : > { %v7141_v36 = vpop.eup %6424  ;;  %v1494_v59 = vpop.permute.xlu0 %1493 }
 0x304   : > { %v7143_v37 = vpop.eup %6426  ;;  %6432 = vpow2.f32 %v2083_v35  ;;  %v1685_v38 = vsel %vm1272_vm1, %v7141_v36, 0.0 }
 0x305   : > { %1686 = vadd.xlane.f32.xlu1 %v1685_v38  ;;  %v1688_v42 = vsel %vm1272_vm1, %v7143_v37, 0.0  ;;  %v1696_v51 = vpop.permute.xlu1 %1695 }
 0x306   : > { %1689 = vadd.xlane.f32.xlu0 %v1688_v42 }
 0x307   : > { %v1900_v60 = vpop.permute.xlu0 %1899 }
 0x309   : > { %v7149_v44 = vpop.eup %6428 }
 0x30a   : > { %v1890_v45 = vsel %vm1272_vm1, %v7149_v44, 0.0 }
 0x30b   : > { %v7153_v46 = vpop.eup %6430  ;;  %1891 = vadd.xlane.f32.xlu0 %v1890_v45 }
 0x30c   : > { %v1887_v47 = vsel %vm1272_vm1, %v7153_v46, 0.0 }
 0x30d   : > { %1888 = vadd.xlane.f32.xlu1 %v1887_v47 }
 0x311   : > { %v7157_v48 = vpop.eup %6432 }
 0x312   : > { %v2088_v49 = vsel %vm1272_vm1, %v7157_v48, 0.0 }
 0x313   : > { %2089 = vadd.xlane.f32.xlu0 %v2088_v49 }
 0x31e   : > { %2180 = vrot.lane.b32.xlu1 %v7083_v10, %s6586_s16 }
 0x329   : > { %2182 = vrot.lane.b32.xlu0 %v7074_v7, %s6586_s16 }
 0x32d   : > { %2176 = vrot.lane.b32.xlu0 %v7080_v8, %s6586_s16 }
 0x331   : > { %2178 = vrot.lane.b32.xlu0 %v7094_v12, %s6586_s16 }
 0x335   : > { %2380 = vrot.lane.b32.xlu0 %v7080_v8, %s6587_s27 }
 0x336   : > { %v2075_v52 = vpop.xlane.xlu1 %2074 }
 0x337   : > { %v2079_v53 = vsub.f32 %v7120_v56, %v2075_v52 }
 0x338   : > { %v1290_v61 = vpop.xlane.xlu0 %1289 }
 0x339   : > { %v2081_v54 = vmul.f32 1.442695, %v2079_v53 }
 0x33a   : > { %v1898_v56 = vpop.permute.xlu1 %1897 }
 0x33b   : > { %6434 = vpow2.f32 %v2081_v54 }
 0x33c   : > { %6436 = vrcp.f32 %v1290_v61 }
 0x348   : > { %v7172_v55 = vpop.eup %6434 }
 0x349   : > { %v2085_v58 = vsel %vm1272_vm1, %v7172_v55, 0.0  ;;  %v6437_v2 = vpop.eup %6436 }
 0x34a   : > { %2086 = vadd.xlane.f32.xlu1 %v2085_v58  ;;  %v1294_v5 = vmul.f32 %v6437_v2, %v7122_v57 }
 0x35b   : > { %2386 = vrot.lane.b32.xlu1 %v7074_v7, %s6587_s27 }
 0x35f   : > { %2384 = vrot.lane.b32.xlu1 %v7083_v10, %s6587_s27 }
 0x363   : > { %2382 = vrot.lane.b32.xlu1 %v7094_v12, %s6587_s27 }
 0x36b   : > { %v1287_v62 = vpop.xlane.xlu1 %1286 }
 0x36c   : > { %6438 = vrcp.f32 %v1287_v62 }
 0x379   : > { %v6439_v3 = vpop.eup %6438 }
 0x37a   : > { %v1292_v4 = vmul.f32 %v6439_v3, %v7129_v1 }
 0x37c   : > { %5857 = vmatprep.mubr.msk.f32.mxu1 %vm1272_vm1, %v1292_v4 }
 0x37d   : > { %5858 = vmatmul.mubr.msk.f32.vlgmr.msra.gmra.mxu1 %vm1272_vm1, %v1294_v5 }
 0x37e   : > { %5868 = vmatpush3.msra.mxu1 %v1496_v30 }
 0x37f   : > { %5869 = vmatprep.subr.mxu1 %v1494_v59 }
 0x380   : > { %5870 = vmatpush3.msra.mxu1 %v1494_v59 }
 0x381   : > { %5881 = vmatprep.subr.mxu1 %v1698_v50 }
 0x386   : > { %v1483_v6 = vpop.xlane.xlu1 %1482 }
 0x387   : > { %6440 = vrcp.f32 %v1483_v6 }
 0x38a   : > { %v1486_v9 = vpop.xlane.xlu0 %1485 }
 0x38b   : > { %6442 = vrcp.f32 %v1486_v9 }
 0x38e   : > { %v1687_v11 = vpop.xlane.xlu1 %1686 }
 0x38f   : > { %6444 = vrcp.f32 %v1687_v11  ;;  %v1690_v14 = vpop.xlane.xlu0 %1689 }
 0x390   : > { %6446 = vrcp.f32 %v1690_v14 }
 0x394   : > { %v6441_v15 = vpop.eup %6440  ;;  %v1892_v1 = vpop.xlane.xlu0 %1891 }
 0x395   : > { %v1488_v57 = vmul.f32 %v6441_v15, %v7133_v27  ;;  %6448 = vrcp.f32 %v1892_v1  ;;  %v7199_v27 = vadd.f32 %v7106_v26, %v566_v24 }
 0x396   : > { %v1889_v17 = vpop.xlane.xlu1 %1888 }
 0x397   : > { %6450 = vrcp.f32 %v1889_v17  ;;  %5871 = vmatprep.mubr.msk.f32.mxu1 %vm1272_vm1, %v1488_v57 }
 0x398   : > { %v6443_v18 = vpop.eup %6442 }
 0x399   : > { %v1490_v19 = vmul.f32 %v6443_v18, %v7137_v31 }
 0x39a   : > { %v2181_v33 = vpop.permute.xlu1 %2180 }
 0x39b   : > { %5872 = vmatmul.mubr.msk.f32.vlgmr.msra.gmra.mxu1 %vm1272_vm1, %v1490_v19 }
 0x39c   : > { %v6445_v21 = vpop.eup %6444  ;;  %5882 = vmatpush3.msra.mxu1 %v1698_v50  ;;  %v2090_v30 = vpop.xlane.xlu0 %2089 }
 0x39d   : > { %v6447_v22 = vpop.eup %6446  ;;  %5883 = vmatprep.subr.mxu1 %v1696_v51  ;;  %v1692_v23 = vmul.f32 %v6445_v21, %v7141_v36  ;;  %6452 = vrcp.f32 %v2090_v30 }
 0x39e   : > { %5884 = vmatpush3.msra.mxu1 %v1696_v51  ;;  %v1694_v25 = vmul.f32 %v6447_v22, %v7143_v37 }
 0x39f   : > { %5895 = vmatprep.subr.mxu1 %v1900_v60  ;;  %5885 = vmatprep.mubr.msk.f32.mxu1 %vm1272_vm1, %v1692_v23 }
 0x3a0   : > { %5886 = vmatmul.mubr.msk.f32.vlgmr.msra.gmra.mxu1 %vm1272_vm1, %v1694_v25  ;;  %v2183_v26 = vpop.permute.xlu0 %2182 }
 0x3a1   : > { %5896 = vmatpush3.msra.mxu1 %v1900_v60 }
 0x3a2   : > { %5897 = vmatprep.subr.mxu1 %v1898_v56  ;;  %v6449_v28 = vpop.eup %6448 }
 0x3a3   : > { %5898 = vmatpush3.msra.mxu1 %v1898_v56  ;;  %v1896_v31 = vmul.f32 %v6449_v28, %v7149_v44 }
 0x3a4   : > { %v6451_v29 = vpop.eup %6450  ;;  %5909 = vmatprep.subr.mxu1 %v7199_v27  ;;  %v2177_v37 = vpop.permute.xlu0 %2176 }
 0x3a5   : > { %v1894_v41 = vmul.f32 %v6451_v29, %v7153_v46 }
 0x3a7   : > { %5899 = vmatprep.mubr.msk.f32.mxu1 %vm1272_vm1, %v1894_v41 }
 0x3a8   : > { %5900 = vmatmul.mubr.msk.f32.vlgmr.msra.gmra.mxu1 %vm1272_vm1, %v1896_v31  ;;  %v2179_v42 = vpop.permute.xlu0 %2178 }
 0x3a9   : > { %5910 = vmatpush3.msra.mxu1 %v7199_v27 }
 0x3aa   : > { %5911 = vmatprep.subr.mxu1 %v7206_v32  ;;  %v6453_v35 = vpop.eup %6452 }
 0x3ab   : > { %5912 = vmatpush3.msra.mxu1 %v7206_v32  ;;  %v2094_v38 = vmul.f32 %v6453_v35, %v7157_v48 }
 0x3ac   : > { %5916 = vmatprep.subr.msk.mxu1 %vm1182_vm0, %v2183_v26  ;;  %v2381_v45 = vpop.permute.xlu0 %2380 }
 0x3d3   : > { %v2087_v34 = vpop.xlane.xlu1 %2086 }
 0x3d4   : > { %6454 = vrcp.f32 %v2087_v34 }
 0x3d7   : > { %v2387_v44 = vpop.permute.xlu1 %2386 }
 0x3db   : > { %v2385_v46 = vpop.permute.xlu1 %2384 }
 0x3df   : > { %v2383_v47 = vpop.permute.xlu1 %2382 }
 0x3e1   : > { %v6455_v36 = vpop.eup %6454 }
 0x3e2   : > { %v2092_v16 = vmul.f32 %v6455_v36, %v7172_v55 }
 0x3e4   : > { %5913 = vmatprep.mubr.msk.f32.mxu1 %vm1272_vm1, %v2092_v16 }
 0x3e5   : > { %5914 = vmatmul.mubr.msk.f32.vlgmr.msra.gmra.mxu1 %vm1272_vm1, %v2094_v38 }
 0x3e6   : > { %5917 = vmatpush3.xpose.msk.msra.mxu1 %vm1182_vm0, %v2183_v26  ;;  %5920 = vmatprep.mubr.msk.f32.mxu1 %vm1182_vm0, %v2177_v37 }
 0x3e7   : > { %5918 = vmatprep.subr.msk.mxu1 %vm1182_vm0, %v2181_v33 }
 0x3ea   : > { %5919 = vmatpush3.xpose.msk.msra.mxu1 %vm1182_vm0, %v2181_v33 }
 0x3eb   : > { %5930 = vmatprep.subr.msk.mxu1 %vm1182_vm0, %v2387_v44 }
 0x3ed   : > { %5921 = vmatmul.mubr.msk.f32.vlgmr.msra.gmra.mxu1 %vm1182_vm0, %v2179_v42 }
 0x3ee   : > { %5931 = vmatpush3.xpose.msk.msra.mxu1 %vm1182_vm0, %v2387_v44  ;;  %5934 = vmatprep.mubr.msk.f32.mxu1 %vm1182_vm0, %v2381_v45 }
 0x3ef   : > { %5932 = vmatprep.subr.msk.mxu1 %vm1182_vm0, %v2385_v46 }
 0x3f2   : > { %5933 = vmatpush3.xpose.msk.msra.mxu1 %vm1182_vm0, %v2385_v46 }
 0x3f5   : > { %5935 = vmatmul.mubr.msk.f32.vlgmr.msra.gmra.mxu1 %vm1182_vm0, %v2383_v47 }
 0x43d   : > { %v7228_v48 = vpop.f32.mrf.mxu1 }
 0x43f   : > { %v7230_v49 = vpop.f32.mrf.mxu1 }
 0x45b   : > { %v7232_v50 = vpop.f32.mrf.mxu1 }
 0x45d   : > { %v7234_v51 = vpop.f32.mrf.mxu1 }
 0x45e   : > { %v6007_v52 = vpack.i.bf16 %v7232_v50, %v7234_v51 }
 0x460   : > { %v7238_v53 = vpop.f32.mrf.mxu1 }
 0x462   : > { %v7240_v54 = vpop.f32.mrf.mxu1 }
 0x463   : > { %v6017_v55 = vpack.i.bf16 %v7238_v53, %v7240_v54 }
 0x468   : > { %v7244_v58 = vpop.f32.mrf.mxu1 }
 0x46a   : > { %v7246_v59 = vpop.f32.mrf.mxu1 }
 0x46b   : > { %v6027_v60 = vpack.i.bf16 %v7244_v58, %v7246_v59 }
 0x4a5   : > { %v7250_v56 = vpop.f32.mrf.mxu1 }
 0x4a7   : > { %v7252_v61 = vpop.f32.mrf.mxu1 }
 0x4ad   : > { %v5922_v62 = vpop.f32.mrf.mxu1 }
 0x4ae   : > { %v2268_v2 = vmul.f32 0.17677669, %v5922_v62 }
 0x4af   : > { %v2258_v3 = vpop.f32.mrf.mxu1 }
 0x4b0   : > { %v2267_v4 = vmul.f32 0.17677669, %v2258_v3  ;;  %v2272_v5 = vsel %vm1272_vm1, %v2268_v2, -inf }
 0x4b1   : > { %2273 = vmax.xlane.f32.xlu1 %v2272_v5 }
 0x4b2   : > { %v2269_v6 = vsel %vm1272_vm1, %v2267_v4, -inf }
 0x4b3   : > { %2270 = vmax.xlane.f32.xlu0 %v2269_v6 }
 0x4b5   : > { %v5936_v9 = vpop.f32.mrf.mxu1 }
 0x4b6   : > { %v2472_v15 = vmul.f32 0.17677669, %v5936_v9 }
 0x4b7   : > { %v2462_v11 = vpop.f32.mrf.mxu1 }
 0x4b8   : > { %v2471_v14 = vmul.f32 0.17677669, %v2462_v11  ;;  %v2476_v57 = vsel %vm1272_vm1, %v2472_v15, -inf }
 0x4ba   : > { %v2473_v1 = vsel %vm1272_vm1, %v2471_v14, -inf }
 0x4bb   : > { %2474 = vmax.xlane.f32.xlu0 %v2473_v1 }
 0x4bf   : > { %2477 = vmax.xlane.f32.xlu0 %v2476_v57 }
 0x4c2   : > { %2295 = vrot.lane.b32.xlu1 %v7199_v27, %s6586_s16 }
 0x4c6   : > { %2497 = vrot.lane.b32.xlu1 %v7199_v27, %s6587_s27 }
 0x4ca   : > { %2495 = vrot.lane.b32.xlu1 %v7206_v32, %s6587_s27 }
 0x4d5   : > { %2293 = vrot.lane.b32.xlu0 %v7206_v32, %s6586_s16 }
 0x53a   : > { %v2274_v17 = vpop.xlane.xlu1 %2273 }
 0x53b   : > { %v2276_v18 = vsub.f32 %v2268_v2, %v2274_v17 }
 0x53c   : > { %v2271_v19 = vpop.xlane.xlu0 %2270 }
 0x53d   : > { %v2279_v21 = vmul.f32 1.442695, %v2276_v18  ;;  %v2275_v22 = vsub.f32 %v2267_v4, %v2271_v19 }
 0x53e   : > { %v2296_v23 = vpop.permute.xlu1 %2295 }
 0x53f   : > { %6456 = vpow2.f32 %v2279_v21  ;;  %v2277_v24 = vmul.f32 1.442695, %v2275_v22  ;;  %5923 = vmatprep.subr.mxu0 %v2296_v23 }
 0x540   : > { %5924 = vmatpush3.msra.mxu0 %v2296_v23 }
 0x541   : > { %6458 = vpow2.f32 %v2277_v24 }
 0x542   : > { %v2498_v34 = vpop.permute.xlu1 %2497 }
 0x544   : > { %v2475_v25 = vpop.xlane.xlu0 %2474 }
 0x545   : > { %v2479_v16 = vsub.f32 %v2471_v14, %v2475_v25 }
 0x546   : > { %v2496_v45 = vpop.permute.xlu1 %2495 }
 0x547   : > { %v2481_v38 = vmul.f32 1.442695, %v2479_v16  ;;  %v6181_v16 = vld [vmem:[%s8386_s3 + $0x64] ss:$8 sps:$4 sm:$0xff]  }
 0x548   : > { %v2478_v28 = vpop.xlane.xlu0 %2477 }
 0x549   : > { %v2480_v29 = vsub.f32 %v2472_v15, %v2478_v28 }
 0x54b   : > { %v2483_v30 = vmul.f32 1.442695, %v2480_v29 }
 0x54c   : > { %v6457_v41 = vpop.eup %6456  ;;  %v2294_v31 = vpop.permute.xlu0 %2293 }
 0x54d   : > { %6460 = vpow2.f32 %v2483_v30  ;;  %5925 = vmatprep.subr.mxu0 %v2294_v31  ;;  %v2284_v26 = vsel %vm1272_vm1, %v6457_v41, 0.0 }
 0x54e   : > { %v6459_v33 = vpop.eup %6458  ;;  %2285 = vadd.xlane.f32.xlu0 %v2284_v26  ;;  %5926 = vmatpush3.msra.mxu0 %v2294_v31  ;;  %6462 = vpow2.f32 %v2481_v38  ;;  %v6179_v38 = vld [vmem:[%s8386_s3 + $0x60] ss:$8 sps:$4 sm:$0xff]  }
 0x54f   : > { %5937 = vmatprep.subr.mxu0 %v2498_v34  ;;  %v2281_v35 = vsel %vm1272_vm1, %v6459_v33, 0.0 }
 0x550   : > { %2282 = vadd.xlane.f32.xlu1 %v2281_v35 }
 0x55a   : > { %v6461_v36 = vpop.eup %6460 }
 0x55b   : > { %v2488_v37 = vsel %vm1272_vm1, %v6461_v36, 0.0  ;;  %v6463_v42 = vpop.eup %6462 }
 0x55c   : > { %2489 = vadd.xlane.f32.xlu0 %v2488_v37  ;;  %v2485_v44 = vsel %vm1272_vm1, %v6463_v42, 0.0  ;;  %v6178_v37 = vld [vmem:[%s8386_s3 + $0x74] ss:$8 sps:$4 sm:$0xff]  }
 0x561   : > { %2586 = vrot.lane.b32.xlu1 %v7083_v10, %s6588_s17 }
 0x572   : > { %2588 = vrot.lane.b32.xlu0 %v7074_v7, %s6588_s17 }
 0x576   : > { %2582 = vrot.lane.b32.xlu0 %v7080_v8, %s6588_s17 }
 0x585   : > { %2486 = vadd.xlane.f32.xlu1 %v2485_v44  ;;  %v6182_v44 = vld [vmem:[%s8386_s3 + $0x50] ss:$8 sps:$4 sm:$0xff]  }
 0x596   : > { %2584 = vrot.lane.b32.xlu1 %v7094_v12, %s6588_s17 }
 0x5d7   : > { %v2286_v46 = vpop.xlane.xlu0 %2285 }
 0x5d8   : > { %6464 = vrcp.f32 %v2286_v46  ;;  %v6185_v46 = vld [vmem:[%s8386_s3 + $0x40] ss:$8 sps:$4 sm:$0xff]  }
 0x5d9   : > { %v2283_v10 = vpop.xlane.xlu1 %2282 }
 0x5da   : > { %6466 = vrcp.f32 %v2283_v10  ;;  %v6190_v10 = vld [vmem:[%s8386_s3 + $0x34] ss:$8 sps:$4 sm:$0xff]  }
 0x5dd   : > { %v2587_v12 = vpop.permute.xlu1 %2586 }
 0x5e5   : > { %v6465_v47 = vpop.eup %6464  ;;  %v2490_v2 = vpop.xlane.xlu0 %2489 }
 0x5e6   : > { %v2290_v3 = vmul.f32 %v6465_v47, %v6457_v41  ;;  %6468 = vrcp.f32 %v2490_v2  ;;  %v6188_v47 = vld [vmem:[%s8386_s3 + $0x30] ss:$8 sps:$4 sm:$0xff]   ;;  %v6191_v2 = vld [vmem:[%s8386_s3 + $0x20] ss:$8 sps:$4 sm:$0xff]  }
 0x5e7   : > { %v6467_v62 = vpop.eup %6466 }
 0x5e8   : > { %v2288_v7 = vmul.f32 %v6467_v62, %v6459_v33  ;;  %v6193_v62 = vld [vmem:[%s8386_s3 + $0x24] ss:$8 sps:$4 sm:$0xff]  }
 0x5e9   : > { %v2589_v8 = vpop.permute.xlu0 %2588 }
 0x5ea   : > { %5927 = vmatprep.mubr.msk.f32.mxu0 %vm1272_vm1, %v2288_v7  ;;  %v6196_v7 = vld [vmem:[%s8386_s3 + $0x14] ss:$8 sps:$4 sm:$0xff]  }
 0x5eb   : > { %5928 = vmatmul.mubr.msk.f32.vlgmr.msra.gmra.mxu0 %vm1272_vm1, %v2290_v3  ;;  %v6194_v3 = vld [vmem:[%s8386_s3 + $0x10] ss:$8 sps:$4 sm:$0xff]  }
 0x5ec   : > { %5938 = vmatpush3.msra.mxu0 %v2498_v34 }
 0x5ed   : > { %5939 = vmatprep.subr.mxu0 %v2496_v45  ;;  %v2583_v14 = vpop.permute.xlu0 %2582 }
 0x5ee   : > { %5940 = vmatpush3.msra.mxu0 %v2496_v45  ;;  %v6187_v45 = vld [vmem:[%s8386_s3 + $0x44] ss:$8 sps:$4 sm:$0xff]  }
 0x5ef   : > { %5944 = vmatprep.subr.msk.mxu0 %vm1182_vm0, %v2589_v8 }
 0x5f3   : > { %v6469_v5 = vpop.eup %6468 }
 0x5f4   : > { %v2494_v11 = vmul.f32 %v6469_v5, %v6461_v36  ;;  %v6200_v5 = vld [vmem:[%s8386_s3 + $0xf0] ss:$8 sps:$4 sm:$0xff]  }
 0x60e   : > { %v2487_v4 = vpop.xlane.xlu1 %2486 }
 0x60f   : > { %6470 = vrcp.f32 %v2487_v4  ;;  %v6202_v4 = vld [vmem:[%s8386_s3 + $0xf4] ss:$8 sps:$4 sm:$0xff]  }
 0x612   : > { %v2585_v15 = vpop.permute.xlu1 %2584 }
 0x61c   : > { %v6471_v6 = vpop.eup %6470 }
 0x61d   : > { %v2492_v9 = vmul.f32 %v6471_v6, %v6463_v42  ;;  %v6184_v42 = vld [vmem:[%s8386_s3 + $0x54] ss:$8 sps:$4 sm:$0xff]   ;;  %v6205_v6 = vld [vmem:[%s8386_s3 + $0xe4] ss:$8 sps:$4 sm:$0xff]  }
 0x61f   : > { %5941 = vmatprep.mubr.msk.f32.mxu0 %vm1272_vm1, %v2492_v9  ;;  %v6203_v9 = vld [vmem:[%s8386_s3 + $0xe0] ss:$8 sps:$4 sm:$0xff]  }
 0x620   : > { %5942 = vmatmul.mubr.msk.f32.vlgmr.msra.gmra.mxu0 %vm1272_vm1, %v2494_v11  ;;  %v6208_v11 = vld [vmem:[%s8386_s3 + $0xd4] ss:$8 sps:$4 sm:$0xff]  }
 0x621   : > { %5945 = vmatpush3.xpose.msk.msra.mxu0 %vm1182_vm0, %v2589_v8  ;;  %5948 = vmatprep.mubr.msk.f32.mxu0 %vm1182_vm0, %v2583_v14  ;;  %v6199_v8 = vld [vmem:[%s8386_s3 + $0x4] ss:$8 sps:$4 sm:$0xff]   ;;  %v6206_v14 = vld [vmem:[%s8386_s3 + $0xd0] ss:$8 sps:$4 sm:$0xff]  }
 0x622   : > { %5946 = vmatprep.subr.msk.mxu0 %vm1182_vm0, %v2587_v12 }
 0x625   : > { %5947 = vmatpush3.xpose.msk.msra.mxu0 %vm1182_vm0, %v2587_v12  ;;  %v6197_v12 = vld [vmem:[%s8386_s3] ss:$8 sps:$4 sm:$0xff]  }
 0x628   : > { %5949 = vmatmul.mubr.msk.f32.vlgmr.msra.gmra.mxu0 %vm1182_vm0, %v2585_v15  ;;  %v6211_v15 = vld [vmem:[%s8386_s3 + $0xc4] ss:$8 sps:$4 sm:$0xff]  }
 0x6ab   : > { %v5929_v1 = vpop.f32.mrf.mxu0 }
 0x6ad   : > { %v2371_v57 = vpop.f32.mrf.mxu0 }
 0x6ae   : > { %v6002_v29 = vpack.i.bf16 %v5929_v1, %v2371_v57  ;;  %v6209_v1 = vld [vmem:[%s8386_s3 + $0xc0] ss:$8 sps:$4 sm:$0xff]   ;;  %v6214_v57 = vld [vmem:[%s8386_s3 + $0xb4] ss:$8 sps:$4 sm:$0xff]  }
 0x6e0   : > { %v5943_v17 = vpop.f32.mrf.mxu0 }
 0x6e2   : > { %v2573_v18 = vpop.f32.mrf.mxu0 }
 0x6e3   : > { %v6012_v19 = vpack.i.bf16 %v5943_v17, %v2573_v18  ;;  %v6212_v17 = vld [vmem:[%s8386_s3 + $0xb0] ss:$8 sps:$4 sm:$0xff]   ;;  %v6217_v18 = vld [vmem:[%s8386_s3 + $0xa4] ss:$8 sps:$4 sm:$0xff]  }
 0x6e8   : > { %v5950_v21 = vpop.f32.mrf.mxu0 }
 0x6e9   : > { %v2674_v22 = vmul.f32 0.17677669, %v5950_v21  ;;  %v6220_v21 = vld [vmem:[%s8386_s3 + $0x94] ss:$8 sps:$4 sm:$0xff]  }
 0x6ea   : > { %v2664_v23 = vpop.f32.mrf.mxu0 }
 0x6eb   : > { %v2673_v24 = vmul.f32 0.17677669, %v2664_v23  ;;  %v2678_v25 = vsel %vm1272_vm1, %v2674_v22, -inf  ;;  %v6221_v23 = vld [vmem:[%s8386_s3 + $0x80] ss:$8 sps:$4 sm:$0xff]  }
 0x6ec   : > { %2679 = vmax.xlane.f32.xlu1 %v2678_v25 }
 0x6ed   : > { %v2675_v28 = vsel %vm1272_vm1, %v2673_v24, -inf }
 0x6ee   : > { %2676 = vmax.xlane.f32.xlu0 %v2675_v28 }
 0x6fd   : > { %2699 = vrot.lane.b32.xlu1 %v7199_v27, %s6588_s17 }
 0x701   : > { %6003 = vrot.lane.b32.xlu1 %v6002_v29, %s6588_s17 }
 0x705   : > { %6008 = vrot.lane.b32.xlu1 %v6007_v52, %s6588_s17 }
 0x709   : > { %6018 = vrot.lane.b32.xlu1 %v6017_v55, %s6587_s27 }
 0x70d   : > { %6028 = vrot.lane.b32.xlu1 %v6027_v60, %s6586_s16 }
 0x775   : > { %v2680_v30 = vpop.xlane.xlu1 %2679 }
 0x776   : > { %v2682_v27 = vsub.f32 %v2674_v22, %v2680_v30  ;;  %v6218_v22 = vld [vmem:[%s8386_s3 + $0x90] ss:$8 sps:$4 sm:$0xff]  }
 0x777   : > { %v2677_v41 = vpop.xlane.xlu0 %2676 }
 0x778   : > { %v2685_v31 = vmul.f32 1.442695, %v2682_v27  ;;  %v2681_v26 = vsub.f32 %v2673_v24, %v2677_v41  ;;  %v6223_v24 = vld [vmem:[%s8386_s3 + $0x84] ss:$8 sps:$4 sm:$0xff]  }
 0x779   : > { %v2700_v33 = vpop.permute.xlu1 %2699 }
 0x77a   : > { %6472 = vpow2.f32 %v2685_v31  ;;  %v2683_v34 = vmul.f32 1.442695, %v2681_v26  ;;  %5951 = vmatprep.subr.mxu1 %v2700_v33 }
 0x77b   : > { %5952 = vmatpush3.msra.mxu1 %v2700_v33 }
 0x77c   : > { %6474 = vpow2.f32 %v2683_v34 }
 0x77d   : > { %v6004_v30 = vpop.permute.xlu1 %6003 }
 0x77e   : > { %v6006_v33 = vunpack.i.h.bf16 %v6004_v30  ;;  %v6005_v34 = vunpack.i.l.bf16 %v6004_v30 }
 0x781   : > { %v6009_v27 = vpop.permute.xlu1 %6008 }
 0x785   : > { %v6019_v41 = vpop.permute.xlu1 %6018 }
 0x787   : > { %v6473_v50 = vpop.eup %6472 }
 0x788   : > { %v2690_v51 = vsel %vm1272_vm1, %v6473_v50, 0.0 }
 0x789   : > { %v6475_v52 = vpop.eup %6474  ;;  %2691 = vadd.xlane.f32.xlu0 %v2690_v51  ;;  %v6029_v31 = vpop.permute.xlu1 %6028  ;;  %v6010_v51 = vunpack.i.l.bf16 %v6009_v27 }
 0x78a   : > { %v2687_v53 = vsel %vm1272_vm1, %v6475_v52, 0.0 }
 0x78d   : > { %2688 = vadd.xlane.f32.xlu0 %v2687_v53  ;;  %v6020_v53 = vunpack.i.l.bf16 %v6019_v41 }
 0x7a3   : > { %2697 = vrot.lane.b32.xlu0 %v7206_v32, %s6588_s17  ;;  %v6176_v32 = vld [vmem:[%s8386_s3 + $0x70] ss:$8 sps:$4 sm:$0xff]   ;;  %s6524_s17 = scalar_lea.vmem %s8341_s19, 512 }
 0x7a4   : > { %p6525_p11 = scmp.ne.s32.totalorder %s8341_s19, %s6524_s17 }
 0x7a6   : > { %p6526_p12 = pnand %p6525_p11, %p6700_p5 }
 0x7a7   : > { %6013 = vrot.lane.b32.xlu0 %v6012_v19, %s6587_s27  ;;  %v6215_v19 = vld [vmem:[%s8386_s3 + $0xa0] ss:$8 sps:$4 sm:$0xff]  }
 0x7a8   : > { %p6527_p13 = pneg %p6526_p12 }
 0x812   : > { %v2692_v54 = vpop.xlane.xlu0 %2691 }
 0x813   : > { %6476 = vrcp.f32 %v2692_v54  ;;  %v6031_v54 = vunpack.i.h.bf16 %v6029_v31 }
 0x816   : > { %v2689_v55 = vpop.xlane.xlu0 %2688 }
 0x817   : > { %6478 = vrcp.f32 %v2689_v55  ;;  %v6030_v55 = vunpack.i.l.bf16 %v6029_v31  ;;  %v3218_v31 = vld [vmem:[%s8390_s7 + $0x1a0] sm:$0xff] }
 0x81a   : > { %v2698_v58 = vpop.permute.xlu0 %2697 }
 0x81b   : > { %5953 = vmatprep.subr.mxu1 %v2698_v58 }
 0x81c   : > { %5954 = vmatpush3.msra.mxu1 %v2698_v58 }
 0x81d   : > { %3052 = vmatprep.subr.bf16.mxu1 %v6178_v37 }
 0x81e   : > { %v6014_v26 = vpop.permute.xlu0 %6013 }
 0x81f   : > { %v6016_v58 = vunpack.i.h.bf16 %v6014_v26 }
 0x820   : > { %v6477_v59 = vpop.eup %6476 }
 0x821   : > { %v2696_v36 = vmul.f32 %v6477_v59, %v6473_v50  ;;  %v6011_v50 = vunpack.i.h.bf16 %v6009_v27  ;;  %v6015_v59 = vunpack.i.l.bf16 %v6014_v26  ;;  %v3227_v27 = vld [vmem:[%s8390_s7 + $0x1e8] sm:$0xff] }
 0x824   : > { %v6479_v60 = vpop.eup %6478 }
 0x825   : > { %v2694_v35 = vmul.f32 %v6479_v60, %v6475_v52  ;;  %v6021_v52 = vunpack.i.h.bf16 %v6019_v41  ;;  %v2841_v60 = vsel %vm1182_vm0, %v7250_v56, %v6006_v33  ;;  %v3214_v41 = vld [vmem:[%s8390_s7 + $0x180] sm:$0xff] }
 0x826   : > { %v2843_v56 = vsel %vm2834_vm2, %v2841_v60, %v6016_v58  ;;  %v3211_v58 = vld [vmem:[%s8390_s7 + $0x168] sm:$0xff] }
 0x827   : > { %5955 = vmatprep.mubr.msk.f32.mxu1 %vm1272_vm1, %v2694_v35  ;;  %v2840_v35 = vsel %vm1182_vm0, %v7252_v61, %v6005_v34  ;;  %v5568_v34 = vcombine.high %v3214_v41, %v3218_v31 }
 0x828   : > { %5956 = vmatmul.mubr.msk.f32.vlgmr.msra.gmra.mxu1 %vm1272_vm1, %v2696_v36  ;;  %v2833_v36 = vsel %vm1182_vm0, %v7228_v48, %v6011_v50  ;;  %v2842_v61 = vsel %vm2834_vm2, %v2840_v35, %v6015_v59  ;;  %v3215_v50 = vld [vmem:[%s8390_s7 + $0x188] sm:$0xff]  ;;  %v5567_v59 = vcombine.low %v3214_v41, %v3218_v31 }
 0x829   : > { %3053 = vmatpush1.bf16.msra.mxu1 %v6176_v32  ;;  %v2832_v32 = vsel %vm1182_vm0, %v7230_v49, %v6010_v51  ;;  %v2880_v49 = vld [vmem:[%s8387_s4] sm:$0x3]  ;;  %v3219_v51 = vld [vmem:[%s8390_s7 + $0x1a8] sm:$0xff] }
 0x82a   : > { %3054 = vmatprep.subr.bf16.mxu1 %v6181_v16  ;;  %v2835_v16 = vsel %vm2834_vm2, %v2832_v32, %v6020_v53  ;;  %v5570_v53 = vcombine.high %v3215_v50, %v3219_v51  ;;  %v5569_v60 = vcombine.low %v3215_v50, %v3219_v51  ;;  %v3198_v32 = vld [vmem:[%s8390_s7 + $0x100] sm:$0xff]  ;;  %v3287_v50 = vld [vmem:[%s8390_s7 + $0x3c8] sm:$0xff] }
 0x82b   : > { %v3291_v51 = vld [vmem:[%s8390_s7 + $0x3e8] sm:$0xff] }
 0x82d   : > { %3055 = vmatpush1.bf16.msra.mxu1 %v6179_v38  ;;  %v2836_v38 = vsel %vm2834_vm2, %v2833_v36, %v6021_v52  ;;  %v3206_v52 = vld [vmem:[%s8390_s7 + $0x140] sm:$0xff] }
 0x82e   : > { %3056 = vmatprep.subr.bf16.mxu1 %v6184_v42 }
 0x831   : > { %3057 = vmatpush1.bf16.msra.mxu1 %v6182_v44 }
 0x832   : > { %3058 = vmatprep.subr.bf16.mxu1 %v6187_v45  ;;  %v2838_v45 = vsel %vm2837_vm3, %v2835_v16, %v6030_v55  ;;  %v3207_v55 = vld [vmem:[%s8390_s7 + $0x148] sm:$0xff] }
 0x833   : > { %v5562_v36 = vcombine.high %v3207_v55, %v3211_v58  ;;  %v3199_v16 = vld [vmem:[%s8390_s7 + $0x108] sm:$0xff] }
 0x835   : > { %3059 = vmatpush1.bf16.msra.mxu1 %v6185_v46  ;;  %v2839_v46 = vsel %vm2837_vm3, %v2836_v38, %v6031_v54  ;;  %v3210_v54 = vld [vmem:[%s8390_s7 + $0x160] sm:$0xff]  ;;  %v3203_v38 = vld [vmem:[%s8390_s7 + $0x128] sm:$0xff] }
 0x836   : > { %3060 = vmatprep.subr.bf16.mxu1 %v6190_v10  ;;  %v5560_v35 = vcombine.high %v3206_v52, %v3210_v54 }
 0x839   : > { %3061 = vmatpush1.bf16.msra.mxu1 %v6188_v47 }
 0x83a   : > { %3062 = vmatprep.subr.bf16.mxu1 %v6193_v62  ;;  %v2846_v62 = vpack.c.bf16 %v2839_v46, %v2838_v45  ;;  %v5554_v46 = vcombine.high %v3199_v16, %v3203_v38 }
 0x83d   : > { %3063 = vmatpush1.bf16.msra.mxu1 %v6191_v2  ;;  %v2885_v2 = vrot.slane %v2880_v49, %v7017_v40 }
 0x83e   : > { %3064 = vmatprep.subr.bf16.mxu1 %v6196_v7  ;;  %v2889_v7 = vrot.slane %v2880_v49, %v7064_v0 }
 0x841   : > { %3065 = vmatpush1.bf16.msra.mxu1 %v6194_v3 }
 0x842   : > { %3066 = vmatprep.subr.bf16.mxu1 %v6199_v8 }
 0x845   : > { %3067 = vmatpush1.bf16.msra.mxu1 %v6197_v12 }
 0x846   : > { %3068 = vmatprep.subr.bf16.mxu1 %v6202_v4 }
 0x849   : > { %3069 = vmatpush2.bf16.msra.mxu1 %v6200_v5 }
 0x84a   : > { %3070 = vmatprep.subr.bf16.mxu1 %v6205_v6  ;;  %v6520_v6 = vld [vmem:[%s6847_s21] sm:$0xff] }
 0x84d   : > { %3071 = vmatpush2.bf16.msra.mxu1 %v6203_v9 }
 0x84e   : > { %3072 = vmatprep.subr.bf16.mxu1 %v6208_v11  ;;  %v6521_v11 = vld [vmem:[%s6847_s21 + $0x8] sm:$0xff] }
 0x851   : > { %3073 = vmatpush2.bf16.msra.mxu1 %v6206_v14 }
 0x852   : > { %3074 = vmatprep.subr.bf16.mxu1 %v6211_v15 }
 0x855   : > { %3075 = vmatpush2.bf16.msra.mxu1 %v6209_v1 }
 0x856   : > { %3076 = vmatprep.subr.bf16.mxu1 %v6214_v57 }
 0x859   : > { %3077 = vmatpush2.bf16.msra.mxu1 %v6212_v17 }
 0x85a   : > { %3078 = vmatprep.subr.bf16.mxu1 %v6217_v18  ;;  %v6522_v18 = vld [vmem:[%s6847_s21 + $0x10] sm:$0xff] }
 0x85d   : > { %3079 = vmatpush2.bf16.msra.mxu1 %v6215_v19 }
 0x85e   : > { %3080 = vmatprep.subr.bf16.mxu1 %v6220_v21  ;;  %v6523_v21 = vld [vmem:[%s6847_s21 + $0x18] sm:$0xff]  ;;  %s6528_s21 = sshll.u32 %s6589_s20, 4  ;;  %s6529_s21 = int_to_ptr.vmem [resolvable:$false] %s6528_s21 }
 0x85f   : > { %s6530_s24 = scalar_lea.vmem %s6529_s21, 1024  ;;  %p6531_p0 = scmp.lt.s32.totalorder %s8341_s19, %s6529_s21 }
 0x860   : > { %p6532_p1 = scmp.lt.s32.totalorder %s6530_s24, %s6524_s17 }
 0x861   : > { %3081 = vmatpush2.bf16.msra.mxu1 %v6218_v22 }
 0x862   : > { %3082 = vmatprep.subr.bf16.mxu1 %v6223_v24  ;;  %v3222_v24 = vld [vmem:[%s8390_s7 + $0x1c0] sm:$0xff]  ;;  %p6533_p2 = por %p6532_p1, %p6531_p0 }
 0x864   : > { %p6534_p3 = pnand %p6533_p2, %p6527_p13 }
 0x865   : > { %3083 = vmatpush2.bf16.msra.mxu1 %v6221_v23 }
 0x8e8   : > { %v5957_v25 = vpop.f32.mrf.mxu1 }
 0x8ea   : > { %v2775_v28 = vpop.f32.mrf.mxu1 }
 0x8eb   : > { %v6022_v29 = vpack.i.bf16 %v5957_v25, %v2775_v28  ;;  %v3226_v25 = vld [vmem:[%s8390_s7 + $0x1e0] sm:$0xff]  ;;  %v3223_v28 = vld [vmem:[%s8390_s7 + $0x1c8] sm:$0xff] }
 0x8ec   : > { %v5576_v30 = vcombine.high %v3222_v24, %v3226_v25  ;;  %v5577_v26 = vcombine.low %v3223_v28, %v3227_v27  ;;  %v5578_v33 = vcombine.high %v3223_v28, %v3227_v27  ;;  %v3170_v28 = vld [vmem:[%s8390_s7 + $0x20] sm:$0xff] }
 0x8ed   : > { %6023 = vrot.lane.b32.xlu0 %v6022_v29, %s6586_s16  ;;  %v5575_v29 = vcombine.low %v3222_v24, %v3226_v25  ;;  %v3166_v25 = vld [vmem:[%s8390_s7] sm:$0xff]  ;;  %s5781_s16 = sshll.u32 %s6683_s29, 9  ;;  %s8343_s29 = scalar_lea.sflag [#allocation3], %s431_s14 }
 0x8ee   : > { %3976 = vmatprep.subr.bf16.mxu0 %v5576_v30  ;;  %4019 = vmatprep.subr.bf16.mxu1 %v5578_v33  ;;  %v3171_v30 = vld [vmem:[%s8390_s7 + $0x28] sm:$0xff]  ;;  %v5520_v31 = vcombine.high %v3166_v25, %v3170_v28  ;;  %v3286_v33 = vld [vmem:[%s8390_s7 + $0x3c0] sm:$0xff]  ;;  %s8339_s27 = scalar_lea.hbm %s8396_s13, %s5781_s16 }
 0x8ef   : > { %3977 = vmatpush1.bf16.msra.mxu0 %v5575_v29  ;;  %v3167_v29 = vld [vmem:[%s8390_s7 + $0x8] sm:$0xff] }
 0x8f0   : > { %3978 = vmatprep.subr.bf16.mxu0 %v5568_v34  ;;  %v3290_v34 = vld [vmem:[%s8390_s7 + $0x3e0] sm:$0xff] }
 0x8f3   : > { %3979 = vmatpush1.bf16.msra.mxu0 %v5567_v59  ;;  %v5641_v59 = vcombine.low %v3287_v50, %v3291_v51 }
 0x8f4   : > { %3980 = vmatprep.subr.bf16.mxu0 %v5560_v35 }
 0x95f   : > { %v6024_v37 = vpop.permute.xlu0 %6023 }
 0x960   : > { %v6026_v42 = vunpack.i.h.bf16 %v6024_v37  ;;  %v6025_v44 = vunpack.i.l.bf16 %v6024_v37  ;;  %v3202_v37 = vld [vmem:[%s8390_s7 + $0x120] sm:$0xff] }
 0x961   : > { %v5552_v45 = vcombine.high %v3198_v32, %v3202_v37 }
 0x962   : > { %v2844_v10 = vsel %vm2837_vm3, %v2842_v61, %v6025_v44  ;;  %v2845_v48 = vsel %vm2837_vm3, %v2843_v56, %v6026_v42  ;;  %v5559_v42 = vcombine.low %v3206_v52, %v3210_v54  ;;  %v5561_v44 = vcombine.low %v3207_v55, %v3211_v58  ;;  %v3190_v56 = vld [vmem:[%s8390_s7 + $0xc0] sm:$0xff] }
 0x963   : > { %v2847_v47 = vpack.c.bf16 %v2845_v48, %v2844_v10  ;;  %v3194_v61 = vld [vmem:[%s8390_s7 + $0xe0] sm:$0xff]  ;;  %v3191_v10 = vld [vmem:[%s8390_s7 + $0xc8] sm:$0xff]  ;;  %v5519_v52 = vcombine.low %v3166_v25, %v3170_v28  ;;  %v5640_v54 = vcombine.high %v3286_v33, %v3290_v34  ;;  %v5642_v55 = vcombine.high %v3287_v50, %v3291_v51 }
 0x964   : > { %v3195_v48 = vld [vmem:[%s8390_s7 + $0xe8] sm:$0xff]  ;;  %3981 = vmatpush1.bf16.msra.mxu0 %v5559_v42  ;;  %v5544_v49 = vcombine.high %v3190_v56, %v3194_v61  ;;  %v5639_v58 = vcombine.low %v3286_v33, %v3290_v34 }
 0x965   : > { %3084 = vmatprep.mubr.bf16.mxu1 %v2847_v47  ;;  %v5551_v47 = vcombine.low %v3198_v32, %v3202_v37  ;;  %3982 = vmatprep.subr.bf16.mxu0 %v5552_v45  ;;  %v3251_v33 = vld [vmem:[%s8390_s7 + $0x2a8] sm:$0xff] }
 0x966   : > { %3085 = vmatmul.mubr.bf16.vlgmr.msra.gmra.mxu1 %v2846_v62  ;;  %v5553_v62 = vcombine.low %v3199_v16, %v3203_v38 }
 0x967   : > { %4020 = vmatpush1.bf16.msra.mxu1 %v5577_v26  ;;  %v5522_v26 = vcombine.high %v3167_v29, %v3171_v30 }
 0x968   : > { %4021 = vmatprep.subr.bf16.mxu1 %v5570_v53  ;;  %3983 = vmatpush1.bf16.msra.mxu0 %v5551_v47  ;;  %v5521_v53 = vcombine.low %v3167_v29, %v3171_v30  ;;  %v3255_v29 = vld [vmem:[%s8390_s7 + $0x2c8] sm:$0xff] }
 0x969   : > { %3984 = vmatprep.subr.bf16.mxu0 %v5544_v49  ;;  %v3259_v30 = vld [vmem:[%s8390_s7 + $0x2e8] sm:$0xff] }
 0x96a   : > { %v5609_v50 = vcombine.low %v3255_v29, %v3259_v30 }
 0x96b   : > { %4022 = vmatpush1.bf16.msra.mxu1 %v5569_v60 }
 0x96c   : > { %4023 = vmatprep.subr.bf16.mxu1 %v5562_v36 }
 0x96f   : > { %4024 = vmatpush1.bf16.msra.mxu1 %v5561_v44 }
 0x970   : > { %4025 = vmatprep.subr.bf16.mxu1 %v5554_v46 }
 0x973   : > { %4026 = vmatpush1.bf16.msra.mxu1 %v5553_v62 }
 0xa26   : > { %v3086_v3 = vpop.f32.mrf.mxu1 }
 0xa27   : > { %v3087_v8 = vadd.f32 %v3086_v3, %v2885_v2  ;;  %v3186_v3 = vld [vmem:[%s8390_s7 + $0xa0] sm:$0xff] }
 0xa28   : > { %v3088_v12 = vpop.f32.mrf.mxu1 }
 0xa29   : > { %v3089_v4 = vadd.f32 %v3088_v12, %v2889_v7  ;;  %v7427_v9 = vadd.f32 %v6520_v6, %v3087_v8  ;;  %v3183_v8 = vld [vmem:[%s8390_s7 + $0x88] sm:$0xff] }
 0xa2a   : > { %v3090_v5 = vpop.f32.mrf.mxu1  ;;  %v3187_v12 = vld [vmem:[%s8390_s7 + $0xa8] sm:$0xff] }
 0xa2b   : > { %v7430_v14 = vadd.f32 %v6521_v11, %v3089_v4  ;;  %v3091_v15 = vadd.f32 %v3090_v5, %v2885_v2  ;;  %v5546_v2 = vcombine.high %v3191_v10, %v3195_v48  ;;  %v5543_v4 = vcombine.low %v3190_v56, %v3194_v61  ;;  %v3278_v61 = vld [vmem:[%s8390_s7 + $0x380] sm:$0xff] }
 0xa2c   : > { %v3092_v1 = vpop.f32.mrf.mxu1  ;;  %v5545_v5 = vcombine.low %v3191_v10, %v3195_v48  ;;  %v5538_v11 = vcombine.high %v3183_v8, %v3187_v12  ;;  %v3283_v48 = vld [vmem:[%s8390_s7 + $0x3a8] sm:$0xff] }
 0xa2d   : > { %v3093_v57 = vadd.f32 %v3092_v1, %v2889_v7  ;;  %v3101_v17 = vadd.f32 %v7430_v14, %v7427_v9  ;;  %v7435_v19 = vadd.f32 %v6522_v18, %v3091_v15  ;;  %v3182_v7 = vld [vmem:[%s8390_s7 + $0x80] sm:$0xff]  ;;  %4027 = vmatprep.subr.bf16.mxu1 %v5546_v2  ;;  %3985 = vmatpush1.bf16.msra.mxu0 %v5543_v4 }
 0xa2e   : > { %v5536_v6 = vcombine.high %v3182_v7, %v3186_v3  ;;  %v3174_v15 = vld [vmem:[%s8390_s7 + $0x40] sm:$0xff]  ;;  %v5535_v18 = vcombine.low %v3182_v7, %v3186_v3  ;;  %4028 = vmatpush1.bf16.msra.mxu1 %v5545_v5  ;;  %v3271_v3 = vld [vmem:[%s8390_s7 + $0x348] sm:$0xff] }
 0xa2f   : > { %v7438_v22 = vadd.f32 %v6523_v21, %v3093_v57  ;;  %3102 = vadd.xlane.f32.xlu0 %v3101_v17  ;;  %v3178_v1 = vld [vmem:[%s8390_s7 + $0x60] sm:$0xff]  ;;  %v3175_v57 = vld [vmem:[%s8390_s7 + $0x48] sm:$0xff]  ;;  %v5537_v21 = vcombine.low %v3183_v8, %v3187_v12  ;;  %4029 = vmatprep.subr.bf16.mxu1 %v5538_v11 }
 0xa30   : > { %v3179_v17 = vld [vmem:[%s8390_s7 + $0x68] sm:$0xff]  ;;  %3986 = vmatprep.subr.bf16.mxu0 %v5536_v6  ;;  %v5527_v27 = vcombine.low %v3174_v15, %v3178_v1  ;;  %v3270_v2 = vld [vmem:[%s8390_s7 + $0x340] sm:$0xff] }
 0xa31   : > { %v3104_v23 = vadd.f32 %v7438_v22, %v7435_v19  ;;  %v5530_v24 = vcombine.high %v3175_v57, %v3179_v17  ;;  %3987 = vmatpush1.bf16.msra.mxu0 %v5535_v18  ;;  %v5529_v41 = vcombine.low %v3175_v57, %v3179_v17  ;;  %v3274_v7 = vld [vmem:[%s8390_s7 + $0x360] sm:$0xff]  ;;  %v3275_v12 = vld [vmem:[%s8390_s7 + $0x368] sm:$0xff] }
 0xa32   : > { %4030 = vmatpush1.bf16.msra.mxu1 %v5537_v21  ;;  %v5624_v8 = vcombine.high %v3270_v2, %v3274_v7  ;;  %v5623_v4 = vcombine.low %v3270_v2, %v3274_v7  ;;  %v5625_v5 = vcombine.low %v3271_v3, %v3275_v12  ;;  %v5626_v6 = vcombine.high %v3271_v3, %v3275_v12  ;;  %v3262_v11 = vld [vmem:[%s8390_s7 + $0x300] sm:$0xff]  ;;  %v3267_v18 = vld [vmem:[%s8390_s7 + $0x328] sm:$0xff] }
 0xa33   : > { %3105 = vadd.xlane.f32.xlu1 %v3104_v23  ;;  %v5528_v23 = vcombine.high %v3174_v15, %v3178_v1  ;;  %4031 = vmatprep.subr.bf16.mxu1 %v5530_v24  ;;  %v3266_v15 = vld [vmem:[%s8390_s7 + $0x320] sm:$0xff]  ;;  %v3263_v1 = vld [vmem:[%s8390_s7 + $0x308] sm:$0xff] }
 0xa34   : > { %v5615_v57 = vcombine.low %v3262_v11, %v3266_v15  ;;  %v5616_v17 = vcombine.high %v3262_v11, %v3266_v15  ;;  %v3254_v21 = vld [vmem:[%s8390_s7 + $0x2c0] sm:$0xff]  ;;  %v5617_v24 = vcombine.low %v3263_v1, %v3267_v18  ;;  %v5618_v25 = vcombine.high %v3263_v1, %v3267_v18 }
 0xa35   : > { %3988 = vmatprep.subr.bf16.mxu0 %v5528_v23  ;;  %v3258_v23 = vld [vmem:[%s8390_s7 + $0x2e0] sm:$0xff] }
 0xa36   : > { %3989 = vmatpush1.bf16.msra.mxu0 %v5527_v27  ;;  %4032 = vmatpush1.bf16.msra.mxu1 %v5529_v41  ;;  %v5608_v28 = vcombine.high %v3254_v21, %v3258_v23  ;;  %v3246_v27 = vld [vmem:[%s8390_s7 + $0x280] sm:$0xff]  ;;  %v5610_v41 = vcombine.high %v3255_v29, %v3259_v30  ;;  %v5607_v34 = vcombine.low %v3254_v21, %v3258_v23 }
 0xa37   : > { %3990 = vmatprep.subr.bf16.mxu0 %v5520_v31  ;;  %4033 = vmatprep.subr.bf16.mxu1 %v5522_v26  ;;  %v3250_v31 = vld [vmem:[%s8390_s7 + $0x2a0] sm:$0xff]  ;;  %v3247_v26 = vld [vmem:[%s8390_s7 + $0x288] sm:$0xff] }
 0xa38   : > { %v5600_v51 = vcombine.high %v3246_v27, %v3250_v31  ;;  %v3099_v15 = vld [vmem:[%s8388_s5] sm:$0x3] }
 0xa39   : > { %v3142_v18 = vrot.slane %v3099_v15, %v7064_v0  ;;  %v3138_v23 = vrot.slane %v3099_v15, %v7017_v40 }
 0xa3a   : > { %3991 = vmatpush1.bf16.msra.mxu0 %v5519_v52  ;;  %4034 = vmatpush1.bf16.msra.mxu1 %v5521_v53  ;;  %v5602_v52 = vcombine.high %v3247_v26, %v3251_v33  ;;  %v3238_v53 = vld [vmem:[%s8390_s7 + $0x240] sm:$0xff] }
 0xa3b   : > { %3992 = vmatprep.subr.bf16.mxu0 %v5640_v54  ;;  %4035 = vmatprep.subr.bf16.mxu1 %v5642_v55  ;;  %v3242_v54 = vld [vmem:[%s8390_s7 + $0x260] sm:$0xff]  ;;  %v3239_v55 = vld [vmem:[%s8390_s7 + $0x248] sm:$0xff] }
 0xa3e   : > { %3993 = vmatpush2.bf16.msra.mxu0 %v5639_v58  ;;  %4036 = vmatpush2.bf16.msra.mxu1 %v5641_v59  ;;  %v3243_v58 = vld [vmem:[%s8390_s7 + $0x268] sm:$0xff]  ;;  %v5599_v59 = vcombine.low %v3246_v27, %v3250_v31 }
 0xab8   : > { %v3103_v60 = vpop.xlane.xlu0 %3102 }
 0xab9   : > { %v3108_v35 = vmul.f32 0.00390625, %v3103_v60  ;;  %v5601_v60 = vcombine.low %v3247_v26, %v3251_v33 }
 0xabb   : > { %v7551_v36 = vsub.f32 %v7427_v9, %v3108_v35  ;;  %v7554_v32 = vsub.f32 %v7430_v14, %v3108_v35  ;;  %v5592_v35 = vcombine.high %v3238_v53, %v3242_v54 }
 0xabc   : > { %v3106_v37 = vpop.xlane.xlu1 %3105 }
 0xabd   : > { %v3109_v16 = vmul.f32 0.00390625, %v3106_v37  ;;  %v3114_v38 = vmul.f32 %v7551_v36, %v7551_v36  ;;  %v3115_v42 = vmul.f32 %v7554_v32, %v7554_v32  ;;  %v5594_v37 = vcombine.high %v3239_v55, %v3243_v58 }
 0xabf   : > { %v7561_v44 = vsub.f32 %v7435_v19, %v3109_v16  ;;  %v7564_v45 = vsub.f32 %v7438_v22, %v3109_v16  ;;  %v3118_v46 = vadd.f32 %v3115_v42, %v3114_v38  ;;  %v3282_v19 = vld [vmem:[%s8390_s7 + $0x3a0] sm:$0xff]  ;;  %v3279_v22 = vld [vmem:[%s8390_s7 + $0x388] sm:$0xff] }
 0xac0   : > { %v5632_v10 = vcombine.high %v3278_v61, %v3282_v19  ;;  %v5631_v47 = vcombine.low %v3278_v61, %v3282_v19  ;;  %v5633_v62 = vcombine.low %v3279_v22, %v3283_v48  ;;  %v5634_v49 = vcombine.high %v3279_v22, %v3283_v48  ;;  %v3230_v16 = vld [vmem:[%s8390_s7 + $0x200] sm:$0xff]  ;;  %v3231_v42 = vld [vmem:[%s8390_s7 + $0x208] sm:$0xff]  ;;  %v3228_v48 = vld [vmem:[%s8390_s7 + $0x1f0] sm:$0xff] }
 0xac1   : > { %3119 = vadd.xlane.f32.xlu0 %v3118_v46  ;;  %v3116_v9 = vmul.f32 %v7561_v44, %v7561_v44  ;;  %v3117_v14 = vmul.f32 %v7564_v45, %v7564_v45  ;;  %v3234_v38 = vld [vmem:[%s8390_s7 + $0x220] sm:$0xff]  ;;  %v3235_v46 = vld [vmem:[%s8390_s7 + $0x228] sm:$0xff] }
 0xac2   : > { %3994 = vmatprep.subr.bf16.mxu0 %v5632_v10  ;;  %4037 = vmatprep.subr.bf16.mxu1 %v5634_v49  ;;  %v5586_v61 = vcombine.high %v3231_v42, %v3235_v46  ;;  %v5583_v19 = vcombine.low %v3230_v16, %v3234_v38  ;;  %v5585_v22 = vcombine.low %v3231_v42, %v3235_v46  ;;  %v3224_v10 = vld [vmem:[%s8390_s7 + $0x1d0] sm:$0xff]  ;;  %v3229_v49 = vld [vmem:[%s8390_s7 + $0x1f8] sm:$0xff] }
 0xac3   : > { %v3121_v56 = vadd.f32 %v3117_v14, %v3116_v9  ;;  %3995 = vmatpush2.bf16.msra.mxu0 %v5631_v47  ;;  %4038 = vmatpush2.bf16.msra.mxu1 %v5633_v62  ;;  %v5591_v9 = vcombine.low %v3238_v53, %v3242_v54  ;;  %v5593_v14 = vcombine.low %v3239_v55, %v3243_v58  ;;  %v3225_v47 = vld [vmem:[%s8390_s7 + $0x1d8] sm:$0xff]  ;;  %v3208_v54 = vld [vmem:[%s8390_s7 + $0x150] sm:$0xff] }
 0xac4   : > { %3996 = vmatprep.subr.bf16.mxu0 %v5624_v8  ;;  %4039 = vmatprep.subr.bf16.mxu1 %v5626_v6  ;;  %v5580_v62 = vcombine.high %v3224_v10, %v3228_v48  ;;  %v5579_v2 = vcombine.low %v3224_v10, %v3228_v48  ;;  %v5581_v7 = vcombine.low %v3225_v47, %v3229_v49  ;;  %v3200_v46 = vld [vmem:[%s8390_s7 + $0x110] sm:$0xff] }
 0xac5   : > { %3122 = vadd.xlane.f32.xlu0 %v3121_v56  ;;  %v5584_v56 = vcombine.high %v3230_v16, %v3234_v38  ;;  %v5582_v3 = vcombine.high %v3225_v47, %v3229_v49  ;;  %v3192_v48 = vld [vmem:[%s8390_s7 + $0xd0] sm:$0xff]  ;;  %v3197_v49 = vld [vmem:[%s8390_s7 + $0xf8] sm:$0xff] }
 0xac6   : > { %v3196_v47 = vld [vmem:[%s8390_s7 + $0xf0] sm:$0xff] }
 0xac7   : > { %3997 = vmatpush2.bf16.msra.mxu0 %v5623_v4  ;;  %4040 = vmatpush2.bf16.msra.mxu1 %v5625_v5 }
 0xac8   : > { %3998 = vmatprep.subr.bf16.mxu0 %v5616_v17  ;;  %4041 = vmatprep.subr.bf16.mxu1 %v5618_v25 }
 0xacb   : > { %3999 = vmatpush2.bf16.msra.mxu0 %v5615_v57  ;;  %4042 = vmatpush2.bf16.msra.mxu1 %v5617_v24  ;;  %v3100_v57 = vld [vmem:[%s8389_s6] sm:$0x3] }
 0xacc   : > { %4000 = vmatprep.subr.bf16.mxu0 %v5608_v28  ;;  %4043 = vmatprep.subr.bf16.mxu1 %v5610_v41  ;;  %v3157_v25 = vrot.slane %v3100_v57, %v7064_v0  ;;  %v3153_v28 = vrot.slane %v3100_v57, %v7017_v40 }
 0xacf   : > { %4001 = vmatpush2.bf16.msra.mxu0 %v5607_v34  ;;  %4044 = vmatpush2.bf16.msra.mxu1 %v5609_v50  ;;  %v3216_v50 = vld [vmem:[%s8390_s7 + $0x190] sm:$0xff] }
 0xad0   : > { %4002 = vmatprep.subr.bf16.mxu0 %v5600_v51  ;;  %4045 = vmatprep.subr.bf16.mxu1 %v5602_v52  ;;  %v3221_v51 = vld [vmem:[%s8390_s7 + $0x1b8] sm:$0xff] }
 0xad3   : > { %4003 = vmatpush2.bf16.msra.mxu0 %v5599_v59  ;;  %4046 = vmatpush2.bf16.msra.mxu1 %v5601_v60  ;;  %v3212_v59 = vld [vmem:[%s8390_s7 + $0x170] sm:$0xff]  ;;  %v3209_v60 = vld [vmem:[%s8390_s7 + $0x158] sm:$0xff] }
 0xad4   : > { %4004 = vmatprep.subr.bf16.mxu0 %v5592_v35  ;;  %4047 = vmatprep.subr.bf16.mxu1 %v5594_v37  ;;  %v3213_v35 = vld [vmem:[%s8390_s7 + $0x178] sm:$0xff]  ;;  %v5564_v38 = vcombine.high %v3208_v54, %v3212_v59 }
 0xad5   : > { %v5566_v42 = vcombine.high %v3209_v60, %v3213_v35 }
 0xad7   : > { %4005 = vmatpush2.bf16.msra.mxu0 %v5591_v9  ;;  %4048 = vmatpush2.bf16.msra.mxu1 %v5593_v14  ;;  %v3204_v9 = vld [vmem:[%s8390_s7 + $0x130] sm:$0xff]  ;;  %v3201_v14 = vld [vmem:[%s8390_s7 + $0x118] sm:$0xff] }
 0xad8   : > { %4006 = vmatprep.subr.bf16.mxu0 %v5584_v56  ;;  %4049 = vmatprep.subr.bf16.mxu1 %v5586_v61  ;;  %v3205_v56 = vld [vmem:[%s8390_s7 + $0x138] sm:$0xff]  ;;  %v5563_v61 = vcombine.low %v3208_v54, %v3212_v59 }
 0xad9   : > { %v5558_v10 = vcombine.high %v3201_v14, %v3205_v56  ;;  %v3289_v54 = vld [vmem:[%s8390_s7 + $0x3d8] sm:$0xff] }
 0xadb   : > { %4007 = vmatpush2.bf16.msra.mxu0 %v5583_v19  ;;  %4050 = vmatpush2.bf16.msra.mxu1 %v5585_v22  ;;  %v5565_v19 = vcombine.low %v3209_v60, %v3213_v35  ;;  %v5556_v22 = vcombine.high %v3200_v46, %v3204_v9 }
 0xadc   : > { %4062 = vmatprep.subr.bf16.mxu0 %v5580_v62  ;;  %4105 = vmatprep.subr.bf16.mxu1 %v5582_v3  ;;  %v3193_v62 = vld [vmem:[%s8390_s7 + $0xd8] sm:$0xff]  ;;  %v5548_v3 = vcombine.high %v3192_v48, %v3196_v47 }
 0xadd   : > { %v5549_v15 = vcombine.low %v3193_v62, %v3197_v49 }
 0xb4a   : > { %v3120_v8 = vpop.xlane.xlu0 %3119 }
 0xb4b   : > { %v3124_v12 = vmul.f32 0.00390625, %v3120_v8  ;;  %v5550_v8 = vcombine.high %v3193_v62, %v3197_v49 }
 0xb4d   : > { %v3126_v4 = vadd.f32 1e-05, %v3124_v12  ;;  %v3184_v12 = vld [vmem:[%s8390_s7 + $0x90] sm:$0xff] }
 0xb4e   : > { %v3123_v5 = vpop.xlane.xlu0 %3122 }
 0xb4f   : > { %6480 = vrsqrt.f32 %v3126_v4  ;;  %v3125_v6 = vmul.f32 0.00390625, %v3123_v5  ;;  %v3188_v4 = vld [vmem:[%s8390_s7 + $0xb0] sm:$0xff]  ;;  %v3185_v5 = vld [vmem:[%s8390_s7 + $0x98] sm:$0xff] }
 0xb51   : > { %v3127_v11 = vadd.f32 1e-05, %v3125_v6  ;;  %v3189_v6 = vld [vmem:[%s8390_s7 + $0xb8] sm:$0xff] }
 0xb52   : > { %v5542_v57 = vcombine.high %v3185_v5, %v3189_v6 }
 0xb53   : > { %6482 = vrsqrt.f32 %v3127_v11  ;;  %v5547_v11 = vcombine.low %v3192_v48, %v3196_v47 }
 0xb5c   : > { %v6481_v1 = vpop.eup %6480 }
 0xb5d   : > { %v3131_v17 = vmul.f32 %v6481_v1, %v7554_v32  ;;  %v3130_v21 = vmul.f32 %v6481_v1, %v7551_v36  ;;  %v5540_v1 = vcombine.high %v3184_v12, %v3188_v4 }
 0xb5f   : > { %v3146_v30 = vmul.f32 %v3142_v18, %v3131_v17  ;;  %v3145_v41 = vmul.f32 %v3138_v23, %v3130_v21  ;;  %v3176_v17 = vld [vmem:[%s8390_s7 + $0x50] sm:$0xff]  ;;  %v3177_v21 = vld [vmem:[%s8390_s7 + $0x58] sm:$0xff] }
 0xb60   : > { %v6483_v24 = vpop.eup %6482 }
 0xb61   : > { %v3133_v29 = vmul.f32 %v6483_v24, %v7564_v45  ;;  %v3132_v27 = vmul.f32 %v6483_v24, %v7561_v44  ;;  %v7680_v32 = vadd.f32 %v3157_v25, %v3146_v30  ;;  %v7684_v36 = vadd.f32 %v3153_v28, %v3145_v41  ;;  %v3220_v45 = vld [vmem:[%s8390_s7 + $0x1b0] sm:$0xff]  ;;  %v3217_v44 = vld [vmem:[%s8390_s7 + $0x198] sm:$0xff] }
 0xb62   : > { %v5572_v55 = vcombine.high %v3216_v50, %v3220_v45  ;;  %v5574_v58 = vcombine.high %v3217_v44, %v3221_v51  ;;  %v5571_v37 = vcombine.low %v3216_v50, %v3220_v45  ;;  %v5573_v16 = vcombine.low %v3217_v44, %v3221_v51  ;;  %v3168_v30 = vld [vmem:[%s8390_s7 + $0x10] sm:$0xff]  ;;  %v3169_v41 = vld [vmem:[%s8390_s7 + $0x18] sm:$0xff] }
 0xb63   : > { %v3148_v31 = vmul.f32 %v3142_v18, %v3133_v29  ;;  %v3147_v26 = vmul.f32 %v3138_v23, %v3132_v27  ;;  %v3180_v18 = vld [vmem:[%s8390_s7 + $0x70] sm:$0xff]  ;;  %v3181_v23 = vld [vmem:[%s8390_s7 + $0x78] sm:$0xff]  ;;  %v5539_v24 = vcombine.low %v3184_v12, %v3188_v4 }
 0xb64   : > { %v5534_v29 = vcombine.high %v3177_v21, %v3181_v23  ;;  %v3172_v27 = vld [vmem:[%s8390_s7 + $0x30] sm:$0xff]  ;;  %v5533_v50 = vcombine.low %v3177_v21, %v3181_v23 }
 0xb65   : > { %v7682_v33 = vadd.f32 %v3157_v25, %v3148_v31  ;;  %v7686_v34 = vadd.f32 %v3153_v28, %v3147_v26  ;;  %v5541_v25 = vcombine.low %v3185_v5, %v3189_v6  ;;  %v5532_v28 = vcombine.high %v3176_v17, %v3180_v18  ;;  %v3173_v31 = vld [vmem:[%s8390_s7 + $0x38] sm:$0xff]  ;;  %v3288_v51 = vld [vmem:[%s8390_s7 + $0x3d0] sm:$0xff] }
 0xb66   : > { %v5531_v26 = vcombine.low %v3176_v17, %v3180_v18  ;;  %v5524_v45 = vcombine.high %v3168_v30, %v3172_v27  ;;  %v5526_v44 = vcombine.high %v3169_v41, %v3173_v31  ;;  %v5525_v59 = vcombine.low %v3169_v41, %v3173_v31 }
 0xb67   : > { %v3165_v52 = vpack.c.bf16 %v7682_v33, %v7680_v32  ;;  %v7704_v53 = vpack.c.bf16 %v7686_v34, %v7684_v36 }
 0xb69   : > { %4008 = vmatprep.mubr.bf16.mxu0 %v3165_v52  ;;  %4051 = vmatprep.mubr.bf16.mxu1 %v3165_v52 }
 0xb6a   : > { %4009 = vmatmul.mubr.bf16.vlgmr.msra.gmra.mxu0 %v7704_v53  ;;  %4052 = vmatmul.mubr.bf16.vlgmr.msra.gmra.mxu1 %v7704_v53 }
 0xb6b   : > { %4063 = vmatpush1.bf16.msra.mxu0 %v5579_v2  ;;  %4106 = vmatpush1.bf16.msra.mxu1 %v5581_v7  ;;  %v5555_v2 = vcombine.low %v3200_v46, %v3204_v9  ;;  %v5557_v7 = vcombine.low %v3201_v14, %v3205_v56 }
 0xb6c   : > { %4094 = vmatprep.mubr.bf16.mxu0 %v3165_v52  ;;  %4137 = vmatprep.mubr.bf16.mxu1 %v3165_v52  ;;  %v3292_v52 = vld [vmem:[%s8390_s7 + $0x3f0] sm:$0xff] }
 0xb6d   : > { %4064 = vmatprep.subr.bf16.mxu0 %v5572_v55  ;;  %4107 = vmatprep.subr.bf16.mxu1 %v5574_v58  ;;  %v3293_v55 = vld [vmem:[%s8390_s7 + $0x3f8] sm:$0xff]  ;;  %v5523_v58 = vcombine.low %v3168_v30, %v3172_v27  ;;  %v5644_v60 = vcombine.high %v3288_v51, %v3292_v52  ;;  %v5643_v46 = vcombine.low %v3288_v51, %v3292_v52 }
 0xb6e   : > { %v5646_v35 = vcombine.high %v3289_v54, %v3293_v55  ;;  %v5645_v9 = vcombine.low %v3289_v54, %v3293_v55 }
 0xb6f   : > { %4065 = vmatpush1.bf16.msra.mxu0 %v5571_v37  ;;  %4108 = vmatpush1.bf16.msra.mxu1 %v5573_v16  ;;  %v3280_v37 = vld [vmem:[%s8390_s7 + $0x390] sm:$0xff] }
 0xb70   : > { %4066 = vmatprep.subr.bf16.mxu0 %v5564_v38  ;;  %4109 = vmatprep.subr.bf16.mxu1 %v5566_v42  ;;  %v3284_v16 = vld [vmem:[%s8390_s7 + $0x3b0] sm:$0xff]  ;;  %v3281_v38 = vld [vmem:[%s8390_s7 + $0x398] sm:$0xff] }
 0xb71   : > { %v3285_v42 = vld [vmem:[%s8390_s7 + $0x3b8] sm:$0xff]  ;;  %v5636_v14 = vcombine.high %v3280_v37, %v3284_v16  ;;  %v5635_v48 = vcombine.low %v3280_v37, %v3284_v16 }
 0xb72   : > { %v5638_v56 = vcombine.high %v3281_v38, %v3285_v42  ;;  %v5637_v47 = vcombine.low %v3281_v38, %v3285_v42 }
 0xb73   : > { %4067 = vmatpush1.bf16.msra.mxu0 %v5563_v61  ;;  %4110 = vmatpush1.bf16.msra.mxu1 %v5565_v19  ;;  %v3272_v61 = vld [vmem:[%s8390_s7 + $0x350] sm:$0xff] }
 0xb74   : > { %4068 = vmatprep.subr.bf16.mxu0 %v5556_v22  ;;  %4111 = vmatprep.subr.bf16.mxu1 %v5558_v10  ;;  %v3276_v19 = vld [vmem:[%s8390_s7 + $0x370] sm:$0xff]  ;;  %v3273_v22 = vld [vmem:[%s8390_s7 + $0x358] sm:$0xff] }
 0xb75   : > { %v3277_v10 = vld [vmem:[%s8390_s7 + $0x378] sm:$0xff]  ;;  %v5628_v62 = vcombine.high %v3272_v61, %v3276_v19  ;;  %v5627_v12 = vcombine.low %v3272_v61, %v3276_v19 }
 0xb76   : > { %v5630_v49 = vcombine.high %v3273_v22, %v3277_v10  ;;  %v5629_v4 = vcombine.low %v3273_v22, %v3277_v10  ;;  %v6224_v61 = vld [vmem:[%s8392_s9 + $0x70] ss:$8 sps:$4 sm:$0xff]   ;;  %v6232_v22 = vld [vmem:[%s8392_s9 + $0x64] ss:$8 sps:$4 sm:$0xff]  }
 0xb77   : > { %4069 = vmatpush1.bf16.msra.mxu0 %v5555_v2  ;;  %4112 = vmatpush1.bf16.msra.mxu1 %v5557_v7  ;;  %v3264_v2 = vld [vmem:[%s8390_s7 + $0x310] sm:$0xff]  ;;  %v6235_v10 = vld [vmem:[%s8392_s9 + $0x164] ss:$8 sps:$4 sm:$0xff]  }
 0xb78   : > { %4070 = vmatprep.subr.bf16.mxu0 %v5548_v3  ;;  %4113 = vmatprep.subr.bf16.mxu1 %v5550_v8  ;;  %v3268_v7 = vld [vmem:[%s8390_s7 + $0x330] sm:$0xff]  ;;  %v3265_v3 = vld [vmem:[%s8390_s7 + $0x318] sm:$0xff] }
 0xb79   : > { %v3269_v8 = vld [vmem:[%s8390_s7 + $0x338] sm:$0xff]  ;;  %v5620_v5 = vcombine.high %v3264_v2, %v3268_v7  ;;  %v5619_v17 = vcombine.low %v3264_v2, %v3268_v7  ;;  %v6244_v7 = vld [vmem:[%s8392_s9 + $0x44] ss:$8 sps:$4 sm:$0xff]  }
 0xb7a   : > { %v5622_v6 = vcombine.high %v3265_v3, %v3269_v8  ;;  %v5621_v18 = vcombine.low %v3265_v3, %v3269_v8  ;;  %v6227_v19 = vld [vmem:[%s8392_s9 + $0x170] ss:$8 sps:$4 sm:$0xff]   ;;  %v6247_v3 = vld [vmem:[%s8392_s9 + $0x144] ss:$8 sps:$4 sm:$0xff]   ;;  %v6242_v8 = vld [vmem:[%s8392_s9 + $0x40] ss:$8 sps:$4 sm:$0xff]  }
 0xb7b   : > { %4071 = vmatpush1.bf16.msra.mxu0 %v5547_v11  ;;  %4114 = vmatpush1.bf16.msra.mxu1 %v5549_v15  ;;  %v3256_v11 = vld [vmem:[%s8390_s7 + $0x2d0] sm:$0xff] }
 0xb7c   : > { %4072 = vmatprep.subr.bf16.mxu0 %v5540_v1  ;;  %4115 = vmatprep.subr.bf16.mxu1 %v5542_v57  ;;  %v3260_v15 = vld [vmem:[%s8390_s7 + $0x2f0] sm:$0xff]  ;;  %v3257_v1 = vld [vmem:[%s8390_s7 + $0x2d8] sm:$0xff] }
 0xb7d   : > { %v3261_v57 = vld [vmem:[%s8390_s7 + $0x2f8] sm:$0xff]  ;;  %v5612_v21 = vcombine.high %v3256_v11, %v3260_v15  ;;  %v5611_v30 = vcombine.low %v3256_v11, %v3260_v15  ;;  %v6256_v15 = vld [vmem:[%s8392_s9 + $0x24] ss:$8 sps:$4 sm:$0xff]  }
 0xb7e   : > { %v5614_v23 = vcombine.high %v3257_v1, %v3261_v57  ;;  %v5613_v27 = vcombine.low %v3257_v1, %v3261_v57  ;;  %v6239_v2 = vld [vmem:[%s8392_s9 + $0x150] ss:$8 sps:$4 sm:$0xff]   ;;  %v6259_v1 = vld [vmem:[%s8392_s9 + $0x124] ss:$8 sps:$4 sm:$0xff]   ;;  %v6254_v57 = vld [vmem:[%s8392_s9 + $0x20] ss:$8 sps:$4 sm:$0xff]  }
 0xb7f   : > { %4073 = vmatpush1.bf16.msra.mxu0 %v5539_v24  ;;  %4116 = vmatpush1.bf16.msra.mxu1 %v5541_v25  ;;  %v3248_v24 = vld [vmem:[%s8390_s7 + $0x290] sm:$0xff] }
 0xb80   : > { %4074 = vmatprep.subr.bf16.mxu0 %v5532_v28  ;;  %4117 = vmatprep.subr.bf16.mxu1 %v5534_v29  ;;  %v3252_v25 = vld [vmem:[%s8390_s7 + $0x2b0] sm:$0xff]  ;;  %v3249_v28 = vld [vmem:[%s8390_s7 + $0x298] sm:$0xff] }
 0xb81   : > { %v3253_v29 = vld [vmem:[%s8390_s7 + $0x2b8] sm:$0xff]  ;;  %v5604_v41 = vcombine.high %v3248_v24, %v3252_v25  ;;  %v5603_v51 = vcombine.low %v3248_v24, %v3252_v25  ;;  %v6268_v25 = vld [vmem:[%s8392_s9 + $0x4] ss:$8 sps:$4 sm:$0xff]  }
 0xb82   : > { %v5606_v31 = vcombine.high %v3249_v28, %v3253_v29  ;;  %v5605_v52 = vcombine.low %v3249_v28, %v3253_v29  ;;  %v6251_v11 = vld [vmem:[%s8392_s9 + $0x130] ss:$8 sps:$4 sm:$0xff]   ;;  %v6271_v28 = vld [vmem:[%s8392_s9 + $0x104] ss:$8 sps:$4 sm:$0xff]   ;;  %v6266_v29 = vld [vmem:[%s8392_s9] ss:$8 sps:$4 sm:$0xff]  }
 0xb83   : > { %4075 = vmatpush1.bf16.msra.mxu0 %v5531_v26  ;;  %4118 = vmatpush1.bf16.msra.mxu1 %v5533_v50  ;;  %v3240_v26 = vld [vmem:[%s8390_s7 + $0x250] sm:$0xff] }
 0xb84   : > { %4076 = vmatprep.subr.bf16.mxu0 %v5524_v45  ;;  %4119 = vmatprep.subr.bf16.mxu1 %v5526_v44  ;;  %v3244_v50 = vld [vmem:[%s8390_s7 + $0x270] sm:$0xff]  ;;  %v3241_v45 = vld [vmem:[%s8390_s7 + $0x258] sm:$0xff] }
 0xb85   : > { %v3245_v44 = vld [vmem:[%s8390_s7 + $0x278] sm:$0xff]  ;;  %v5596_v54 = vcombine.high %v3240_v26, %v3244_v50  ;;  %v5595_v37 = vcombine.low %v3240_v26, %v3244_v50  ;;  %v6280_v50 = vld [vmem:[%s8392_s9 + $0xe4] ss:$8 sps:$4 sm:$0xff]  }
 0xb86   : > { %v5598_v55 = vcombine.high %v3241_v45, %v3245_v44  ;;  %v5597_v16 = vcombine.low %v3241_v45, %v3245_v44  ;;  %v6263_v24 = vld [vmem:[%s8392_s9 + $0x110] ss:$8 sps:$4 sm:$0xff]   ;;  %v6283_v45 = vld [vmem:[%s8392_s9 + $0x1e4] ss:$8 sps:$4 sm:$0xff]   ;;  %v6278_v44 = vld [vmem:[%s8392_s9 + $0xe0] ss:$8 sps:$4 sm:$0xff]  }
 0xb87   : > { %4077 = vmatpush1.bf16.msra.mxu0 %v5523_v58  ;;  %4120 = vmatpush1.bf16.msra.mxu1 %v5525_v59  ;;  %v3232_v58 = vld [vmem:[%s8390_s7 + $0x210] sm:$0xff] }
 0xb88   : > { %4078 = vmatprep.subr.bf16.mxu0 %v5644_v60  ;;  %4121 = vmatprep.subr.bf16.mxu1 %v5646_v35  ;;  %v3236_v59 = vld [vmem:[%s8390_s7 + $0x230] sm:$0xff]  ;;  %v3233_v60 = vld [vmem:[%s8390_s7 + $0x218] sm:$0xff] }
 0xb89   : > { %v3237_v35 = vld [vmem:[%s8390_s7 + $0x238] sm:$0xff]  ;;  %v5588_v38 = vcombine.high %v3232_v58, %v3236_v59 }
 0xb8a   : > { %v5590_v42 = vcombine.high %v3233_v60, %v3237_v35  ;;  %v6275_v26 = vld [vmem:[%s8392_s9 + $0x1f0] ss:$8 sps:$4 sm:$0xff]  }
 0xb8b   : > { %4079 = vmatpush2.bf16.msra.mxu0 %v5643_v46  ;;  %4122 = vmatpush2.bf16.msra.mxu1 %v5645_v9  ;;  %v5587_v46 = vcombine.low %v3232_v58, %v3236_v59  ;;  %v5589_v9 = vcombine.low %v3233_v60, %v3237_v35  ;;  %v6287_v58 = vld [vmem:[%s8392_s9 + $0x1d0] ss:$8 sps:$4 sm:$0xff]   ;;  %v6292_v59 = vld [vmem:[%s8392_s9 + $0xc4] ss:$8 sps:$4 sm:$0xff]   ;;  %v6290_v35 = vld [vmem:[%s8392_s9 + $0xc0] ss:$8 sps:$4 sm:$0xff]  }
 0xb8c   : > { %4080 = vmatprep.subr.bf16.mxu0 %v5636_v14  ;;  %4123 = vmatprep.subr.bf16.mxu1 %v5638_v56  ;;  %v6226_v14 = vld [vmem:[%s8392_s9 + $0x74] ss:$8 sps:$4 sm:$0xff]   ;;  %v6295_v60 = vld [vmem:[%s8392_s9 + $0x1c4] ss:$8 sps:$4 sm:$0xff]  }
 0xb8d   : > { %v6229_v56 = vld [vmem:[%s8392_s9 + $0x174] ss:$8 sps:$4 sm:$0xff]  }
 0xb8f   : > { %4081 = vmatpush2.bf16.msra.mxu0 %v5635_v48  ;;  %4124 = vmatpush2.bf16.msra.mxu1 %v5637_v47  ;;  %v6230_v48 = vld [vmem:[%s8392_s9 + $0x60] ss:$8 sps:$4 sm:$0xff]  }
 0xb90   : > { %4082 = vmatprep.subr.bf16.mxu0 %v5628_v62  ;;  %4125 = vmatprep.subr.bf16.mxu1 %v5630_v49  ;;  %v6233_v47 = vld [vmem:[%s8392_s9 + $0x160] ss:$8 sps:$4 sm:$0xff]   ;;  %v6238_v62 = vld [vmem:[%s8392_s9 + $0x54] ss:$8 sps:$4 sm:$0xff]   ;;  %v6236_v49 = vld [vmem:[%s8392_s9 + $0x50] ss:$8 sps:$4 sm:$0xff]  }
 0xb93   : > { %4083 = vmatpush2.bf16.msra.mxu0 %v5627_v12  ;;  %4126 = vmatpush2.bf16.msra.mxu1 %v5629_v4  ;;  %v6245_v12 = vld [vmem:[%s8392_s9 + $0x140] ss:$8 sps:$4 sm:$0xff]   ;;  %v6250_v4 = vld [vmem:[%s8392_s9 + $0x34] ss:$8 sps:$4 sm:$0xff]  }
 0xb94   : > { %4084 = vmatprep.subr.bf16.mxu0 %v5620_v5  ;;  %4127 = vmatprep.subr.bf16.mxu1 %v5622_v6  ;;  %v6253_v5 = vld [vmem:[%s8392_s9 + $0x134] ss:$8 sps:$4 sm:$0xff]   ;;  %v6248_v6 = vld [vmem:[%s8392_s9 + $0x30] ss:$8 sps:$4 sm:$0xff]  }
 0xb97   : > { %4085 = vmatpush2.bf16.msra.mxu0 %v5619_v17  ;;  %4128 = vmatpush2.bf16.msra.mxu1 %v5621_v18  ;;  %v6257_v17 = vld [vmem:[%s8392_s9 + $0x120] ss:$8 sps:$4 sm:$0xff]   ;;  %v6262_v18 = vld [vmem:[%s8392_s9 + $0x14] ss:$8 sps:$4 sm:$0xff]  }
 0xb98   : > { %4086 = vmatprep.subr.bf16.mxu0 %v5612_v21  ;;  %4129 = vmatprep.subr.bf16.mxu1 %v5614_v23  ;;  %v6265_v21 = vld [vmem:[%s8392_s9 + $0x114] ss:$8 sps:$4 sm:$0xff]   ;;  %v6260_v23 = vld [vmem:[%s8392_s9 + $0x10] ss:$8 sps:$4 sm:$0xff]  }
 0xb9b   : > { %4087 = vmatpush2.bf16.msra.mxu0 %v5611_v30  ;;  %4130 = vmatpush2.bf16.msra.mxu1 %v5613_v27  ;;  %v6269_v30 = vld [vmem:[%s8392_s9 + $0x100] ss:$8 sps:$4 sm:$0xff]   ;;  %v6274_v27 = vld [vmem:[%s8392_s9 + $0xf4] ss:$8 sps:$4 sm:$0xff]  }
 0xb9c   : > { %4088 = vmatprep.subr.bf16.mxu0 %v5604_v41  ;;  %4131 = vmatprep.subr.bf16.mxu1 %v5606_v31  ;;  %v6277_v41 = vld [vmem:[%s8392_s9 + $0x1f4] ss:$8 sps:$4 sm:$0xff]   ;;  %v6272_v31 = vld [vmem:[%s8392_s9 + $0xf0] ss:$8 sps:$4 sm:$0xff]  }
 0xb9f   : > { %4089 = vmatpush2.bf16.msra.mxu0 %v5603_v51  ;;  %4132 = vmatpush2.bf16.msra.mxu1 %v5605_v52  ;;  %v6281_v51 = vld [vmem:[%s8392_s9 + $0x1e0] ss:$8 sps:$4 sm:$0xff]   ;;  %v6286_v52 = vld [vmem:[%s8392_s9 + $0xd4] ss:$8 sps:$4 sm:$0xff]  }
 0xba0   : > { %4090 = vmatprep.subr.bf16.mxu0 %v5596_v54  ;;  %4133 = vmatprep.subr.bf16.mxu1 %v5598_v55  ;;  %v6289_v54 = vld [vmem:[%s8392_s9 + $0x1d4] ss:$8 sps:$4 sm:$0xff]   ;;  %v6284_v55 = vld [vmem:[%s8392_s9 + $0xd0] ss:$8 sps:$4 sm:$0xff]  }
 0xba3   : > { %4091 = vmatpush2.bf16.msra.mxu0 %v5595_v37  ;;  %4134 = vmatpush2.bf16.msra.mxu1 %v5597_v16  ;;  %v6293_v37 = vld [vmem:[%s8392_s9 + $0x1c0] ss:$8 sps:$4 sm:$0xff]   ;;  %v6298_v16 = vld [vmem:[%s8392_s9 + $0xb4] ss:$8 sps:$4 sm:$0xff]  }
 0xba4   : > { %4092 = vmatprep.subr.bf16.mxu0 %v5588_v38  ;;  %4135 = vmatprep.subr.bf16.mxu1 %v5590_v42  ;;  %v6301_v38 = vld [vmem:[%s8392_s9 + $0x1b4] ss:$8 sps:$4 sm:$0xff]   ;;  %v6296_v42 = vld [vmem:[%s8392_s9 + $0xb0] ss:$8 sps:$4 sm:$0xff]  }
 0xba7   : > { %4093 = vmatpush2.bf16.msra.mxu0 %v5587_v46  ;;  %4136 = vmatpush2.bf16.msra.mxu1 %v5589_v9  ;;  %v6299_v46 = vld [vmem:[%s8392_s9 + $0x1b0] ss:$8 sps:$4 sm:$0xff]   ;;  %v6304_v9 = vld [vmem:[%s8392_s9 + $0xa4] ss:$8 sps:$4 sm:$0xff]  }
 0xba8   : > { %5016 = vmatprep.subr.bf16.mxu0 %v6226_v14  ;;  %5059 = vmatprep.subr.bf16.mxu1 %v6229_v56  ;;  %v6307_v14 = vld [vmem:[%s8392_s9 + $0x1a4] ss:$8 sps:$4 sm:$0xff]   ;;  %v6302_v56 = vld [vmem:[%s8392_s9 + $0xa0] ss:$8 sps:$4 sm:$0xff]  }
 0xbaa   : > { %4095 = vmatmul.mubr.bf16.vlgmr.msra.gmra.mxu0 %v7704_v53  ;;  %4138 = vmatmul.mubr.bf16.vlgmr.msra.gmra.mxu1 %v7704_v53  ;;  %v6241_v53 = vld [vmem:[%s8392_s9 + $0x154] ss:$8 sps:$4 sm:$0xff]  }
 0xbab   : > { %5017 = vmatpush1.bf16.msra.mxu0 %v6224_v61  ;;  %5060 = vmatpush1.bf16.msra.mxu1 %v6227_v19  ;;  %v6305_v61 = vld [vmem:[%s8392_s9 + $0x1a0] ss:$8 sps:$4 sm:$0xff]   ;;  %v6310_v19 = vld [vmem:[%s8392_s9 + $0x94] ss:$8 sps:$4 sm:$0xff]  }
 0xbac   : > { %5018 = vmatprep.subr.bf16.mxu0 %v6232_v22  ;;  %5061 = vmatprep.subr.bf16.mxu1 %v6235_v10  ;;  %v6313_v22 = vld [vmem:[%s8392_s9 + $0x194] ss:$8 sps:$4 sm:$0xff]   ;;  %v6308_v10 = vld [vmem:[%s8392_s9 + $0x90] ss:$8 sps:$4 sm:$0xff]  }
 0xbaf   : > { %5019 = vmatpush1.bf16.msra.mxu0 %v6230_v48  ;;  %5062 = vmatpush1.bf16.msra.mxu1 %v6233_v47  ;;  %v6311_v48 = vld [vmem:[%s8392_s9 + $0x190] ss:$8 sps:$4 sm:$0xff]   ;;  %v6316_v47 = vld [vmem:[%s8392_s9 + $0x84] ss:$8 sps:$4 sm:$0xff]  }
 0xbb0   : > { %5020 = vmatprep.subr.bf16.mxu0 %v6238_v62  ;;  %5063 = vmatprep.subr.bf16.mxu1 %v6241_v53  ;;  %v6319_v62 = vld [vmem:[%s8392_s9 + $0x184] ss:$8 sps:$4 sm:$0xff]   ;;  %v6314_v53 = vld [vmem:[%s8392_s9 + $0x80] ss:$8 sps:$4 sm:$0xff]  }
 0xbb3   : > { %5021 = vmatpush1.bf16.msra.mxu0 %v6236_v49  ;;  %5064 = vmatpush1.bf16.msra.mxu1 %v6239_v2  ;;  %v6317_v49 = vld [vmem:[%s8392_s9 + $0x180] ss:$8 sps:$4 sm:$0xff]   ;;  %v6322_v2 = vld [vmem:[%s8392_s9 + $0x274] ss:$8 sps:$4 sm:$0xff]  }
 0xbb4   : > { %5022 = vmatprep.subr.bf16.mxu0 %v6244_v7  ;;  %5065 = vmatprep.subr.bf16.mxu1 %v6247_v3  ;;  %v6325_v7 = vld [vmem:[%s8392_s9 + $0x374] ss:$8 sps:$4 sm:$0xff]   ;;  %v8079_v3 = vld [vmem:[%s8391_s8] sm:$0xff] }
 0xbb7   : > { %5023 = vmatpush1.bf16.msra.mxu0 %v6242_v8  ;;  %5066 = vmatpush1.bf16.msra.mxu1 %v6245_v12  ;;  %v3299_v8 = vrot.slane %v8079_v3, %v7017_v40  ;;  %v3307_v12 = vrot.slane %v8079_v3, %v553_v43 }
 0xbb8   : > { %5024 = vmatprep.subr.bf16.mxu0 %v6250_v4  ;;  %5067 = vmatprep.subr.bf16.mxu1 %v6253_v5 }
 0xbbb   : > { %5025 = vmatpush1.bf16.msra.mxu0 %v6248_v6  ;;  %5068 = vmatpush1.bf16.msra.mxu1 %v6251_v11  ;;  %v3303_v6 = vrot.slane %v8079_v3, %v7064_v0  ;;  %v3311_v11 = vrot.slane %v8079_v3, %v557_v63 }
 0xbbc   : > { %5026 = vmatprep.subr.bf16.mxu0 %v6256_v15  ;;  %5069 = vmatprep.subr.bf16.mxu1 %v6259_v1 }
 0xbbf   : > { %5027 = vmatpush1.bf16.msra.mxu0 %v6254_v57  ;;  %5070 = vmatpush1.bf16.msra.mxu1 %v6257_v17 }
 0xbc0   : > { %5028 = vmatprep.subr.bf16.mxu0 %v6262_v18  ;;  %5071 = vmatprep.subr.bf16.mxu1 %v6265_v21 }
 0xbc3   : > { %5029 = vmatpush1.bf16.msra.mxu0 %v6260_v23  ;;  %5072 = vmatpush1.bf16.msra.mxu1 %v6263_v24 }
 0xbc4   : > { %5030 = vmatprep.subr.bf16.mxu0 %v6268_v25  ;;  %5073 = vmatprep.subr.bf16.mxu1 %v6271_v28 }
 0xbc7   : > { %5031 = vmatpush1.bf16.msra.mxu0 %v6266_v29  ;;  %5074 = vmatpush1.bf16.msra.mxu1 %v6269_v30 }
 0xbc8   : > { %5032 = vmatprep.subr.bf16.mxu0 %v6274_v27  ;;  %5075 = vmatprep.subr.bf16.mxu1 %v6277_v41 }
 0xbcb   : > { %5033 = vmatpush2.bf16.msra.mxu0 %v6272_v31  ;;  %5076 = vmatpush2.bf16.msra.mxu1 %v6275_v26 }
 0xbcc   : > { %5034 = vmatprep.subr.bf16.mxu0 %v6280_v50  ;;  %5077 = vmatprep.subr.bf16.mxu1 %v6283_v45 }
 0xbcf   : > { %5035 = vmatpush2.bf16.msra.mxu0 %v6278_v44  ;;  %5078 = vmatpush2.bf16.msra.mxu1 %v6281_v51 }
 0xbd0   : > { %5036 = vmatprep.subr.bf16.mxu0 %v6286_v52  ;;  %5079 = vmatprep.subr.bf16.mxu1 %v6289_v54 }
 0xbd3   : > { %5037 = vmatpush2.bf16.msra.mxu0 %v6284_v55  ;;  %5080 = vmatpush2.bf16.msra.mxu1 %v6287_v58 }
 0xbd4   : > { %5038 = vmatprep.subr.bf16.mxu0 %v6292_v59  ;;  %5081 = vmatprep.subr.bf16.mxu1 %v6295_v60 }
 0xbd7   : > { %5039 = vmatpush2.bf16.msra.mxu0 %v6290_v35  ;;  %5082 = vmatpush2.bf16.msra.mxu1 %v6293_v37 }
 0xbd8   : > { %5040 = vmatprep.subr.bf16.mxu0 %v6298_v16  ;;  %5083 = vmatprep.subr.bf16.mxu1 %v6301_v38 }
 0xbdb   : > { %5041 = vmatpush2.bf16.msra.mxu0 %v6296_v42  ;;  %5084 = vmatpush2.bf16.msra.mxu1 %v6299_v46 }
 0xbdc   : > { %5042 = vmatprep.subr.bf16.mxu0 %v6304_v9  ;;  %5085 = vmatprep.subr.bf16.mxu1 %v6307_v14 }
 0xbdf   : > { %5043 = vmatpush2.bf16.msra.mxu0 %v6302_v56  ;;  %5086 = vmatpush2.bf16.msra.mxu1 %v6305_v61 }
 0xbe0   : > { %5044 = vmatprep.subr.bf16.mxu0 %v6310_v19  ;;  %5087 = vmatprep.subr.bf16.mxu1 %v6313_v22 }
 0xbe3   : > { %5045 = vmatpush2.bf16.msra.mxu0 %v6308_v10  ;;  %5088 = vmatpush2.bf16.msra.mxu1 %v6311_v48 }
 0xbe4   : > { %5046 = vmatprep.subr.bf16.mxu0 %v6316_v47  ;;  %5089 = vmatprep.subr.bf16.mxu1 %v6319_v62 }
 0xbe7   : > { %5047 = vmatpush2.bf16.msra.mxu0 %v6314_v53  ;;  %5090 = vmatpush2.bf16.msra.mxu1 %v6317_v49 }
 0xbe8   : > { %5102 = vmatprep.subr.bf16.mxu0 %v6322_v2  ;;  %5145 = vmatprep.subr.bf16.mxu1 %v6325_v7 }
 0xc2a   : > { %v4010_v4 = vpop.f32.mrf.mxu0  ;;  %v4053_v5 = vpop.f32.mrf.mxu1 }
 0xc2b   : > { %v4011_v15 = vadd.f32 %v4010_v4, %v3299_v8  ;;  %v4054_v1 = vadd.f32 %v4053_v5, %v3307_v12 }
 0xc2c   : > { %v4012_v57 = vpop.f32.mrf.mxu0  ;;  %v4055_v17 = vpop.f32.mrf.mxu1 }
 0xc2d   : > { %v4164_v18 = vmul.f32 0.70710677, %v4011_v15  ;;  %v4166_v21 = vmul.f32 0.70710677, %v4054_v1  ;;  %v4013_v23 = vadd.f32 %v4012_v57, %v3303_v6  ;;  %v4056_v24 = vadd.f32 %v4055_v17, %v3311_v11  ;;  %v6320_v57 = vld [vmem:[%s8392_s9 + $0x270] ss:$8 sps:$4 sm:$0xff]  }
 0xc2e   : > { %v4014_v25 = vpop.f32.mrf.mxu0  ;;  %v4057_v28 = vpop.f32.mrf.mxu1  ;;  %v4148_v35 = vmul.f32 0.5, %v4011_v15  ;;  %v4150_v2 = vmul.f32 0.5, %v4054_v1  ;;  %v6328_v1 = vld [vmem:[%s8392_s9 + $0x264] ss:$8 sps:$4 sm:$0xff]  }
 0xc2f   : > { %v4015_v43 = vadd.f32 %v4014_v25, %v3299_v8  ;;  %v4058_v29 = vadd.f32 %v4057_v28, %v3307_v12  ;;  %6484 = verf.f32 %v4164_v18  ;;  %v4165_v30 = vmul.f32 0.70710677, %v4013_v23  ;;  %v6326_v25 = vld [vmem:[%s8392_s9 + $0x260] ss:$8 sps:$4 sm:$0xff]  }
 0xc30   : > { %v4016_v27 = vpop.f32.mrf.mxu0  ;;  %v4059_v41 = vpop.f32.mrf.mxu1  ;;  %6486 = verf.f32 %v4166_v21  ;;  %v4167_v31 = vmul.f32 0.70710677, %v4056_v24  ;;  %v4149_v37 = vmul.f32 0.5, %v4013_v23  ;;  %v4151_v47 = vmul.f32 0.5, %v4056_v24  ;;  %v6323_v21 = vld [vmem:[%s8392_s9 + $0x370] ss:$8 sps:$4 sm:$0xff]  }
 0xc31   : > { %v4172_v26 = vmul.f32 0.70710677, %v4015_v43  ;;  %6488 = verf.f32 %v4165_v30  ;;  %v4174_v63 = vmul.f32 0.70710677, %v4058_v29  ;;  %v4017_v50 = vadd.f32 %v4016_v27, %v3303_v6  ;;  %v6331_v24 = vld [vmem:[%s8392_s9 + $0x364] ss:$8 sps:$4 sm:$0xff]  }
 0xc32   : > { %v4060_v45 = vadd.f32 %v4059_v41, %v3311_v11  ;;  %6490 = verf.f32 %v4167_v31  ;;  %v4156_v14 = vmul.f32 0.5, %v4015_v43  ;;  %v4158_v22 = vmul.f32 0.5, %v4058_v29  ;;  %v6329_v28 = vld [vmem:[%s8392_s9 + $0x360] ss:$8 sps:$4 sm:$0xff]   ;;  %v6334_v43 = vld [vmem:[%s8392_s9 + $0x254] ss:$8 sps:$4 sm:$0xff]  }
 0xc33   : > { %6492 = verf.f32 %v4172_v26  ;;  %v4173_v44 = vmul.f32 0.70710677, %v4017_v50  ;;  %v4157_v10 = vmul.f32 0.5, %v4017_v50  ;;  %v6337_v29 = vld [vmem:[%s8392_s9 + $0x354] ss:$8 sps:$4 sm:$0xff]  }
 0xc34   : > { %6494 = verf.f32 %v4174_v63  ;;  %v4175_v51 = vmul.f32 0.70710677, %v4060_v45  ;;  %v4159_v53 = vmul.f32 0.5, %v4060_v45  ;;  %v6332_v30 = vld [vmem:[%s8392_s9 + $0x250] ss:$8 sps:$4 sm:$0xff]  }
 0xc35   : > { %6496 = verf.f32 %v4173_v44  ;;  %v6335_v27 = vld [vmem:[%s8392_s9 + $0x350] ss:$8 sps:$4 sm:$0xff]   ;;  %v6340_v41 = vld [vmem:[%s8392_s9 + $0x244] ss:$8 sps:$4 sm:$0xff]   ;;  %v6338_v26 = vld [vmem:[%s8392_s9 + $0x240] ss:$8 sps:$4 sm:$0xff]  }
 0xc36   : > { %6498 = verf.f32 %v4175_v51  ;;  %v6343_v31 = vld [vmem:[%s8392_s9 + $0x344] ss:$8 sps:$4 sm:$0xff]   ;;  %v6341_v63 = vld [vmem:[%s8392_s9 + $0x340] ss:$8 sps:$4 sm:$0xff]   ;;  %v6346_v50 = vld [vmem:[%s8392_s9 + $0x234] ss:$8 sps:$4 sm:$0xff]  }
 0xc37   : > { %v6349_v45 = vld [vmem:[%s8392_s9 + $0x334] ss:$8 sps:$4 sm:$0xff]   ;;  %v6344_v44 = vld [vmem:[%s8392_s9 + $0x230] ss:$8 sps:$4 sm:$0xff]  }
 0xc38   : > { %v6347_v51 = vld [vmem:[%s8392_s9 + $0x330] ss:$8 sps:$4 sm:$0xff]  }
 0xc3c   : > { %v6485_v52 = vpop.eup %6484 }
 0xc3d   : > { %v6487_v54 = vpop.eup %6486  ;;  %v4196_v46 = vadd.f32 1.0, %v6485_v52  ;;  %v6352_v52 = vld [vmem:[%s8392_s9 + $0x224] ss:$8 sps:$4 sm:$0xff]  }
 0xc3e   : > { %v6489_v55 = vpop.eup %6488  ;;  %v4198_v19 = vadd.f32 1.0, %v6487_v54  ;;  %v6355_v54 = vld [vmem:[%s8392_s9 + $0x324] ss:$8 sps:$4 sm:$0xff]  }
 0xc3f   : > { %v6491_v58 = vpop.eup %6490  ;;  %v4197_v16 = vadd.f32 1.0, %v6489_v55  ;;  %v4212_v4 = vmul.f32 %v4196_v46, %v4148_v35  ;;  %v6350_v55 = vld [vmem:[%s8392_s9 + $0x220] ss:$8 sps:$4 sm:$0xff]   ;;  %v6356_v35 = vld [vmem:[%s8392_s9 + $0x210] ss:$8 sps:$4 sm:$0xff]  }
 0xc40   : > { %v6493_v59 = vpop.eup %6492  ;;  %v4199_v9 = vadd.f32 1.0, %v6491_v58  ;;  %v4214_v11 = vmul.f32 %v4198_v19, %v4150_v2  ;;  %v6353_v58 = vld [vmem:[%s8392_s9 + $0x320] ss:$8 sps:$4 sm:$0xff]   ;;  %v3315_v19 = vrot.slane %v8079_v3, %v561_v13  ;;  %v3319_v13 = vrot.slane %v8079_v3, %v565_v20  ;;  %v6379_v2 = vld [vmem:[%s8392_s9 + $0x3e4] ss:$8 sps:$4 sm:$0xff]  }
 0xc41   : > { %v6495_v60 = vpop.eup %6494  ;;  %v4204_v38 = vadd.f32 1.0, %v6493_v59  ;;  %v4213_v7 = vmul.f32 %v4197_v16, %v4149_v37  ;;  %v6358_v59 = vld [vmem:[%s8392_s9 + $0x214] ss:$8 sps:$4 sm:$0xff]   ;;  %v6359_v37 = vld [vmem:[%s8392_s9 + $0x310] ss:$8 sps:$4 sm:$0xff]  }
 0xc42   : > { %v6497_v42 = vpop.eup %6496  ;;  %v4206_v56 = vadd.f32 1.0, %v6495_v60  ;;  %v4215_v5 = vmul.f32 %v4199_v9, %v4151_v47  ;;  %v6361_v60 = vld [vmem:[%s8392_s9 + $0x314] ss:$8 sps:$4 sm:$0xff]   ;;  %v6364_v16 = vld [vmem:[%s8392_s9 + $0x204] ss:$8 sps:$4 sm:$0xff]  }
 0xc43   : > { %v6499_v61 = vpop.eup %6498  ;;  %v4205_v48 = vadd.f32 1.0, %v6497_v42  ;;  %v4220_v62 = vmul.f32 %v4204_v38, %v4156_v14  ;;  %v6367_v38 = vld [vmem:[%s8392_s9 + $0x304] ss:$8 sps:$4 sm:$0xff]   ;;  %v3322_v42 = vsub.s32 6, %v7014_v39  ;;  %v6362_v46 = vld [vmem:[%s8392_s9 + $0x200] ss:$8 sps:$4 sm:$0xff]  }
 0xc44   : > { %v4207_v49 = vadd.f32 1.0, %v6499_v61  ;;  %v4222_v8 = vmul.f32 %v4206_v56, %v4158_v22  ;;  %v6365_v9 = vld [vmem:[%s8392_s9 + $0x300] ss:$8 sps:$4 sm:$0xff]   ;;  %v6370_v14 = vld [vmem:[%s8392_s9 + $0x2f4] ss:$8 sps:$4 sm:$0xff]   ;;  %v3326_v61 = vsub.s32 7, %v7014_v39 }
 0xc45   : > { %v4221_v12 = vmul.f32 %v4205_v48, %v4157_v10  ;;  %v4228_v17 = vpack.c.bf16 %v4220_v62, %v4212_v4  ;;  %v6373_v56 = vld [vmem:[%s8392_s9 + $0x3f4] ss:$8 sps:$4 sm:$0xff]   ;;  %v3323_v22 = vrot.slane %v8079_v3, %v3322_v42  ;;  %v6368_v10 = vld [vmem:[%s8392_s9 + $0x2f0] ss:$8 sps:$4 sm:$0xff]   ;;  %v6376_v47 = vld [vmem:[%s8392_s9 + $0x2e4] ss:$8 sps:$4 sm:$0xff]  }
 0xc46   : > { %v4223_v6 = vmul.f32 %v4207_v49, %v4159_v53  ;;  %v4230_v23 = vpack.c.bf16 %v4222_v8, %v4214_v11  ;;  %v6371_v48 = vld [vmem:[%s8392_s9 + $0x3f0] ss:$8 sps:$4 sm:$0xff]   ;;  %v3327_v49 = vrot.slane %v8079_v3, %v3326_v61  ;;  %v6377_v39 = vld [vmem:[%s8392_s9 + $0x3e0] ss:$8 sps:$4 sm:$0xff]  }
 0xc47   : > { %v4229_v15 = vpack.c.bf16 %v4221_v12, %v4213_v7 }
 0xc48   : > { %v4231_v18 = vpack.c.bf16 %v4223_v6, %v4215_v5  ;;  %v6374_v5 = vld [vmem:[%s8392_s9 + $0x2e0] ss:$8 sps:$4 sm:$0xff]   ;;  %v6382_v6 = vld [vmem:[%s8392_s9 + $0x2d4] ss:$8 sps:$4 sm:$0xff]  }
 0xc49   : > { %5048 = vmatprep.mubr.bf16.mxu0 %v4229_v15 }
 0xc4a   : > { %5091 = vmatprep.mubr.bf16.mxu1 %v4231_v18  ;;  %5049 = vmatmul.mubr.bf16.vlgmr.msra.gmra.mxu0 %v4228_v17  ;;  %v6385_v18 = vld [vmem:[%s8392_s9 + $0x3d4] ss:$8 sps:$4 sm:$0xff]  }
 0xc4b   : > { %5092 = vmatmul.mubr.bf16.vlgmr.msra.gmra.mxu1 %v4230_v23  ;;  %5103 = vmatpush1.bf16.msra.mxu0 %v6320_v57 }
 0xc4c   : > { %5146 = vmatpush1.bf16.msra.mxu1 %v6323_v21  ;;  %5104 = vmatprep.subr.bf16.mxu0 %v6328_v1 }
 0xc4d   : > { %5147 = vmatprep.subr.bf16.mxu1 %v6331_v24 }
 0xc4f   : > { %5105 = vmatpush1.bf16.msra.mxu0 %v6326_v25 }
 0xc50   : > { %5148 = vmatpush1.bf16.msra.mxu1 %v6329_v28  ;;  %5106 = vmatprep.subr.bf16.mxu0 %v6334_v43  ;;  %v6380_v28 = vld [vmem:[%s8392_s9 + $0x2d0] ss:$8 sps:$4 sm:$0xff]  }
 0xc51   : > { %5149 = vmatprep.subr.bf16.mxu1 %v6337_v29  ;;  %v6383_v43 = vld [vmem:[%s8392_s9 + $0x3d0] ss:$8 sps:$4 sm:$0xff]  }
 0xc53   : > { %5107 = vmatpush1.bf16.msra.mxu0 %v6332_v30 }
 0xc54   : > { %5150 = vmatpush1.bf16.msra.mxu1 %v6335_v27  ;;  %5108 = vmatprep.subr.bf16.mxu0 %v6340_v41  ;;  %v6388_v27 = vld [vmem:[%s8392_s9 + $0x2c4] ss:$8 sps:$4 sm:$0xff]  }
 0xc55   : > { %5151 = vmatprep.subr.bf16.mxu1 %v6343_v31 }
 0xc57   : > { %5109 = vmatpush1.bf16.msra.mxu0 %v6338_v26 }
 0xc58   : > { %5152 = vmatpush1.bf16.msra.mxu1 %v6341_v63  ;;  %5110 = vmatprep.subr.bf16.mxu0 %v6346_v50  ;;  %v6391_v63 = vld [vmem:[%s8392_s9 + $0x3c4] ss:$8 sps:$4 sm:$0xff]  }
 0xc59   : > { %5153 = vmatprep.subr.bf16.mxu1 %v6349_v45  ;;  %v6386_v45 = vld [vmem:[%s8392_s9 + $0x2c0] ss:$8 sps:$4 sm:$0xff]  }
 0xc5b   : > { %5111 = vmatpush1.bf16.msra.mxu0 %v6344_v44 }
 0xc5c   : > { %5154 = vmatpush1.bf16.msra.mxu1 %v6347_v51  ;;  %5112 = vmatprep.subr.bf16.mxu0 %v6352_v52  ;;  %v6389_v51 = vld [vmem:[%s8392_s9 + $0x3c0] ss:$8 sps:$4 sm:$0xff]   ;;  %v6394_v52 = vld [vmem:[%s8392_s9 + $0x2b4] ss:$8 sps:$4 sm:$0xff]  }
 0xc5d   : > { %5155 = vmatprep.subr.bf16.mxu1 %v6355_v54  ;;  %v6397_v54 = vld [vmem:[%s8392_s9 + $0x3b4] ss:$8 sps:$4 sm:$0xff]  }
 0xc5f   : > { %5113 = vmatpush1.bf16.msra.mxu0 %v6350_v55  ;;  %v6392_v55 = vld [vmem:[%s8392_s9 + $0x2b0] ss:$8 sps:$4 sm:$0xff]  }
 0xc60   : > { %5156 = vmatpush1.bf16.msra.mxu1 %v6353_v58  ;;  %5114 = vmatprep.subr.bf16.mxu0 %v6358_v59  ;;  %v6395_v58 = vld [vmem:[%s8392_s9 + $0x3b0] ss:$8 sps:$4 sm:$0xff]   ;;  %v6400_v59 = vld [vmem:[%s8392_s9 + $0x2a4] ss:$8 sps:$4 sm:$0xff]  }
 0xc61   : > { %5157 = vmatprep.subr.bf16.mxu1 %v6361_v60  ;;  %v6403_v60 = vld [vmem:[%s8392_s9 + $0x3a4] ss:$8 sps:$4 sm:$0xff]  }
 0xc63   : > { %5115 = vmatpush1.bf16.msra.mxu0 %v6356_v35  ;;  %v6398_v35 = vld [vmem:[%s8392_s9 + $0x2a0] ss:$8 sps:$4 sm:$0xff]  }
 0xc64   : > { %5158 = vmatpush1.bf16.msra.mxu1 %v6359_v37  ;;  %5116 = vmatprep.subr.bf16.mxu0 %v6364_v16  ;;  %v6401_v16 = vld [vmem:[%s8392_s9 + $0x3a0] ss:$8 sps:$4 sm:$0xff]  }
 0xc65   : > { %5159 = vmatprep.subr.bf16.mxu1 %v6367_v38  ;;  %v6406_v38 = vld [vmem:[%s8392_s9 + $0x294] ss:$8 sps:$4 sm:$0xff]  }
 0xc67   : > { %5117 = vmatpush1.bf16.msra.mxu0 %v6362_v46  ;;  %v6409_v46 = vld [vmem:[%s8392_s9 + $0x394] ss:$8 sps:$4 sm:$0xff]  }
 0xc68   : > { %5160 = vmatpush1.bf16.msra.mxu1 %v6365_v9  ;;  %5118 = vmatprep.subr.bf16.mxu0 %v6370_v14 }
 0xc69   : > { %5161 = vmatprep.subr.bf16.mxu1 %v6373_v56  ;;  %v6404_v56 = vld [vmem:[%s8392_s9 + $0x290] ss:$8 sps:$4 sm:$0xff]  }
 0xc6a   : > { %v4096_v62 = vpop.f32.mrf.mxu0  ;;  %v4139_v53 = vpop.f32.mrf.mxu1 }
 0xc6b   : > { %v8209_v7 = vadd.f32 %v4096_v62, %v3315_v19  ;;  %v8211_v8 = vadd.f32 %v4139_v53, %v3323_v22  ;;  %5119 = vmatpush2.bf16.msra.mxu0 %v6368_v10 }
 0xc6c   : > { %v4098_v12 = vpop.f32.mrf.mxu0  ;;  %v4141_v4 = vpop.f32.mrf.mxu1  ;;  %5162 = vmatpush2.bf16.msra.mxu1 %v6371_v48  ;;  %5120 = vmatprep.subr.bf16.mxu0 %v6376_v47 }
 0xc6d   : > { %v4168_v20 = vmul.f32 0.70710677, %v8209_v7  ;;  %v4170_v3 = vmul.f32 0.70710677, %v8211_v8  ;;  %v8224_v11 = vadd.f32 %v4098_v12, %v3319_v13  ;;  %v8226_v15 = vadd.f32 %v4141_v4, %v3327_v49  ;;  %5163 = vmatprep.subr.bf16.mxu1 %v6379_v2 }
 0xc6e   : > { %v4100_v57 = vpop.f32.mrf.mxu0  ;;  %v4143_v17 = vpop.f32.mrf.mxu1  ;;  %v4152_v48 = vmul.f32 0.5, %v8209_v7 }
 0xc6f   : > { %v8231_v21 = vadd.f32 %v4100_v57, %v3315_v19  ;;  %v8233_v1 = vadd.f32 %v4143_v17, %v3323_v22  ;;  %6500 = verf.f32 %v4168_v20  ;;  %v4169_v23 = vmul.f32 0.70710677, %v8224_v11  ;;  %5121 = vmatpush2.bf16.msra.mxu0 %v6374_v5  ;;  %v6407_v19 = vld [vmem:[%s8392_s9 + $0x390] ss:$8 sps:$4 sm:$0xff]   ;;  %v6412_v22 = vld [vmem:[%s8392_s9 + $0x284] ss:$8 sps:$4 sm:$0xff]  }
 0xc70   : > { %v4102_v24 = vpop.f32.mrf.mxu0  ;;  %v4145_v25 = vpop.f32.mrf.mxu1  ;;  %6502 = verf.f32 %v4170_v3  ;;  %v4171_v29 = vmul.f32 0.70710677, %v8226_v15  ;;  %5164 = vmatpush2.bf16.msra.mxu1 %v6377_v39  ;;  %5122 = vmatprep.subr.bf16.mxu0 %v6382_v6  ;;  %v4153_v47 = vmul.f32 0.5, %v8224_v11  ;;  %v6410_v11 = vld [vmem:[%s8392_s9 + $0x280] ss:$8 sps:$4 sm:$0xff]   ;;  %v4155_v57 = vmul.f32 0.5, %v8226_v15 }
 0xc71   : > { %v4176_v30 = vmul.f32 0.70710677, %v8231_v21  ;;  %6504 = verf.f32 %v4169_v23  ;;  %v4178_v41 = vmul.f32 0.70710677, %v8233_v1  ;;  %v4103_v31 = vadd.f32 %v4102_v24, %v3319_v13  ;;  %5165 = vmatprep.subr.bf16.mxu1 %v6385_v18  ;;  %v6415_v13 = vld [vmem:[%s8392_s9 + $0x384] ss:$8 sps:$4 sm:$0xff]  }
 0xc72   : > { %v8248_v26 = vadd.f32 %v4145_v25, %v3327_v49  ;;  %6506 = verf.f32 %v4171_v29  ;;  %v4160_v4 = vmul.f32 0.5, %v8231_v21  ;;  %v4162_v3 = vmul.f32 0.5, %v8233_v1  ;;  %v6413_v21 = vld [vmem:[%s8392_s9 + $0x380] ss:$8 sps:$4 sm:$0xff]  }
 0xc73   : > { %6508 = verf.f32 %v4176_v30  ;;  %v4177_v50 = vmul.f32 0.70710677, %v4103_v31  ;;  %5123 = vmatpush2.bf16.msra.mxu0 %v6380_v28  ;;  %v4161_v7 = vmul.f32 0.5, %v4103_v31  ;;  %v4154_v1 = vmul.f32 0.5, %v8211_v8 }
 0xc74   : > { %6510 = verf.f32 %v4178_v41  ;;  %v4179_v44 = vmul.f32 0.70710677, %v8248_v26  ;;  %5166 = vmatpush2.bf16.msra.mxu1 %v6383_v43  ;;  %5124 = vmatprep.subr.bf16.mxu0 %v6388_v27  ;;  %v4163_v18 = vmul.f32 0.5, %v8248_v26 }
 0xc75   : > { %6512 = verf.f32 %v4177_v50  ;;  %5167 = vmatprep.subr.bf16.mxu1 %v6391_v63  ;;  %v4364_v50 = vld [vmem:[%s8393_s10] sm:$0x3] }
 0xc76   : > { %6514 = verf.f32 %v4179_v44  ;;  %v4369_v44 = vrot.slane %v4364_v50, %v7017_v40 }
 0xc77   : > { %5125 = vmatpush2.bf16.msra.mxu0 %v6386_v45 }
 0xc78   : > { %5168 = vmatpush2.bf16.msra.mxu1 %v6389_v51  ;;  %5126 = vmatprep.subr.bf16.mxu0 %v6394_v52  ;;  %v4373_v52 = vrot.slane %v4364_v50, %v7064_v0 }
 0xc79   : > { %5169 = vmatprep.subr.bf16.mxu1 %v6397_v54 }
 0xc7b   : > { %5127 = vmatpush2.bf16.msra.mxu0 %v6392_v55 }
 0xc7c   : > { %v6501_v37 = vpop.eup %6500  ;;  %5170 = vmatpush2.bf16.msra.mxu1 %v6395_v58  ;;  %5128 = vmatprep.subr.bf16.mxu0 %v6400_v59 }
 0xc7d   : > { %v6503_v42 = vpop.eup %6502  ;;  %5171 = vmatprep.subr.bf16.mxu1 %v6403_v60  ;;  %v4200_v2 = vadd.f32 1.0, %v6501_v37 }
 0xc7e   : > { %v6505_v9 = vpop.eup %6504  ;;  %v4202_v20 = vadd.f32 1.0, %v6503_v42 }
 0xc7f   : > { %v6507_v14 = vpop.eup %6506  ;;  %5129 = vmatpush2.bf16.msra.mxu0 %v6398_v35  ;;  %v4201_v62 = vadd.f32 1.0, %v6505_v9  ;;  %v4216_v43 = vmul.f32 %v4200_v2, %v4152_v48 }
 0xc80   : > { %v6509_v61 = vpop.eup %6508  ;;  %5172 = vmatpush2.bf16.msra.mxu1 %v6401_v16  ;;  %5130 = vmatprep.subr.bf16.mxu0 %v6406_v38  ;;  %v4203_v12 = vadd.f32 1.0, %v6507_v14  ;;  %v4218_v15 = vmul.f32 %v4202_v20, %v4154_v1 }
 0xc81   : > { %v6511_v10 = vpop.eup %6510  ;;  %v4208_v53 = vadd.f32 1.0, %v6509_v61  ;;  %5173 = vmatprep.subr.bf16.mxu1 %v6409_v46  ;;  %v4217_v24 = vmul.f32 %v4201_v62, %v4153_v47 }
 0xc82   : > { %v6513_v49 = vpop.eup %6512  ;;  %v4210_v5 = vadd.f32 1.0, %v6511_v10  ;;  %v4219_v29 = vmul.f32 %v4203_v12, %v4155_v57 }
 0xc83   : > { %v6515_v39 = vpop.eup %6514  ;;  %v4209_v6 = vadd.f32 1.0, %v6513_v49  ;;  %5131 = vmatpush2.bf16.msra.mxu0 %v6404_v56  ;;  %v4224_v17 = vmul.f32 %v4208_v53, %v4160_v4 }
 0xc84   : > { %v4211_v23 = vadd.f32 1.0, %v6515_v39  ;;  %5174 = vmatpush2.bf16.msra.mxu1 %v6407_v19  ;;  %5132 = vmatprep.subr.bf16.mxu0 %v6412_v22  ;;  %v4226_v25 = vmul.f32 %v4210_v5, %v4162_v3 }
 0xc85   : > { %v4225_v28 = vmul.f32 %v4209_v6, %v4161_v7  ;;  %5175 = vmatprep.subr.bf16.mxu1 %v6415_v13  ;;  %v4232_v41 = vpack.c.bf16 %v4224_v17, %v4216_v43 }
 0xc86   : > { %v4227_v30 = vmul.f32 %v4211_v23, %v4163_v18  ;;  %v4234_v26 = vpack.c.bf16 %v4226_v25, %v4218_v15 }
 0xc87   : > { %5133 = vmatpush2.bf16.msra.mxu0 %v6410_v11  ;;  %v4233_v27 = vpack.c.bf16 %v4225_v28, %v4217_v24 }
 0xc88   : > { %5176 = vmatpush2.bf16.msra.mxu1 %v6413_v21  ;;  %v4235_v31 = vpack.c.bf16 %v4227_v30, %v4219_v29 }
 0xc89   : > { %5134 = vmatprep.mubr.bf16.mxu0 %v4233_v27 }
 0xc8a   : > { %5177 = vmatprep.mubr.bf16.mxu1 %v4235_v31  ;;  %5135 = vmatmul.mubr.bf16.vlgmr.msra.gmra.mxu0 %v4232_v41 }
 0xc8b   : > { %5178 = vmatmul.mubr.bf16.vlgmr.msra.gmra.mxu1 %v4234_v26  ;;  %v5192_v26 = vld [vmem:[%s8394_s11] sm:$0x3] }
 0xc8c   : > { %v5234_v50 = vrot.slane %v5192_v26, %v7064_v0 }
 0xd0a   : > { %v5050_v63 = vpop.f32.mrf.mxu0 }
 0xd0b   : > { %v5093_v8 = vpop.f32.mrf.mxu1  ;;  %v5051_v55 = vadd.f32 %v5050_v63, %v4369_v44  ;;  %v5193_v63 = vld [vmem:[%s8395_s12] sm:$0x3] }
 0xd0c   : > { %v5052_v45 = vpop.f32.mrf.mxu0 }
 0xd0d   : > { %v5095_v51 = vpop.f32.mrf.mxu1  ;;  %v5053_v59 = vadd.f32 %v5052_v45, %v4373_v52  ;;  %v5094_v35 = vadd.f32 %v5093_v8, %v5051_v55  ;;  %v5230_v8 = vrot.slane %v5192_v26, %v7017_v40 }
 0xd0e   : > { %v5054_v54 = vpop.f32.mrf.mxu0 }
 0xd0f   : > { %v5097_v58 = vpop.f32.mrf.mxu1  ;;  %v5055_v37 = vadd.f32 %v5054_v54, %v4369_v44  ;;  %v5096_v42 = vadd.f32 %v5095_v51, %v5053_v59  ;;  %v5245_v44 = vrot.slane %v5193_v63, %v7017_v40  ;;  %v5249_v51 = vrot.slane %v5193_v63, %v7064_v0 }
 0xd10   : > { %v5056_v60 = vpop.f32.mrf.mxu0 }
 0xd11   : > { %v5099_v16 = vpop.f32.mrf.mxu1  ;;  %v5057_v46 = vadd.f32 %v5056_v60, %v4373_v52  ;;  %v5098_v61 = vadd.f32 %v5097_v58, %v5055_v37 }
 0xd13   : > { %v5100_v47 = vadd.f32 %v5099_v16, %v5057_v46 }
 0xd4a   : > { %v5136_v38 = vpop.f32.mrf.mxu0 }
 0xd4b   : > { %v5137_v9 = vadd.f32 %v5136_v38, %v5094_v35  ;;  %v5179_v14 = vpop.f32.mrf.mxu1 }
 0xd4c   : > { %v5138_v56 = vpop.f32.mrf.mxu0 }
 0xd4d   : > { %v5180_v19 = vadd.f32 %v5179_v14, %v5137_v9  ;;  %v5139_v22 = vadd.f32 %v5138_v56, %v5096_v42  ;;  %v5181_v10 = vpop.f32.mrf.mxu1 }
 0xd4e   : > { %v5140_v48 = vpop.f32.mrf.mxu0 }
 0xd4f   : > { %v5182_v62 = vadd.f32 %v5181_v10, %v5139_v22  ;;  %v5141_v53 = vadd.f32 %v5140_v48, %v5098_v61  ;;  %v5183_v13 = vpop.f32.mrf.mxu1  ;;  %v5188_v2 = vadd.f32 %v5180_v19, %v7684_v36 }
 0xd50   : > { %v5142_v49 = vpop.f32.mrf.mxu0 }
 0xd51   : > { %v5189_v12 = vadd.f32 %v5182_v62, %v7680_v32  ;;  %v5184_v4 = vadd.f32 %v5183_v13, %v5141_v53  ;;  %v5143_v5 = vadd.f32 %v5142_v49, %v5100_v47  ;;  %v5185_v39 = vpop.f32.mrf.mxu1 }
 0xd53   : > { %v5186_v20 = vadd.f32 %v5185_v39, %v5143_v5  ;;  %v5194_v3 = vadd.f32 %v5189_v12, %v5188_v2  ;;  %v5190_v7 = vadd.f32 %v5184_v4, %v7686_v34 }
 0xd55   : > { %v5191_v6 = vadd.f32 %v5186_v20, %v7682_v33  ;;  %5195 = vadd.xlane.f32.xlu1 %v5194_v3 }
 0xd57   : > { %v5197_v11 = vadd.f32 %v5191_v6, %v5190_v7 }
 0xd59   : > { %5198 = vadd.xlane.f32.xlu0 %v5197_v11 }
 0xdde   : > { %v5196_v57 = vpop.xlane.xlu1 %5195 }
 0xddf   : > { %v5200_v17 = vmul.f32 0.00390625, %v5196_v57 }
 0xde1   : > { %v5202_v18 = vsub.f32 %v5188_v2, %v5200_v17  ;;  %v5203_v23 = vsub.f32 %v5189_v12, %v5200_v17 }
 0xde2   : > { %v5199_v21 = vpop.xlane.xlu0 %5198 }
 0xde3   : > { %v5201_v36 = vmul.f32 0.00390625, %v5199_v21  ;;  %v5206_v1 = vmul.f32 %v5202_v18, %v5202_v18  ;;  %v5207_v32 = vmul.f32 %v5203_v23, %v5203_v23 }
 0xde5   : > { %v5204_v24 = vsub.f32 %v5190_v7, %v5201_v36  ;;  %v5205_v25 = vsub.f32 %v5191_v6, %v5201_v36  ;;  %v5210_v28 = vadd.f32 %v5207_v32, %v5206_v1 }
 0xde7   : > { %5211 = vadd.xlane.f32.xlu1 %v5210_v28  ;;  %v5208_v43 = vmul.f32 %v5204_v24, %v5204_v24  ;;  %v5209_v34 = vmul.f32 %v5205_v25, %v5205_v25 }
 0xde9   : > { %v5213_v29 = vadd.f32 %v5209_v34, %v5208_v43 }
 0xdeb   : > { %5214 = vadd.xlane.f32.xlu0 %v5213_v29 }
 0xe70   : > { %v5212_v33 = vpop.xlane.xlu1 %5211 }
 0xe71   : > { %v5216_v30 = vmul.f32 0.00390625, %v5212_v33 }
 0xe73   : > { %v5218_v15 = vadd.f32 1e-05, %v5216_v30 }
 0xe74   : > { %v5215_v27 = vpop.xlane.xlu0 %5214 }
 0xe75   : > { %6516 = vrsqrt.f32 %v5218_v15  ;;  %v5217_v41 = vmul.f32 0.00390625, %v5215_v27 }
 0xe77   : > { %v5219_v31 = vadd.f32 1e-05, %v5217_v41 }
 0xe79   : > { %6518 = vrsqrt.f32 %v5219_v31 }
 0xe82   : > { %v6517_v45 = vpop.eup %6516 }
 0xe83   : > { %v5222_v52 = vmul.f32 %v6517_v45, %v5202_v18  ;;  %v5223_v54 = vmul.f32 %v6517_v45, %v5203_v23 }
 0xe85   : > { %v5237_v55 = vmul.f32 %v5230_v8, %v5222_v52  ;;  %v5238_v58 = vmul.f32 %v5234_v50, %v5223_v54 }
 0xe86   : > { %v6519_v59 = vpop.eup %6518 }
 0xe87   : > { %v5252_v60 = vadd.f32 %v5245_v44, %v5237_v55  ;;  %v5253_v35 = vadd.f32 %v5249_v51, %v5238_v58  ;;  %v5224_v37 = vmul.f32 %v6519_v59, %v5204_v24  ;;  %v5225_v16 = vmul.f32 %v6519_v59, %v5205_v25 }
 0xe89   : > { %v5239_v38 = vmul.f32 %v5230_v8, %v5224_v37  ;;  %v5240_v42 = vmul.f32 %v5234_v50, %v5225_v16  ;;  %5256 = vst [vmem:[%s433_s30] sm:$0xff] %v5252_v60  ;;  %5257 = vst [vmem:[%s433_s30 + $0x8] sm:$0xff] %v5253_v35 }
 0xe8b   : > { %v5254_v40 = vadd.f32 %v5245_v44, %v5239_v38  ;;  %v5255_v0 = vadd.f32 %v5249_v51, %v5240_v42 }
 0xe8d   : > { %5258 = vst [vmem:[%s433_s30 + $0x10] sm:$0xff] %v5254_v40  ;;  %5259 = vst [vmem:[%s433_s30 + $0x18] sm:$0xff] %v5255_v0 }
 0xe8e   : > { %6537 = shalt.err (!%p6534_p3)
}
 0xe8f   : > { %s6538_s14 = scalar_lea.hbm %s8339_s27, 512  ;;  %s6542_s30 = scalar_lea.hbm %s8396_s13, 1024 }
 0xe90   : > { %p6539_p4 = scmp.ne.s32.totalorder %s8339_s27, %s6538_s14  ;;  %p6543_p9 = scmp.lt.s32.totalorder %s8339_s27, %s8396_s13 }
 0xe91   : > { %p6544_p10 = scmp.lt.s32.totalorder %s6542_s30, %s6538_s14 }
 0xe92   : > { %p6540_p7 = pnand %p6539_p4, %p6700_p5 }
 0xe93   : > { %p6545_p11 = por %p6544_p10, %p6543_p9 }
 0xe94   : > { %p6541_p8 = pneg %p6540_p7 }
 0xe96   : > { %p6546_p12 = pnand %p6545_p11, %p6541_p8 }
 0xe98   : > { %6549 = shalt.err (!%p6546_p12)
}
 0xe99   : > { %s6590_s17 = smov 256   ;;  %s6591_s20 = smov 16  }
 0xe9a   : > { %5958 = dma.vmem_to_hbm [thread:$0]  (%p6700_p5), %s8341_s19, 512, %s8339_s27, %s8343_s29, %s6590_s17, %s6590_s17, %s6591_s20  }
 0xe9b PF: > { %p5964_p13 = scmp.ge.s32.totalorder %s6584_s28, 2  ;;  %s5289_s24 = sand.u32 1, %s6572_s25  }
 0xe9c   : > { %s5290_s14 = scalar_lea.sflag [#allocation3], %s5289_s24 }
 0xe9d   : > { %p5961_p0 = pnand %p5964_p13, %p6704_p6 }
 0xe9f   : > { %p5962_p1 = pneg %p5961_p0 }
 0xea1   : > { %6567 = dma.done.wait (%p5962_p1), %s5290_s14, 512  }
 0xea2   : > { %6569 = vsyncadd (%p5962_p1), %s5290_s14, 4294966784  ;;  %s8408_s28 = sld [smem:[#allocation6_spill]]  ;;  %s8411_s25 = smov %s6576_s26 }
 0xea3   : > { %s8409_s22 = sld [smem:[#allocation5_spill]] }
 0xea4   : > { %s8410_s27 = sld [smem:[#allocation7_spill]] }
 0xea8   : > { %p23_p2 = scmp.ge.s32.totalorder %s8408_s28, 4  }
 0xea9   : > { %s8412_s26 = smov %s8409_s22 }
 0xeaa   :  { %25 = sbr.rel (!%p23_p2) target bundleno = 3 (0x3), region = 107 }
 0xeaf   :  { %5295 = vsyncpa [#allocation3], 1 }
 0xeb0   :  { %5297 = vsyncpa [#allocation3 + $0x1], 1 }

</bundles_post_ra>
